<compile_context>
chip_gen: v7x
topology: tpu7x:2x2x1
jax: 0.10.0
libtpu: 0.0.40
codegen_flags: <defaults>
</compile_context>

<pallas_src>
import functools

import jax
import jax.numpy as jnp
from jax.experimental import pallas as pl
from jax.experimental.pallas import tpu as pltpu

_EPS = 1e-5
_LANE = 128
_VMEM_LIMIT = 48 * 1024 * 1024      # scoped VMEM budget; below v7x's 64 MiB


def _round_up(x, m):
    return (x + m - 1) // m * m


def _pick_row_tile(h, w, ci, cp, budget_bytes=12 * 1024 * 1024):
    """Largest even row tile that divides H, keeps >=2 row tiles (so the halo
    path is exercised), and keeps the per-step working set (f32 input tile +
    bf16 padded tile + bf16 im2col + f32 output tile, x2 for double
    buffering) well inside VMEM -- sized with v7x's 64 MiB in mind."""
    for th in (32, 16, 8, 4, 2):
        if h % th:
            continue
        if th > 2 and h // th < 2:
            continue
        est = 2 * th * w * (4 * ci + 2 * ci + 2 * 9 * ci + 4 * cp)
        if est <= budget_bytes:
            return th
    return h


# ----------------------------------------------------------------------------
# Kernel 1: tiled Conv2d(3x3, pad=1) pass (optionally fused with the previous
# layer's BN+ReLU on the input) + single-pass BatchNorm partial statistics.
# ----------------------------------------------------------------------------
def _conv_pass_kernel(xc_ref, xu_ref, xd_ref, w_ref, scale_ref, shift_ref,
                      y_ref, stats_ref, pad_ref, im_ref, *, apply_input_act):
    """One (1, TH, W, Ci) row tile -> (1, TH, W, Cp) pre-BN conv output tile
    plus per-channel (sum, sum_sq) partials for the batch statistics."""
    _, th, w, ci = xc_ref.shape
    cp = y_ref.shape[-1]
    hh = pl.program_id(1)
    nh = pl.num_programs(1)

    def act(v):
        if apply_input_act:
            # previous layer's BN+ReLU folded into this load
            v = jnp.maximum(v * scale_ref[...] + shift_ref[...], 0.0)
        return v.astype(jnp.bfloat16)

    xc = act(xc_ref[...])                                    # (1, th, w, ci)
    # 1-row halos; rows outside the image are zero (pad=1 in activation space)
    xu = jnp.where(hh > 0, act(xu_ref[...]), 0.0).astype(jnp.bfloat16)
    xd = jnp.where(hh < nh - 1, act(xd_ref[...]), 0.0).astype(jnp.bfloat16)

    # assemble the zero-padded (th+2, w+2) input tile in a VMEM scratch
    pad_ref[...] = jnp.zeros_like(pad_ref)
    pad_ref[:, 1:th + 1, 1:w + 1, :] = xc
    pad_ref[:, 0:1, 1:w + 1, :] = xu
    pad_ref[:, th + 1:th + 2, 1:w + 1, :] = xd

    # im2col: (th*w, 9*ci), taps ordered (dy, dx) major / channel minor --
    # matches the host-side reshape of the HWIO weight to (9*ci, cp).
    t = 0
    for dy in range(3):
        for dx in range(3):
            im_ref[:, t * ci:(t + 1) * ci] = (
                pad_ref[:, dy:dy + th, dx:dx + w, :].reshape(th * w, ci))
            t += 1

    # single MXU matmul: bf16 operands, f32 accumulation
    acc = jax.lax.dot_general(
        im_ref[...], w_ref[...],
        dimension_numbers=(((1,), (0,)), ((), ())),
        preferred_element_type=jnp.float32)                  # (th*w, cp)

    y_ref[...] = acc.reshape(1, th, w, cp)

    # single-pass BatchNorm partials: per-channel sum and sum-of-squares
    s = jnp.sum(acc, axis=0, keepdims=True)                  # (1, cp)
    ss = jnp.sum(acc * acc, axis=0, keepdims=True)           # (1, cp)
    stats_ref[...] = jnp.concatenate([s, ss], axis=0).reshape(1, 1, 2, cp)


def _conv_pass(x, w2d, scale_in, shift_in, cp_out, th, *, apply_input_act):
    """Tiled conv layer. x: (N, H, W, Ci) f32; w2d: (9*Ci, cp_out) bf16.
    Returns pre-BN conv output (N, H, W, cp_out) f32 and per-tile BN partials
    (N, H//th, 2, cp_out) f32."""
    n, h, w, ci = x.shape
    nh = h // th
    kernel = functools.partial(_conv_pass_kernel,
                               apply_input_act=apply_input_act)
    return pl.pallas_call(
        kernel,
        out_shape=(
            jax.ShapeDtypeStruct((n, h, w, cp_out), jnp.float32),
            jax.ShapeDtypeStruct((n, nh, 2, cp_out), jnp.float32),
        ),
        grid=(n, nh),
        in_specs=[
            # row tile + its two 1-row halo neighbours (index clamped at the
            # image edges; the kernel zero-masks out-of-image rows)
            pl.BlockSpec((1, th, w, ci), lambda i, j: (i, j, 0, 0)),
            pl.BlockSpec((1, 1, w, ci),
                         lambda i, j: (i, jnp.maximum(j * th - 1, 0), 0, 0)),
            pl.BlockSpec((1, 1, w, ci),
                         lambda i, j: (i, jnp.minimum((j + 1) * th, h - 1),
                                       0, 0)),
            pl.BlockSpec((9 * ci, cp_out), lambda i, j: (0, 0)),
            pl.BlockSpec((1, ci), lambda i, j: (0, 0)),
            pl.BlockSpec((1, ci), lambda i, j: (0, 0)),
        ],
        out_specs=(
            pl.BlockSpec((1, th, w, cp_out), lambda i, j: (i, j, 0, 0)),
            pl.BlockSpec((1, 1, 2, cp_out), lambda i, j: (i, j, 0, 0)),
        ),
        scratch_shapes=[
            pltpu.VMEM((1, th + 2, w + 2, ci), jnp.bfloat16),   # padded tile
            pltpu.VMEM((th * w, 9 * ci), jnp.bfloat16),         # im2col
        ],
        compiler_params=pltpu.CompilerParams(
            dimension_semantics=("parallel", "parallel"),
            vmem_limit_bytes=_VMEM_LIMIT),
    )(x, x, x, w2d, scale_in, shift_in)


# ----------------------------------------------------------------------------
# Kernel 2: BN (precomputed scale/shift) + ReLU epilogue, optionally fused
# with the 2x2 stride-2 max-pool.
# ----------------------------------------------------------------------------
def _bn_relu_pool_kernel(y_ref, scale_ref, shift_ref, bp_ref, pool_ref):
    _, th, w, cp = y_ref.shape
    th2, w2 = th // 2, w // 2
    a = jnp.maximum(y_ref[...] * scale_ref[...] + shift_ref[...], 0.0)
    bp_ref[...] = a
    # fused 2x2 stride-2 max-pool: strided lane-dense reads along W from the
    # tile just written, then pairwise max along H (layout-preserving reshape
    # of a major dim).
    pw = jnp.maximum(bp_ref[:, :, pl.ds(0, w2, stride=2), :],
                     bp_ref[:, :, pl.ds(1, w2, stride=2), :])  # (1, th, w2, cp)
    pr = pw.reshape(1, th2, 2, w2, cp)
    pool_ref[...] = jnp.maximum(pr[:, :, 0], pr[:, :, 1])


def _bn_relu_kernel(y_ref, scale_ref, shift_ref, bp_ref):
    bp_ref[...] = jnp.maximum(y_ref[...] * scale_ref[...] + shift_ref[...],
                              0.0)


def _bn_relu_finalize(y, scale, shift, th, pooling):
    n, h, w, cp = y.shape
    nh = h // th
    in_specs = [
        pl.BlockSpec((1, th, w, cp), lambda i, j: (i, j, 0, 0)),
        pl.BlockSpec((1, cp), lambda i, j: (0, 0)),
        pl.BlockSpec((1, cp), lambda i, j: (0, 0)),
    ]
    cparams = pltpu.CompilerParams(
        dimension_semantics=("parallel", "parallel"),
        vmem_limit_bytes=_VMEM_LIMIT)
    if pooling:
        return pl.pallas_call(
            _bn_relu_pool_kernel,
            out_shape=(
                jax.ShapeDtypeStruct((n, h, w, cp), jnp.float32),
                jax.ShapeDtypeStruct((n, h // 2, w // 2, cp), jnp.float32),
            ),
            grid=(n, nh),
            in_specs=in_specs,
            out_specs=(
                pl.BlockSpec((1, th, w, cp), lambda i, j: (i, j, 0, 0)),
                pl.BlockSpec((1, th // 2, w // 2, cp),
                             lambda i, j: (i, j, 0, 0)),
            ),
            compiler_params=cparams,
        )(y, scale, shift)
    before_pool = pl.pallas_call(
        _bn_relu_kernel,
        out_shape=jax.ShapeDtypeStruct((n, h, w, cp), jnp.float32),
        grid=(n, nh),
        in_specs=in_specs,
        out_specs=pl.BlockSpec((1, th, w, cp), lambda i, j: (i, j, 0, 0)),
        compiler_params=cparams,
    )(y, scale, shift)
    return before_pool, before_pool


def _bn_scale_shift(stats, gamma, beta, count):
    """Per-tile (sum, sum_sq) partials -> BN scale/shift (training-mode batch
    statistics, biased variance, eps=1e-5)."""
    sums = jnp.sum(stats, axis=(0, 1))             # (2, Cp)
    mean = sums[0] / count
    var = jnp.maximum(sums[1] / count - mean * mean, 0.0)
    inv = jax.lax.rsqrt(var + _EPS)
    scale = gamma * inv
    shift = beta - mean * scale
    return scale.reshape(1, -1), shift.reshape(1, -1)


# ----------------------------------------------------------------------------
# DownBlock forward
# ----------------------------------------------------------------------------
@functools.partial(jax.jit, static_argnames=("pooling",))
def down_block_forward(x_nchw, params, pooling=True):
    """Mirrors DownBlock.forward. Input/outputs are NCHW like PyTorch."""
    x = jnp.transpose(x_nchw, (0, 2, 3, 1)).astype(jnp.float32)   # -> NHWC
    n, h, w, cin = x.shape
    cout = params["w1"].shape[-1]
    cp = _round_up(cout, _LANE)                     # lane-dense channel count
    th = _pick_row_tile(h, w, max(cin, cp), cp)
    assert h % th == 0
    if pooling:
        assert h % 2 == 0 and w % 2 == 0 and th % 2 == 0

    # Weights -> (9*Ci, Cp) bf16, zero-padded channels (gamma/beta padded with
    # zeros so padded channels stay exactly zero downstream).
    # NOTE: the Conv2d biases params["b1"]/["b2"] are intentionally unused in
    # the kernels -- under training-mode BatchNorm they cancel exactly.
    w1 = jnp.zeros((3, 3, cin, cp), jnp.float32)
    w1 = w1.at[..., :cout].set(params["w1"]).reshape(9 * cin, cp)
    w1 = w1.astype(jnp.bfloat16)
    w2 = jnp.zeros((3, 3, cp, cp), jnp.float32)
    w2 = w2.at[:, :, :cout, :cout].set(params["w2"]).reshape(9 * cp, cp)
    w2 = w2.astype(jnp.bfloat16)
    g1 = jnp.zeros((cp,), jnp.float32).at[:cout].set(params["gamma1"])
    be1 = jnp.zeros((cp,), jnp.float32).at[:cout].set(params["beta1"])
    g2 = jnp.zeros((cp,), jnp.float32).at[:cout].set(params["gamma2"])
    be2 = jnp.zeros((cp,), jnp.float32).at[:cout].set(params["beta2"])

    count = float(n * h * w)

    # conv1 on the raw input (input channels left unpadded to avoid an extra
    # full-tensor HBM copy of x; everything downstream is lane-dense at Cp).
    one = jnp.ones((1, cin), jnp.float32)
    zero = jnp.zeros((1, cin), jnp.float32)
    y1, st1 = _conv_pass(x, w1, one, zero, cp, th, apply_input_act=False)
    scale1, shift1 = _bn_scale_shift(st1, g1, be1, count)

    # conv2 with BN1+ReLU1 applied to y1 on the fly inside the conv kernel.
    y2, st2 = _conv_pass(y1, w2, scale1, shift1, cp, th, apply_input_act=True)
    scale2, shift2 = _bn_scale_shift(st2, g2, be2, count)

    # BN2 + ReLU2 (+ fused 2x2 max-pool).
    before_pool, pooled = _bn_relu_finalize(y2, scale2, shift2, th, pooling)

    # strip channel padding, back to NCHW for parity with the PyTorch module
    bp_out = jnp.transpose(before_pool[..., :cout], (0, 3, 1, 2))
    x_out = jnp.transpose(pooled[..., :cout], (0, 3, 1, 2))
    return x_out, bp_out


def init_params(key, in_channels, out_channels):
    k1, k2, k3, k4 = jax.random.split(key, 4)
    return {
        # conv weights in HWIO layout for the kernels
        "w1": (jax.random.normal(k1, (3, 3, in_channels, out_channels),
                                 jnp.float32) * 0.1),
        "b1": (jax.random.normal(k2, (out_channels,), jnp.float32) * 0.1),
        "gamma1": jnp.ones((out_channels,), jnp.float32),  # PyTorch BN init
        "beta1": jnp.zeros((out_channels,), jnp.float32),
        "w2": (jax.random.normal(k3, (3, 3, out_channels, out_channels),
                                 jnp.float32) * 0.1),
        "b2": (jax.random.normal(k4, (out_channels,), jnp.float32) * 0.1),
        "gamma2": jnp.ones((out_channels,), jnp.float32),
        "beta2": jnp.zeros((out_channels,), jnp.float32),
    }


def _reference(x_nchw, params, pooling):
    """Pure-JAX (XLA) reference of the PyTorch forward (f32, highest
    precision). It DOES apply the conv biases; the comparison in __main__
    confirms numerically that they cancel under training-mode BN."""
    def layer(x, w, b, g, beta):
        y = jax.lax.conv_general_dilated(
            x, w, window_strides=(1, 1), padding=((1, 1), (1, 1)),
            dimension_numbers=("NCHW", "HWIO", "NCHW"),
            precision=jax.lax.Precision.HIGHEST)
        y = y + b.reshape(1, -1, 1, 1)
        mean = jnp.mean(y, axis=(0, 2, 3), keepdims=True)
        var = jnp.mean(jnp.square(y - mean), axis=(0, 2, 3), keepdims=True)
        y = (y - mean) * jax.lax.rsqrt(var + _EPS)
        y = y * g.reshape(1, -1, 1, 1) + beta.reshape(1, -1, 1, 1)
        return jnp.maximum(y, 0.0)

    a = layer(x_nchw.astype(jnp.float32), params["w1"], params["b1"],
              params["gamma1"], params["beta1"])
    a = layer(a, params["w2"], params["b2"], params["gamma2"],
              params["beta2"])
    before_pool = a
    if pooling:
        nn, cc, hh, ww = a.shape
        a = jnp.max(a.reshape(nn, cc, hh // 2, 2, ww // 2, 2), axis=(3, 5))
    return a, before_pool


if __name__ == "__main__":
    N, Cin, H, W = 2, 4, 16, 16
    Cout = 8
    pooling = True

    root = jax.random.PRNGKey(0)
    kx, kp = jax.random.split(root)
    x = jax.random.normal(kx, (N, Cin, H, W), jnp.float32)  # NCHW, like torch
    params = init_params(kp, Cin, Cout)

    pooled, before_pool = down_block_forward(x, params, pooling=pooling)
    pooled = jax.block_until_ready(pooled)
    before_pool = jax.block_until_ready(before_pool)

    assert pooled.shape == (N, Cout, H // 2, W // 2), pooled.shape
    assert before_pool.shape == (N, Cout, H, W), before_pool.shape
    assert bool(jnp.all(jnp.isfinite(pooled)))
    assert bool(jnp.all(jnp.isfinite(before_pool)))
    assert bool(jnp.all(pooled >= 0.0)) and bool(jnp.all(before_pool >= 0.0))

    # check against a pure-JAX reference (bf16-matmul tolerance)
    ref_pooled, ref_bp = _reference(x, params, pooling)
    err = max(float(jnp.max(jnp.abs(pooled - ref_pooled))),
              float(jnp.max(jnp.abs(before_pool - ref_bp))))
    assert err < 0.2, f"mismatch vs reference: max abs err {err}"

    print("KERNEL_OK")
</pallas_src>

<mosaic_0001>
module attributes {stable_mosaic.version = 11 : i64} {
  func.func @_conv_pass_kernel(%arg0: i32, %arg1: i32, %arg2: memref<1x8x16x4xf32, #tpu.memory_space<vmem>>, %arg3: memref<1x1x16x4xf32, #tpu.memory_space<vmem>>, %arg4: memref<1x1x16x4xf32, #tpu.memory_space<vmem>>, %arg5: memref<36x128xbf16, #tpu.memory_space<vmem>>, %arg6: memref<1x4xf32, #tpu.memory_space<vmem>>, %arg7: memref<1x4xf32, #tpu.memory_space<vmem>>, %arg8: memref<1x8x16x128xf32, #tpu.memory_space<vmem>>, %arg9: memref<1x1x2x128xf32, #tpu.memory_space<vmem>>, %arg10: memref<1x10x18x4xbf16, #tpu.memory_space<vmem>>, %arg11: memref<128x36xbf16, #tpu.memory_space<vmem>>) attributes {dimension_semantics = [#tpu.dimension_semantics<parallel>, #tpu.dimension_semantics<parallel>], iteration_bounds = array<i64: 2, 2>, scalar_prefetch = 0 : i64, scratch_operands = 2 : i64, tpu.core_type = #tpu.core_type<tc>, window_params = [{transform_indices = @transform_0, window_bounds = array<i64: 1, 8, 16, 4>}, {transform_indices = @transform_1, window_bounds = array<i64: 1, 1, 16, 4>}, {transform_indices = @transform_2, window_bounds = array<i64: 1, 1, 16, 4>}, {pipeline_mode = #tpu.pipeline_mode<synchronous>, transform_indices = @transform_3, window_bounds = array<i64: 36, 128>}, {pipeline_mode = #tpu.pipeline_mode<synchronous>, transform_indices = @transform_4, window_bounds = array<i64: 1, 4>}, {pipeline_mode = #tpu.pipeline_mode<synchronous>, transform_indices = @transform_5, window_bounds = array<i64: 1, 4>}, {transform_indices = @transform_6, window_bounds = array<i64: 1, 8, 16, 128>}, {transform_indices = @transform_7, window_bounds = array<i64: 1, 1, 2, 128>}]} {
    %c0 = arith.constant 0 : index
    %c0_0 = arith.constant 0 : index
    %c0_1 = arith.constant 0 : index
    %c0_2 = arith.constant 0 : index
    %0 = vector.load %arg2[%c0, %c0_0, %c0_1, %c0_2] : memref<1x8x16x4xf32, #tpu.memory_space<vmem>>, vector<1x8x16x4xf32>
    %1 = arith.truncf %0 : vector<1x8x16x4xf32> to vector<1x8x16x4xbf16>
    %c0_i32 = arith.constant 0 : i32
    %2 = arith.cmpi sgt, %arg1, %c0_i32 : i32
    %c0_3 = arith.constant 0 : index
    %c0_4 = arith.constant 0 : index
    %c0_5 = arith.constant 0 : index
    %c0_6 = arith.constant 0 : index
    %3 = vector.load %arg3[%c0_3, %c0_4, %c0_5, %c0_6] : memref<1x1x16x4xf32, #tpu.memory_space<vmem>>, vector<1x1x16x4xf32>
    %4 = arith.truncf %3 : vector<1x1x16x4xf32> to vector<1x1x16x4xbf16>
    %cst = arith.constant 0.000000e+00 : f32
    %5 = arith.truncf %cst : f32 to bf16
    %6 = vector.broadcast %5 : bf16 to vector<1x1x16x4xbf16>
    %7 = arith.select %2, %4, %6 : vector<1x1x16x4xbf16>
    %c1_i32 = arith.constant 1 : i32
    %8 = arith.cmpi slt, %arg1, %c1_i32 : i32
    %c0_7 = arith.constant 0 : index
    %c0_8 = arith.constant 0 : index
    %c0_9 = arith.constant 0 : index
    %c0_10 = arith.constant 0 : index
    %9 = vector.load %arg4[%c0_7, %c0_8, %c0_9, %c0_10] : memref<1x1x16x4xf32, #tpu.memory_space<vmem>>, vector<1x1x16x4xf32>
    %10 = arith.truncf %9 : vector<1x1x16x4xf32> to vector<1x1x16x4xbf16>
    %cst_11 = arith.constant 0.000000e+00 : f32
    %11 = arith.truncf %cst_11 : f32 to bf16
    %12 = vector.broadcast %11 : bf16 to vector<1x1x16x4xbf16>
    %13 = arith.select %8, %10, %12 : vector<1x1x16x4xbf16>
    %cst_12 = arith.constant 0.000000e+00 : bf16
    %14 = vector.broadcast %cst_12 : bf16 to vector<1x10x18x4xbf16>
    %c0_13 = arith.constant 0 : index
    %c0_14 = arith.constant 0 : index
    %c0_15 = arith.constant 0 : index
    %c0_16 = arith.constant 0 : index
    %15 = vector.load %arg10[%c0_13, %c0_14, %c0_15, %c0_16] : memref<1x10x18x4xbf16, #tpu.memory_space<vmem>>, vector<1x10x18x4xbf16>
    tpu.vector_store %arg10[%c0_13, %c0_14, %c0_15, %c0_16], %14 {strides = array<i32>} : memref<1x10x18x4xbf16, #tpu.memory_space<vmem>>, vector<1x10x18x4xbf16>,
    %c0_17 = arith.constant 0 : index
    %c1 = arith.constant 1 : index
    %c1_18 = arith.constant 1 : index
    %c0_19 = arith.constant 0 : index
    %16 = vector.load %arg10[%c0_17, %c1, %c1_18, %c0_19] : memref<1x10x18x4xbf16, #tpu.memory_space<vmem>>, vector<1x8x16x4xbf16>
    tpu.vector_store %arg10[%c0_17, %c1, %c1_18, %c0_19], %1 {strides = array<i32>} : memref<1x10x18x4xbf16, #tpu.memory_space<vmem>>, vector<1x8x16x4xbf16>,
    %c0_20 = arith.constant 0 : index
    %c0_21 = arith.constant 0 : index
    %c1_22 = arith.constant 1 : index
    %c0_23 = arith.constant 0 : index
    %17 = vector.load %arg10[%c0_20, %c0_21, %c1_22, %c0_23] : memref<1x10x18x4xbf16, #tpu.memory_space<vmem>>, vector<1x1x16x4xbf16>
    tpu.vector_store %arg10[%c0_20, %c0_21, %c1_22, %c0_23], %7 {strides = array<i32>} : memref<1x10x18x4xbf16, #tpu.memory_space<vmem>>, vector<1x1x16x4xbf16>,
    %c0_24 = arith.constant 0 : index
    %c9 = arith.constant 9 : index
    %c1_25 = arith.constant 1 : index
    %c0_26 = arith.constant 0 : index
    %18 = vector.load %arg10[%c0_24, %c9, %c1_25, %c0_26] : memref<1x10x18x4xbf16, #tpu.memory_space<vmem>>, vector<1x1x16x4xbf16>
    tpu.vector_store %arg10[%c0_24, %c9, %c1_25, %c0_26], %13 {strides = array<i32>} : memref<1x10x18x4xbf16, #tpu.memory_space<vmem>>, vector<1x1x16x4xbf16>,
    %c0_27 = arith.constant 0 : index
    %c0_28 = arith.constant 0 : index
    %c0_29 = arith.constant 0 : index
    %c0_30 = arith.constant 0 : index
    %19 = vector.load %arg10[%c0_27, %c0_28, %c0_29, %c0_30] : memref<1x10x18x4xbf16, #tpu.memory_space<vmem>>, vector<1x8x16x4xbf16>
    %20 = vector.shape_cast %19 : vector<1x8x16x4xbf16> to vector<128x4xbf16>
    %c0_31 = arith.constant 0 : index
    %c0_32 = arith.constant 0 : index
    %21 = vector.load %arg11[%c0_31, %c0_32] : memref<128x36xbf16, #tpu.memory_space<vmem>>, vector<128x4xbf16>
    tpu.vector_store %arg11[%c0_31, %c0_32], %20 {strides = array<i32>} : memref<128x36xbf16, #tpu.memory_space<vmem>>, vector<128x4xbf16>,
    %c0_33 = arith.constant 0 : index
    %c0_34 = arith.constant 0 : index
    %c1_35 = arith.constant 1 : index
    %c0_36 = arith.constant 0 : index
    %22 = vector.load %arg10[%c0_33, %c0_34, %c1_35, %c0_36] : memref<1x10x18x4xbf16, #tpu.memory_space<vmem>>, vector<1x8x16x4xbf16>
    %23 = vector.shape_cast %22 : vector<1x8x16x4xbf16> to vector<128x4xbf16>
    %c0_37 = arith.constant 0 : index
    %c4 = arith.constant 4 : index
    %24 = vector.load %arg11[%c0_37, %c4] : memref<128x36xbf16, #tpu.memory_space<vmem>>, vector<128x4xbf16>
    tpu.vector_store %arg11[%c0_37, %c4], %23 {strides = array<i32>} : memref<128x36xbf16, #tpu.memory_space<vmem>>, vector<128x4xbf16>,
    %c0_38 = arith.constant 0 : index
    %c0_39 = arith.constant 0 : index
    %c2 = arith.constant 2 : index
    %c0_40 = arith.constant 0 : index
    %25 = vector.load %arg10[%c0_38, %c0_39, %c2, %c0_40] : memref<1x10x18x4xbf16, #tpu.memory_space<vmem>>, vector<1x8x16x4xbf16>
    %26 = vector.shape_cast %25 : vector<1x8x16x4xbf16> to vector<128x4xbf16>
    %c0_41 = arith.constant 0 : index
    %c8 = arith.constant 8 : index
    %27 = vector.load %arg11[%c0_41, %c8] : memref<128x36xbf16, #tpu.memory_space<vmem>>, vector<128x4xbf16>
    tpu.vector_store %arg11[%c0_41, %c8], %26 {strides = array<i32>} : memref<128x36xbf16, #tpu.memory_space<vmem>>, vector<128x4xbf16>,
    %c0_42 = arith.constant 0 : index
    %c1_43 = arith.constant 1 : index
    %c0_44 = arith.constant 0 : index
    %c0_45 = arith.constant 0 : index
    %28 = vector.load %arg10[%c0_42, %c1_43, %c0_44, %c0_45] : memref<1x10x18x4xbf16, #tpu.memory_space<vmem>>, vector<1x8x16x4xbf16>
    %29 = vector.shape_cast %28 : vector<1x8x16x4xbf16> to vector<128x4xbf16>
    %c0_46 = arith.constant 0 : index
    %c12 = arith.constant 12 : index
    %30 = vector.load %arg11[%c0_46, %c12] : memref<128x36xbf16, #tpu.memory_space<vmem>>, vector<128x4xbf16>
    tpu.vector_store %arg11[%c0_46, %c12], %29 {strides = array<i32>} : memref<128x36xbf16, #tpu.memory_space<vmem>>, vector<128x4xbf16>,
    %c0_47 = arith.constant 0 : index
    %c1_48 = arith.constant 1 : index
    %c1_49 = arith.constant 1 : index
    %c0_50 = arith.constant 0 : index
    %31 = vector.load %arg10[%c0_47, %c1_48, %c1_49, %c0_50] : memref<1x10x18x4xbf16, #tpu.memory_space<vmem>>, vector<1x8x16x4xbf16>
    %32 = vector.shape_cast %31 : vector<1x8x16x4xbf16> to vector<128x4xbf16>
    %c0_51 = arith.constant 0 : index
    %c16 = arith.constant 16 : index
    %33 = vector.load %arg11[%c0_51, %c16] : memref<128x36xbf16, #tpu.memory_space<vmem>>, vector<128x4xbf16>
    tpu.vector_store %arg11[%c0_51, %c16], %32 {strides = array<i32>} : memref<128x36xbf16, #tpu.memory_space<vmem>>, vector<128x4xbf16>,
    %c0_52 = arith.constant 0 : index
    %c1_53 = arith.constant 1 : index
    %c2_54 = arith.constant 2 : index
    %c0_55 = arith.constant 0 : index
    %34 = vector.load %arg10[%c0_52, %c1_53, %c2_54, %c0_55] : memref<1x10x18x4xbf16, #tpu.memory_space<vmem>>, vector<1x8x16x4xbf16>
    %35 = vector.shape_cast %34 : vector<1x8x16x4xbf16> to vector<128x4xbf16>
    %c0_56 = arith.constant 0 : index
    %c20 = arith.constant 20 : index
    %36 = vector.load %arg11[%c0_56, %c20] : memref<128x36xbf16, #tpu.memory_space<vmem>>, vector<128x4xbf16>
    tpu.vector_store %arg11[%c0_56, %c20], %35 {strides = array<i32>} : memref<128x36xbf16, #tpu.memory_space<vmem>>, vector<128x4xbf16>,
    %c0_57 = arith.constant 0 : index
    %c2_58 = arith.constant 2 : index
    %c0_59 = arith.constant 0 : index
    %c0_60 = arith.constant 0 : index
    %37 = vector.load %arg10[%c0_57, %c2_58, %c0_59, %c0_60] : memref<1x10x18x4xbf16, #tpu.memory_space<vmem>>, vector<1x8x16x4xbf16>
    %38 = vector.shape_cast %37 : vector<1x8x16x4xbf16> to vector<128x4xbf16>
    %c0_61 = arith.constant 0 : index
    %c24 = arith.constant 24 : index
    %39 = vector.load %arg11[%c0_61, %c24] : memref<128x36xbf16, #tpu.memory_space<vmem>>, vector<128x4xbf16>
    tpu.vector_store %arg11[%c0_61, %c24], %38 {strides = array<i32>} : memref<128x36xbf16, #tpu.memory_space<vmem>>, vector<128x4xbf16>,
    %c0_62 = arith.constant 0 : index
    %c2_63 = arith.constant 2 : index
    %c1_64 = arith.constant 1 : index
    %c0_65 = arith.constant 0 : index
    %40 = vector.load %arg10[%c0_62, %c2_63, %c1_64, %c0_65] : memref<1x10x18x4xbf16, #tpu.memory_space<vmem>>, vector<1x8x16x4xbf16>
    %41 = vector.shape_cast %40 : vector<1x8x16x4xbf16> to vector<128x4xbf16>
    %c0_66 = arith.constant 0 : index
    %c28 = arith.constant 28 : index
    %42 = vector.load %arg11[%c0_66, %c28] : memref<128x36xbf16, #tpu.memory_space<vmem>>, vector<128x4xbf16>
    tpu.vector_store %arg11[%c0_66, %c28], %41 {strides = array<i32>} : memref<128x36xbf16, #tpu.memory_space<vmem>>, vector<128x4xbf16>,
    %c0_67 = arith.constant 0 : index
    %c2_68 = arith.constant 2 : index
    %c2_69 = arith.constant 2 : index
    %c0_70 = arith.constant 0 : index
    %43 = vector.load %arg10[%c0_67, %c2_68, %c2_69, %c0_70] : memref<1x10x18x4xbf16, #tpu.memory_space<vmem>>, vector<1x8x16x4xbf16>
    %44 = vector.shape_cast %43 : vector<1x8x16x4xbf16> to vector<128x4xbf16>
    %c0_71 = arith.constant 0 : index
    %c32 = arith.constant 32 : index
    %45 = vector.load %arg11[%c0_71, %c32] : memref<128x36xbf16, #tpu.memory_space<vmem>>, vector<128x4xbf16>
    tpu.vector_store %arg11[%c0_71, %c32], %44 {strides = array<i32>} : memref<128x36xbf16, #tpu.memory_space<vmem>>, vector<128x4xbf16>,
    %c0_72 = arith.constant 0 : index
    %c0_73 = arith.constant 0 : index
    %46 = vector.load %arg11[%c0_72, %c0_73] : memref<128x36xbf16, #tpu.memory_space<vmem>>, vector<128x36xbf16>
    %c0_74 = arith.constant 0 : index
    %c0_75 = arith.constant 0 : index
    %47 = vector.load %arg5[%c0_74, %c0_75] : memref<36x128xbf16, #tpu.memory_space<vmem>>, vector<36x128xbf16>
    %cst_76 = arith.constant dense<0.000000e+00> : vector<128x128xf32>
    %48 = tpu.matmul %46, %47, %cst_76 {dimension_numbers = #tpu.dot_dimension_numbers<[1], [0], [0], [1], [0, 0, 1, 1], [], []>} : vector<128x36xbf16>, vector<36x128xbf16>, vector<128x128xf32> -> vector<128x128xf32>
    %49 = vector.shape_cast %48 : vector<128x128xf32> to vector<1x8x16x128xf32>
    %c0_77 = arith.constant 0 : index
    %c0_78 = arith.constant 0 : index
    %c0_79 = arith.constant 0 : index
    %c0_80 = arith.constant 0 : index
    %50 = vector.load %arg8[%c0_77, %c0_78, %c0_79, %c0_80] : memref<1x8x16x128xf32, #tpu.memory_space<vmem>>, vector<1x8x16x128xf32>
    tpu.vector_store %arg8[%c0_77, %c0_78, %c0_79, %c0_80], %49 {strides = array<i32>} : memref<1x8x16x128xf32, #tpu.memory_space<vmem>>, vector<1x8x16x128xf32>,
    %cst_81 = arith.constant dense<0.000000e+00> : vector<128xf32>
    %51 = vector.multi_reduction <add>, %48, %cst_81 [0] : vector<128x128xf32> to vector<128xf32>
    %52 = vector.shape_cast %51 : vector<128xf32> to vector<1x128xf32>
    %53 = arith.mulf %48, %48 : vector<128x128xf32>
    %cst_82 = arith.constant dense<0.000000e+00> : vector<128xf32>
    %54 = vector.multi_reduction <add>, %53, %cst_82 [0] : vector<128x128xf32> to vector<128xf32>
    %55 = vector.shape_cast %54 : vector<128xf32> to vector<1x128xf32>
    %56 = tpu.concatenate %52, %55 in 0 : vector<1x128xf32>, vector<1x128xf32> -> vector<2x128xf32>
    %57 = vector.shape_cast %56 : vector<2x128xf32> to vector<1x1x2x128xf32>
    %c0_83 = arith.constant 0 : index
    %c0_84 = arith.constant 0 : index
    %c0_85 = arith.constant 0 : index
    %c0_86 = arith.constant 0 : index
    %58 = vector.load %arg9[%c0_83, %c0_84, %c0_85, %c0_86] : memref<1x1x2x128xf32, #tpu.memory_space<vmem>>, vector<1x1x2x128xf32>
    tpu.vector_store %arg9[%c0_83, %c0_84, %c0_85, %c0_86], %57 {strides = array<i32>} : memref<1x1x2x128xf32, #tpu.memory_space<vmem>>, vector<1x1x2x128xf32>,
    return
  }
  func.func @transform_0(%arg0: i32, %arg1: i32) -> (i32, i32, i32, i32) {
    %c0_i32 = arith.constant 0 : i32
    %c0_i32_0 = arith.constant 0 : i32
    %c0_i32_1 = arith.constant 0 : i32
    return %arg0, %arg1, %c0_i32, %c0_i32_0 : i32, i32, i32, i32
  }
  func.func @transform_1(%arg0: i32, %arg1: i32) -> (i32, i32, i32, i32) {
    %c8_i32 = arith.constant 8 : i32
    %0 = arith.muli %arg1, %c8_i32 : i32
    %c1_i32 = arith.constant 1 : i32
    %1 = arith.subi %0, %c1_i32 : i32
    %c0_i32 = arith.constant 0 : i32
    %2 = arith.maxsi %1, %c0_i32 : i32
    %c0_i32_0 = arith.constant 0 : i32
    %c0_i32_1 = arith.constant 0 : i32
    %c0_i32_2 = arith.constant 0 : i32
    return %arg0, %2, %c0_i32_0, %c0_i32_1 : i32, i32, i32, i32
  }
  func.func @transform_2(%arg0: i32, %arg1: i32) -> (i32, i32, i32, i32) {
    %c1_i32 = arith.constant 1 : i32
    %0 = arith.addi %arg1, %c1_i32 : i32
    %c8_i32 = arith.constant 8 : i32
    %1 = arith.muli %0, %c8_i32 : i32
    %c15_i32 = arith.constant 15 : i32
    %2 = arith.minsi %1, %c15_i32 : i32
    %c0_i32 = arith.constant 0 : i32
    %c0_i32_0 = arith.constant 0 : i32
    %c0_i32_1 = arith.constant 0 : i32
    return %arg0, %2, %c0_i32, %c0_i32_0 : i32, i32, i32, i32
  }
  func.func @transform_3(%arg0: i32, %arg1: i32) -> (i32, i32) {
    %c0_i32 = arith.constant 0 : i32
    %c0_i32_0 = arith.constant 0 : i32
    %c0_i32_1 = arith.constant 0 : i32
    return %c0_i32, %c0_i32_0 : i32, i32
  }
  func.func @transform_4(%arg0: i32, %arg1: i32) -> (i32, i32) {
    %c0_i32 = arith.constant 0 : i32
    %c0_i32_0 = arith.constant 0 : i32
    %c0_i32_1 = arith.constant 0 : i32
    return %c0_i32, %c0_i32_0 : i32, i32
  }
  func.func @transform_5(%arg0: i32, %arg1: i32) -> (i32, i32) {
    %c0_i32 = arith.constant 0 : i32
    %c0_i32_0 = arith.constant 0 : i32
    %c0_i32_1 = arith.constant 0 : i32
    return %c0_i32, %c0_i32_0 : i32, i32
  }
  func.func @transform_6(%arg0: i32, %arg1: i32) -> (i32, i32, i32, i32) {
    %c0_i32 = arith.constant 0 : i32
    %c0_i32_0 = arith.constant 0 : i32
    %c0_i32_1 = arith.constant 0 : i32
    return %arg0, %arg1, %c0_i32, %c0_i32_0 : i32, i32, i32, i32
  }
  func.func @transform_7(%arg0: i32, %arg1: i32) -> (i32, i32, i32, i32) {
    %c0_i32 = arith.constant 0 : i32
    %c0_i32_0 = arith.constant 0 : i32
    %c0_i32_1 = arith.constant 0 : i32
    return %arg0, %arg1, %c0_i32, %c0_i32_0 : i32, i32, i32, i32
  }
}

module attributes {stable_mosaic.version = 11 : i64} {
  func.func @_conv_pass_kernel(%arg0: i32, %arg1: i32, %arg2: memref<1x8x16x128xf32, #tpu.memory_space<vmem>>, %arg3: memref<1x1x16x128xf32, #tpu.memory_space<vmem>>, %arg4: memref<1x1x16x128xf32, #tpu.memory_space<vmem>>, %arg5: memref<1152x128xbf16, #tpu.memory_space<vmem>>, %arg6: memref<1x128xf32, #tpu.memory_space<vmem>>, %arg7: memref<1x128xf32, #tpu.memory_space<vmem>>, %arg8: memref<1x8x16x128xf32, #tpu.memory_space<vmem>>, %arg9: memref<1x1x2x128xf32, #tpu.memory_space<vmem>>, %arg10: memref<1x10x18x128xbf16, #tpu.memory_space<vmem>>, %arg11: memref<128x1152xbf16, #tpu.memory_space<vmem>>) attributes {dimension_semantics = [#tpu.dimension_semantics<parallel>, #tpu.dimension_semantics<parallel>], iteration_bounds = array<i64: 2, 2>, scalar_prefetch = 0 : i64, scratch_operands = 2 : i64, tpu.core_type = #tpu.core_type<tc>, window_params = [{transform_indices = @transform_0, window_bounds = array<i64: 1, 8, 16, 128>}, {transform_indices = @transform_1, window_bounds = array<i64: 1, 1, 16, 128>}, {transform_indices = @transform_2, window_bounds = array<i64: 1, 1, 16, 128>}, {pipeline_mode = #tpu.pipeline_mode<synchronous>, transform_indices = @transform_3, window_bounds = array<i64: 1152, 128>}, {pipeline_mode = #tpu.pipeline_mode<synchronous>, transform_indices = @transform_4, window_bounds = array<i64: 1, 128>}, {pipeline_mode = #tpu.pipeline_mode<synchronous>, transform_indices = @transform_5, window_bounds = array<i64: 1, 128>}, {transform_indices = @transform_6, window_bounds = array<i64: 1, 8, 16, 128>}, {transform_indices = @transform_7, window_bounds = array<i64: 1, 1, 2, 128>}]} {
    %c0 = arith.constant 0 : index
    %c0_0 = arith.constant 0 : index
    %c0_1 = arith.constant 0 : index
    %c0_2 = arith.constant 0 : index
    %0 = vector.load %arg2[%c0, %c0_0, %c0_1, %c0_2] : memref<1x8x16x128xf32, #tpu.memory_space<vmem>>, vector<1x8x16x128xf32>
    %c0_3 = arith.constant 0 : index
    %c0_4 = arith.constant 0 : index
    %1 = vector.load %arg6[%c0_3, %c0_4] : memref<1x128xf32, #tpu.memory_space<vmem>>, vector<1x128xf32>
    %2 = vector.shape_cast %1 : vector<1x128xf32> to vector<1x1x1x128xf32>
    %3 = vector.broadcast %2 : vector<1x1x1x128xf32> to vector<1x8x16x128xf32>
    %4 = arith.mulf %0, %3 : vector<1x8x16x128xf32>
    %c0_5 = arith.constant 0 : index
    %c0_6 = arith.constant 0 : index
    %5 = vector.load %arg7[%c0_5, %c0_6] : memref<1x128xf32, #tpu.memory_space<vmem>>, vector<1x128xf32>
    %6 = vector.shape_cast %5 : vector<1x128xf32> to vector<1x1x1x128xf32>
    %7 = vector.broadcast %6 : vector<1x1x1x128xf32> to vector<1x8x16x128xf32>
    %8 = arith.addf %4, %7 : vector<1x8x16x128xf32>
    %cst = arith.constant 0.000000e+00 : f32
    %9 = vector.broadcast %cst : f32 to vector<1x8x16x128xf32>
    %10 = arith.maximumf %8, %9 : vector<1x8x16x128xf32>
    %11 = arith.truncf %10 : vector<1x8x16x128xf32> to vector<1x8x16x128xbf16>
    %c0_i32 = arith.constant 0 : i32
    %12 = arith.cmpi sgt, %arg1, %c0_i32 : i32
    %c0_7 = arith.constant 0 : index
    %c0_8 = arith.constant 0 : index
    %c0_9 = arith.constant 0 : index
    %c0_10 = arith.constant 0 : index
    %13 = vector.load %arg3[%c0_7, %c0_8, %c0_9, %c0_10] : memref<1x1x16x128xf32, #tpu.memory_space<vmem>>, vector<1x1x16x128xf32>
    %c0_11 = arith.constant 0 : index
    %c0_12 = arith.constant 0 : index
    %14 = vector.load %arg6[%c0_11, %c0_12] : memref<1x128xf32, #tpu.memory_space<vmem>>, vector<1x128xf32>
    %15 = vector.shape_cast %14 : vector<1x128xf32> to vector<1x1x1x128xf32>
    %16 = vector.broadcast %15 : vector<1x1x1x128xf32> to vector<1x1x16x128xf32>
    %17 = arith.mulf %13, %16 : vector<1x1x16x128xf32>
    %c0_13 = arith.constant 0 : index
    %c0_14 = arith.constant 0 : index
    %18 = vector.load %arg7[%c0_13, %c0_14] : memref<1x128xf32, #tpu.memory_space<vmem>>, vector<1x128xf32>
    %19 = vector.shape_cast %18 : vector<1x128xf32> to vector<1x1x1x128xf32>
    %20 = vector.broadcast %19 : vector<1x1x1x128xf32> to vector<1x1x16x128xf32>
    %21 = arith.addf %17, %20 : vector<1x1x16x128xf32>
    %cst_15 = arith.constant 0.000000e+00 : f32
    %22 = vector.broadcast %cst_15 : f32 to vector<1x1x16x128xf32>
    %23 = arith.maximumf %21, %22 : vector<1x1x16x128xf32>
    %24 = arith.truncf %23 : vector<1x1x16x128xf32> to vector<1x1x16x128xbf16>
    %cst_16 = arith.constant 0.000000e+00 : f32
    %25 = arith.truncf %cst_16 : f32 to bf16
    %26 = vector.broadcast %25 : bf16 to vector<1x1x16x128xbf16>
    %27 = arith.select %12, %24, %26 : vector<1x1x16x128xbf16>
    %c1_i32 = arith.constant 1 : i32
    %28 = arith.cmpi slt, %arg1, %c1_i32 : i32
    %c0_17 = arith.constant 0 : index
    %c0_18 = arith.constant 0 : index
    %c0_19 = arith.constant 0 : index
    %c0_20 = arith.constant 0 : index
    %29 = vector.load %arg4[%c0_17, %c0_18, %c0_19, %c0_20] : memref<1x1x16x128xf32, #tpu.memory_space<vmem>>, vector<1x1x16x128xf32>
    %c0_21 = arith.constant 0 : index
    %c0_22 = arith.constant 0 : index
    %30 = vector.load %arg6[%c0_21, %c0_22] : memref<1x128xf32, #tpu.memory_space<vmem>>, vector<1x128xf32>
    %31 = vector.shape_cast %30 : vector<1x128xf32> to vector<1x1x1x128xf32>
    %32 = vector.broadcast %31 : vector<1x1x1x128xf32> to vector<1x1x16x128xf32>
    %33 = arith.mulf %29, %32 : vector<1x1x16x128xf32>
    %c0_23 = arith.constant 0 : index
    %c0_24 = arith.constant 0 : index
    %34 = vector.load %arg7[%c0_23, %c0_24] : memref<1x128xf32, #tpu.memory_space<vmem>>, vector<1x128xf32>
    %35 = vector.shape_cast %34 : vector<1x128xf32> to vector<1x1x1x128xf32>
    %36 = vector.broadcast %35 : vector<1x1x1x128xf32> to vector<1x1x16x128xf32>
    %37 = arith.addf %33, %36 : vector<1x1x16x128xf32>
    %cst_25 = arith.constant 0.000000e+00 : f32
    %38 = vector.broadcast %cst_25 : f32 to vector<1x1x16x128xf32>
    %39 = arith.maximumf %37, %38 : vector<1x1x16x128xf32>
    %40 = arith.truncf %39 : vector<1x1x16x128xf32> to vector<1x1x16x128xbf16>
    %cst_26 = arith.constant 0.000000e+00 : f32
    %41 = arith.truncf %cst_26 : f32 to bf16
    %42 = vector.broadcast %41 : bf16 to vector<1x1x16x128xbf16>
    %43 = arith.select %28, %40, %42 : vector<1x1x16x128xbf16>
    %cst_27 = arith.constant 0.000000e+00 : bf16
    %44 = vector.broadcast %cst_27 : bf16 to vector<1x10x18x128xbf16>
    %c0_28 = arith.constant 0 : index
    %c0_29 = arith.constant 0 : index
    %c0_30 = arith.constant 0 : index
    %c0_31 = arith.constant 0 : index
    %45 = vector.load %arg10[%c0_28, %c0_29, %c0_30, %c0_31] : memref<1x10x18x128xbf16, #tpu.memory_space<vmem>>, vector<1x10x18x128xbf16>
    tpu.vector_store %arg10[%c0_28, %c0_29, %c0_30, %c0_31], %44 {strides = array<i32>} : memref<1x10x18x128xbf16, #tpu.memory_space<vmem>>, vector<1x10x18x128xbf16>,
    %c0_32 = arith.constant 0 : index
    %c1 = arith.constant 1 : index
    %c1_33 = arith.constant 1 : index
    %c0_34 = arith.constant 0 : index
    %46 = vector.load %arg10[%c0_32, %c1, %c1_33, %c0_34] : memref<1x10x18x128xbf16, #tpu.memory_space<vmem>>, vector<1x8x16x128xbf16>
    tpu.vector_store %arg10[%c0_32, %c1, %c1_33, %c0_34], %11 {strides = array<i32>} : memref<1x10x18x128xbf16, #tpu.memory_space<vmem>>, vector<1x8x16x128xbf16>,
    %c0_35 = arith.constant 0 : index
    %c0_36 = arith.constant 0 : index
    %c1_37 = arith.constant 1 : index
    %c0_38 = arith.constant 0 : index
    %47 = vector.load %arg10[%c0_35, %c0_36, %c1_37, %c0_38] : memref<1x10x18x128xbf16, #tpu.memory_space<vmem>>, vector<1x1x16x128xbf16>
    tpu.vector_store %arg10[%c0_35, %c0_36, %c1_37, %c0_38], %27 {strides = array<i32>} : memref<1x10x18x128xbf16, #tpu.memory_space<vmem>>, vector<1x1x16x128xbf16>,
    %c0_39 = arith.constant 0 : index
    %c9 = arith.constant 9 : index
    %c1_40 = arith.constant 1 : index
    %c0_41 = arith.constant 0 : index
    %48 = vector.load %arg10[%c0_39, %c9, %c1_40, %c0_41] : memref<1x10x18x128xbf16, #tpu.memory_space<vmem>>, vector<1x1x16x128xbf16>
    tpu.vector_store %arg10[%c0_39, %c9, %c1_40, %c0_41], %43 {strides = array<i32>} : memref<1x10x18x128xbf16, #tpu.memory_space<vmem>>, vector<1x1x16x128xbf16>,
    %c0_42 = arith.constant 0 : index
    %c0_43 = arith.constant 0 : index
    %c0_44 = arith.constant 0 : index
    %c0_45 = arith.constant 0 : index
    %49 = vector.load %arg10[%c0_42, %c0_43, %c0_44, %c0_45] : memref<1x10x18x128xbf16, #tpu.memory_space<vmem>>, vector<1x8x16x128xbf16>
    %50 = vector.shape_cast %49 : vector<1x8x16x128xbf16> to vector<128x128xbf16>
    %c0_46 = arith.constant 0 : index
    %c0_47 = arith.constant 0 : index
    %51 = vector.load %arg11[%c0_46, %c0_47] : memref<128x1152xbf16, #tpu.memory_space<vmem>>, vector<128x128xbf16>
    tpu.vector_store %arg11[%c0_46, %c0_47], %50 {strides = array<i32>} : memref<128x1152xbf16, #tpu.memory_space<vmem>>, vector<128x128xbf16>,
    %c0_48 = arith.constant 0 : index
    %c0_49 = arith.constant 0 : index
    %c1_50 = arith.constant 1 : index
    %c0_51 = arith.constant 0 : index
    %52 = vector.load %arg10[%c0_48, %c0_49, %c1_50, %c0_51] : memref<1x10x18x128xbf16, #tpu.memory_space<vmem>>, vector<1x8x16x128xbf16>
    %53 = vector.shape_cast %52 : vector<1x8x16x128xbf16> to vector<128x128xbf16>
    %c0_52 = arith.constant 0 : index
    %c128 = arith.constant 128 : index
    %54 = vector.load %arg11[%c0_52, %c128] : memref<128x1152xbf16, #tpu.memory_space<vmem>>, vector<128x128xbf16>
    tpu.vector_store %arg11[%c0_52, %c128], %53 {strides = array<i32>} : memref<128x1152xbf16, #tpu.memory_space<vmem>>, vector<128x128xbf16>,
    %c0_53 = arith.constant 0 : index
    %c0_54 = arith.constant 0 : index
    %c2 = arith.constant 2 : index
    %c0_55 = arith.constant 0 : index
    %55 = vector.load %arg10[%c0_53, %c0_54, %c2, %c0_55] : memref<1x10x18x128xbf16, #tpu.memory_space<vmem>>, vector<1x8x16x128xbf16>
    %56 = vector.shape_cast %55 : vector<1x8x16x128xbf16> to vector<128x128xbf16>
    %c0_56 = arith.constant 0 : index
    %c256 = arith.constant 256 : index
    %57 = vector.load %arg11[%c0_56, %c256] : memref<128x1152xbf16, #tpu.memory_space<vmem>>, vector<128x128xbf16>
    tpu.vector_store %arg11[%c0_56, %c256], %56 {strides = array<i32>} : memref<128x1152xbf16, #tpu.memory_space<vmem>>, vector<128x128xbf16>,
    %c0_57 = arith.constant 0 : index
    %c1_58 = arith.constant 1 : index
    %c0_59 = arith.constant 0 : index
    %c0_60 = arith.constant 0 : index
    %58 = vector.load %arg10[%c0_57, %c1_58, %c0_59, %c0_60] : memref<1x10x18x128xbf16, #tpu.memory_space<vmem>>, vector<1x8x16x128xbf16>
    %59 = vector.shape_cast %58 : vector<1x8x16x128xbf16> to vector<128x128xbf16>
    %c0_61 = arith.constant 0 : index
    %c384 = arith.constant 384 : index
    %60 = vector.load %arg11[%c0_61, %c384] : memref<128x1152xbf16, #tpu.memory_space<vmem>>, vector<128x128xbf16>
    tpu.vector_store %arg11[%c0_61, %c384], %59 {strides = array<i32>} : memref<128x1152xbf16, #tpu.memory_space<vmem>>, vector<128x128xbf16>,
    %c0_62 = arith.constant 0 : index
    %c1_63 = arith.constant 1 : index
    %c1_64 = arith.constant 1 : index
    %c0_65 = arith.constant 0 : index
    %61 = vector.load %arg10[%c0_62, %c1_63, %c1_64, %c0_65] : memref<1x10x18x128xbf16, #tpu.memory_space<vmem>>, vector<1x8x16x128xbf16>
    %62 = vector.shape_cast %61 : vector<1x8x16x128xbf16> to vector<128x128xbf16>
    %c0_66 = arith.constant 0 : index
    %c512 = arith.constant 512 : index
    %63 = vector.load %arg11[%c0_66, %c512] : memref<128x1152xbf16, #tpu.memory_space<vmem>>, vector<128x128xbf16>
    tpu.vector_store %arg11[%c0_66, %c512], %62 {strides = array<i32>} : memref<128x1152xbf16, #tpu.memory_space<vmem>>, vector<128x128xbf16>,
    %c0_67 = arith.constant 0 : index
    %c1_68 = arith.constant 1 : index
    %c2_69 = arith.constant 2 : index
    %c0_70 = arith.constant 0 : index
    %64 = vector.load %arg10[%c0_67, %c1_68, %c2_69, %c0_70] : memref<1x10x18x128xbf16, #tpu.memory_space<vmem>>, vector<1x8x16x128xbf16>
    %65 = vector.shape_cast %64 : vector<1x8x16x128xbf16> to vector<128x128xbf16>
    %c0_71 = arith.constant 0 : index
    %c640 = arith.constant 640 : index
    %66 = vector.load %arg11[%c0_71, %c640] : memref<128x1152xbf16, #tpu.memory_space<vmem>>, vector<128x128xbf16>
    tpu.vector_store %arg11[%c0_71, %c640], %65 {strides = array<i32>} : memref<128x1152xbf16, #tpu.memory_space<vmem>>, vector<128x128xbf16>,
    %c0_72 = arith.constant 0 : index
    %c2_73 = arith.constant 2 : index
    %c0_74 = arith.constant 0 : index
    %c0_75 = arith.constant 0 : index
    %67 = vector.load %arg10[%c0_72, %c2_73, %c0_74, %c0_75] : memref<1x10x18x128xbf16, #tpu.memory_space<vmem>>, vector<1x8x16x128xbf16>
    %68 = vector.shape_cast %67 : vector<1x8x16x128xbf16> to vector<128x128xbf16>
    %c0_76 = arith.constant 0 : index
    %c768 = arith.constant 768 : index
    %69 = vector.load %arg11[%c0_76, %c768] : memref<128x1152xbf16, #tpu.memory_space<vmem>>, vector<128x128xbf16>
    tpu.vector_store %arg11[%c0_76, %c768], %68 {strides = array<i32>} : memref<128x1152xbf16, #tpu.memory_space<vmem>>, vector<128x128xbf16>,
    %c0_77 = arith.constant 0 : index
    %c2_78 = arith.constant 2 : index
    %c1_79 = arith.constant 1 : index
    %c0_80 = arith.constant 0 : index
    %70 = vector.load %arg10[%c0_77, %c2_78, %c1_79, %c0_80] : memref<1x10x18x128xbf16, #tpu.memory_space<vmem>>, vector<1x8x16x128xbf16>
    %71 = vector.shape_cast %70 : vector<1x8x16x128xbf16> to vector<128x128xbf16>
    %c0_81 = arith.constant 0 : index
    %c896 = arith.constant 896 : index
    %72 = vector.load %arg11[%c0_81, %c896] : memref<128x1152xbf16, #tpu.memory_space<vmem>>, vector<128x128xbf16>
    tpu.vector_store %arg11[%c0_81, %c896], %71 {strides = array<i32>} : memref<128x1152xbf16, #tpu.memory_space<vmem>>, vector<128x128xbf16>,
    %c0_82 = arith.constant 0 : index
    %c2_83 = arith.constant 2 : index
    %c2_84 = arith.constant 2 : index
    %c0_85 = arith.constant 0 : index
    %73 = vector.load %arg10[%c0_82, %c2_83, %c2_84, %c0_85] : memref<1x10x18x128xbf16, #tpu.memory_space<vmem>>, vector<1x8x16x128xbf16>
    %74 = vector.shape_cast %73 : vector<1x8x16x128xbf16> to vector<128x128xbf16>
    %c0_86 = arith.constant 0 : index
    %c1024 = arith.constant 1024 : index
    %75 = vector.load %arg11[%c0_86, %c1024] : memref<128x1152xbf16, #tpu.memory_space<vmem>>, vector<128x128xbf16>
    tpu.vector_store %arg11[%c0_86, %c1024], %74 {strides = array<i32>} : memref<128x1152xbf16, #tpu.memory_space<vmem>>, vector<128x128xbf16>,
    %c0_87 = arith.constant 0 : index
    %c0_88 = arith.constant 0 : index
    %76 = vector.load %arg11[%c0_87, %c0_88] : memref<128x1152xbf16, #tpu.memory_space<vmem>>, vector<128x1152xbf16>
    %c0_89 = arith.constant 0 : index
    %c0_90 = arith.constant 0 : index
    %77 = vector.load %arg5[%c0_89, %c0_90] : memref<1152x128xbf16, #tpu.memory_space<vmem>>, vector<1152x128xbf16>
    %cst_91 = arith.constant dense<0.000000e+00> : vector<128x128xf32>
    %78 = tpu.matmul %76, %77, %cst_91 {dimension_numbers = #tpu.dot_dimension_numbers<[1], [0], [0], [1], [0, 0, 1, 1], [], []>} : vector<128x1152xbf16>, vector<1152x128xbf16>, vector<128x128xf32> -> vector<128x128xf32>
    %79 = vector.shape_cast %78 : vector<128x128xf32> to vector<1x8x16x128xf32>
    %c0_92 = arith.constant 0 : index
    %c0_93 = arith.constant 0 : index
    %c0_94 = arith.constant 0 : index
    %c0_95 = arith.constant 0 : index
    %80 = vector.load %arg8[%c0_92, %c0_93, %c0_94, %c0_95] : memref<1x8x16x128xf32, #tpu.memory_space<vmem>>, vector<1x8x16x128xf32>
    tpu.vector_store %arg8[%c0_92, %c0_93, %c0_94, %c0_95], %79 {strides = array<i32>} : memref<1x8x16x128xf32, #tpu.memory_space<vmem>>, vector<1x8x16x128xf32>,
    %cst_96 = arith.constant dense<0.000000e+00> : vector<128xf32>
    %81 = vector.multi_reduction <add>, %78, %cst_96 [0] : vector<128x128xf32> to vector<128xf32>
    %82 = vector.shape_cast %81 : vector<128xf32> to vector<1x128xf32>
    %83 = arith.mulf %78, %78 : vector<128x128xf32>
    %cst_97 = arith.constant dense<0.000000e+00> : vector<128xf32>
    %84 = vector.multi_reduction <add>, %83, %cst_97 [0] : vector<128x128xf32> to vector<128xf32>
    %85 = vector.shape_cast %84 : vector<128xf32> to vector<1x128xf32>
    %86 = tpu.concatenate %82, %85 in 0 : vector<1x128xf32>, vector<1x128xf32> -> vector<2x128xf32>
    %87 = vector.shape_cast %86 : vector<2x128xf32> to vector<1x1x2x128xf32>
    %c0_98 = arith.constant 0 : index
    %c0_99 = arith.constant 0 : index
    %c0_100 = arith.constant 0 : index
    %c0_101 = arith.constant 0 : index
    %88 = vector.load %arg9[%c0_98, %c0_99, %c0_100, %c0_101] : memref<1x1x2x128xf32, #tpu.memory_space<vmem>>, vector<1x1x2x128xf32>
    tpu.vector_store %arg9[%c0_98, %c0_99, %c0_100, %c0_101], %87 {strides = array<i32>} : memref<1x1x2x128xf32, #tpu.memory_space<vmem>>, vector<1x1x2x128xf32>,
    return
  }
  func.func @transform_0(%arg0: i32, %arg1: i32) -> (i32, i32, i32, i32) {
    %c0_i32 = arith.constant 0 : i32
    %c0_i32_0 = arith.constant 0 : i32
    %c0_i32_1 = arith.constant 0 : i32
    return %arg0, %arg1, %c0_i32, %c0_i32_0 : i32, i32, i32, i32
  }
  func.func @transform_1(%arg0: i32, %arg1: i32) -> (i32, i32, i32, i32) {
    %c8_i32 = arith.constant 8 : i32
    %0 = arith.muli %arg1, %c8_i32 : i32
    %c1_i32 = arith.constant 1 : i32
    %1 = arith.subi %0, %c1_i32 : i32
    %c0_i32 = arith.constant 0 : i32
    %2 = arith.maxsi %1, %c0_i32 : i32
    %c0_i32_0 = arith.constant 0 : i32
    %c0_i32_1 = arith.constant 0 : i32
    %c0_i32_2 = arith.constant 0 : i32
    return %arg0, %2, %c0_i32_0, %c0_i32_1 : i32, i32, i32, i32
  }
  func.func @transform_2(%arg0: i32, %arg1: i32) -> (i32, i32, i32, i32) {
    %c1_i32 = arith.constant 1 : i32
    %0 = arith.addi %arg1, %c1_i32 : i32
    %c8_i32 = arith.constant 8 : i32
    %1 = arith.muli %0, %c8_i32 : i32
    %c15_i32 = arith.constant 15 : i32
    %2 = arith.minsi %1, %c15_i32 : i32
    %c0_i32 = arith.constant 0 : i32
    %c0_i32_0 = arith.constant 0 : i32
    %c0_i32_1 = arith.constant 0 : i32
    return %arg0, %2, %c0_i32, %c0_i32_0 : i32, i32, i32, i32
  }
  func.func @transform_3(%arg0: i32, %arg1: i32) -> (i32, i32) {
    %c0_i32 = arith.constant 0 : i32
    %c0_i32_0 = arith.constant 0 : i32
    %c0_i32_1 = arith.constant 0 : i32
    return %c0_i32, %c0_i32_0 : i32, i32
  }
  func.func @transform_4(%arg0: i32, %arg1: i32) -> (i32, i32) {
    %c0_i32 = arith.constant 0 : i32
    %c0_i32_0 = arith.constant 0 : i32
    %c0_i32_1 = arith.constant 0 : i32
    return %c0_i32, %c0_i32_0 : i32, i32
  }
  func.func @transform_5(%arg0: i32, %arg1: i32) -> (i32, i32) {
    %c0_i32 = arith.constant 0 : i32
    %c0_i32_0 = arith.constant 0 : i32
    %c0_i32_1 = arith.constant 0 : i32
    return %c0_i32, %c0_i32_0 : i32, i32
  }
  func.func @transform_6(%arg0: i32, %arg1: i32) -> (i32, i32, i32, i32) {
    %c0_i32 = arith.constant 0 : i32
    %c0_i32_0 = arith.constant 0 : i32
    %c0_i32_1 = arith.constant 0 : i32
    return %arg0, %arg1, %c0_i32, %c0_i32_0 : i32, i32, i32, i32
  }
  func.func @transform_7(%arg0: i32, %arg1: i32) -> (i32, i32, i32, i32) {
    %c0_i32 = arith.constant 0 : i32
    %c0_i32_0 = arith.constant 0 : i32
    %c0_i32_1 = arith.constant 0 : i32
    return %arg0, %arg1, %c0_i32, %c0_i32_0 : i32, i32, i32, i32
  }
}

module attributes {stable_mosaic.version = 11 : i64} {
  func.func @_bn_relu_pool_kernel(%arg0: i32, %arg1: i32, %arg2: memref<1x8x16x128xf32, #tpu.memory_space<vmem>>, %arg3: memref<1x128xf32, #tpu.memory_space<vmem>>, %arg4: memref<1x128xf32, #tpu.memory_space<vmem>>, %arg5: memref<1x8x16x128xf32, #tpu.memory_space<vmem>>, %arg6: memref<1x4x8x128xf32, #tpu.memory_space<vmem>>) attributes {dimension_semantics = [#tpu.dimension_semantics<parallel>, #tpu.dimension_semantics<parallel>], iteration_bounds = array<i64: 2, 2>, scalar_prefetch = 0 : i64, scratch_operands = 0 : i64, tpu.core_type = #tpu.core_type<tc>, window_params = [{transform_indices = @transform_0, window_bounds = array<i64: 1, 8, 16, 128>}, {pipeline_mode = #tpu.pipeline_mode<synchronous>, transform_indices = @transform_1, window_bounds = array<i64: 1, 128>}, {pipeline_mode = #tpu.pipeline_mode<synchronous>, transform_indices = @transform_2, window_bounds = array<i64: 1, 128>}, {transform_indices = @transform_3, window_bounds = array<i64: 1, 8, 16, 128>}, {transform_indices = @transform_4, window_bounds = array<i64: 1, 4, 8, 128>}]} {
    %c0 = arith.constant 0 : index
    %c0_0 = arith.constant 0 : index
    %c0_1 = arith.constant 0 : index
    %c0_2 = arith.constant 0 : index
    %0 = vector.load %arg2[%c0, %c0_0, %c0_1, %c0_2] : memref<1x8x16x128xf32, #tpu.memory_space<vmem>>, vector<1x8x16x128xf32>
    %c0_3 = arith.constant 0 : index
    %c0_4 = arith.constant 0 : index
    %1 = vector.load %arg3[%c0_3, %c0_4] : memref<1x128xf32, #tpu.memory_space<vmem>>, vector<1x128xf32>
    %2 = vector.shape_cast %1 : vector<1x128xf32> to vector<1x1x1x128xf32>
    %3 = vector.broadcast %2 : vector<1x1x1x128xf32> to vector<1x8x16x128xf32>
    %4 = arith.mulf %0, %3 : vector<1x8x16x128xf32>
    %c0_5 = arith.constant 0 : index
    %c0_6 = arith.constant 0 : index
    %5 = vector.load %arg4[%c0_5, %c0_6] : memref<1x128xf32, #tpu.memory_space<vmem>>, vector<1x128xf32>
    %6 = vector.shape_cast %5 : vector<1x128xf32> to vector<1x1x1x128xf32>
    %7 = vector.broadcast %6 : vector<1x1x1x128xf32> to vector<1x8x16x128xf32>
    %8 = arith.addf %4, %7 : vector<1x8x16x128xf32>
    %cst = arith.constant 0.000000e+00 : f32
    %9 = vector.broadcast %cst : f32 to vector<1x8x16x128xf32>
    %10 = arith.maximumf %8, %9 : vector<1x8x16x128xf32>
    %c0_7 = arith.constant 0 : index
    %c0_8 = arith.constant 0 : index
    %c0_9 = arith.constant 0 : index
    %c0_10 = arith.constant 0 : index
    %11 = vector.load %arg5[%c0_7, %c0_8, %c0_9, %c0_10] : memref<1x8x16x128xf32, #tpu.memory_space<vmem>>, vector<1x8x16x128xf32>
    tpu.vector_store %arg5[%c0_7, %c0_8, %c0_9, %c0_10], %10 {strides = array<i32>} : memref<1x8x16x128xf32, #tpu.memory_space<vmem>>, vector<1x8x16x128xf32>,
    %c0_11 = arith.constant 0 : index
    %c0_12 = arith.constant 0 : index
    %c0_13 = arith.constant 0 : index
    %c0_14 = arith.constant 0 : index
    %12 = tpu.strided_load %arg5[%c0_11, %c0_12, %c0_13, %c0_14] {strides = array<i32: 1, 1, 2, 1>} : memref<1x8x16x128xf32, #tpu.memory_space<vmem>>, vector<1x8x8x128xf32>
    %c0_15 = arith.constant 0 : index
    %c0_16 = arith.constant 0 : index
    %c1 = arith.constant 1 : index
    %c0_17 = arith.constant 0 : index
    %13 = tpu.strided_load %arg5[%c0_15, %c0_16, %c1, %c0_17] {strides = array<i32: 1, 1, 2, 1>} : memref<1x8x16x128xf32, #tpu.memory_space<vmem>>, vector<1x8x8x128xf32>
    %14 = arith.maximumf %12, %13 : vector<1x8x8x128xf32>
    %15 = vector.shape_cast %14 : vector<1x8x8x128xf32> to vector<1x4x2x8x128xf32>
    %16 = vector.extract_strided_slice %15 {offsets = [0, 0, 0, 0, 0], sizes = [1, 4, 1, 8, 128], strides = [1, 1, 1, 1, 1]} : vector<1x4x2x8x128xf32> to vector<1x4x1x8x128xf32>
    %17 = vector.shape_cast %16 : vector<1x4x1x8x128xf32> to vector<1x4x8x128xf32>
    %18 = vector.extract_strided_slice %15 {offsets = [0, 0, 1, 0, 0], sizes = [1, 4, 1, 8, 128], strides = [1, 1, 1, 1, 1]} : vector<1x4x2x8x128xf32> to vector<1x4x1x8x128xf32>
    %19 = vector.shape_cast %18 : vector<1x4x1x8x128xf32> to vector<1x4x8x128xf32>
    %20 = arith.maximumf %17, %19 : vector<1x4x8x128xf32>
    %c0_18 = arith.constant 0 : index
    %c0_19 = arith.constant 0 : index
    %c0_20 = arith.constant 0 : index
    %c0_21 = arith.constant 0 : index
    %21 = vector.load %arg6[%c0_18, %c0_19, %c0_20, %c0_21] : memref<1x4x8x128xf32, #tpu.memory_space<vmem>>, vector<1x4x8x128xf32>
    tpu.vector_store %arg6[%c0_18, %c0_19, %c0_20, %c0_21], %20 {strides = array<i32>} : memref<1x4x8x128xf32, #tpu.memory_space<vmem>>, vector<1x4x8x128xf32>,
    return
  }
  func.func @transform_0(%arg0: i32, %arg1: i32) -> (i32, i32, i32, i32) {
    %c0_i32 = arith.constant 0 : i32
    %c0_i32_0 = arith.constant 0 : i32
    %c0_i32_1 = arith.constant 0 : i32
    return %arg0, %arg1, %c0_i32, %c0_i32_0 : i32, i32, i32, i32
  }
  func.func @transform_1(%arg0: i32, %arg1: i32) -> (i32, i32) {
    %c0_i32 = arith.constant 0 : i32
    %c0_i32_0 = arith.constant 0 : i32
    %c0_i32_1 = arith.constant 0 : i32
    return %c0_i32, %c0_i32_0 : i32, i32
  }
  func.func @transform_2(%arg0: i32, %arg1: i32) -> (i32, i32) {
    %c0_i32 = arith.constant 0 : i32
    %c0_i32_0 = arith.constant 0 : i32
    %c0_i32_1 = arith.constant 0 : i32
    return %c0_i32, %c0_i32_0 : i32, i32
  }
  func.func @transform_3(%arg0: i32, %arg1: i32) -> (i32, i32, i32, i32) {
    %c0_i32 = arith.constant 0 : i32
    %c0_i32_0 = arith.constant 0 : i32
    %c0_i32_1 = arith.constant 0 : i32
    return %arg0, %arg1, %c0_i32, %c0_i32_0 : i32, i32, i32, i32
  }
  func.func @transform_4(%arg0: i32, %arg1: i32) -> (i32, i32, i32, i32) {
    %c0_i32 = arith.constant 0 : i32
    %c0_i32_0 = arith.constant 0 : i32
    %c0_i32_1 = arith.constant 0 : i32
    return %arg0, %arg1, %c0_i32, %c0_i32_0 : i32, i32, i32, i32
  }
}

</mosaic_0001>

<bundles_post_ra>
// kernel: down_block_forward.5
= control target key start
LH: loop header
LB: loop body
LE: loop exit
PB: predicated region body
PF: predicated region fallthrough
CT: control target
= control target key end

     0   :  { %s696_s15 = smov 0   ;;  %s698_s16 = smov 0   ;;  %s862_s0 = inlined_call_operand.vmem [shape: f32[2,16,16,128], index: 0, kind: input, shape index: {}]   ;;  %s863_s1 = inlined_call_operand.vmem [shape: f32[1,128], index: 1, kind: input, shape index: {}]   ;;  %s864_s2 = inlined_call_operand.vmem [shape: f32[1,128], index: 2, kind: input, shape index: {}]   ;;  %s865_s3 = inlined_call_operand.vmem [shape: f32[2,16,16,128], index: 3, kind: output, shape index: {0}]   ;;  %s866_s4 = inlined_call_operand.vmem [shape: f32[2,8,8,128], index: 4, kind: output, shape index: {1}]  }
   0x1   :  { %s700_s17 = smov 0   ;;  %s702_s18 = smov 0  }
   0x2   :  { %s704_s19 = smov 0  }
   0x3 LB: > { %s24_s20 = sadd.s32 1, %s661_s17  ;;  %s27_s21 = sadd.s32 1, %s665_s18  ;;  %s669_s19 = sphi %s704_s19, %s15_s19   ;;  %s665_s18 = sphi %s702_s18, %s871_s18   ;;  %s661_s17 = sphi %s700_s17, %s870_s17   ;;  %s657_s16 = sphi %s698_s16, %s869_s16   ;;  %s653_s15 = sphi %s696_s15, %s868_s15  }
   0x4   : > { %p25_p0 = scmp.ge.s32.totalorder %s24_s20, 2  ;;  %p560_p1 = scmp.ge.s32.totalorder %s669_s19, 1 }
   0x5   : > { %p189_p2 = scmp.lt.s32.totalorder %s669_s19, 5 }
   0x6   : > { %s873_s20 = smov (%p25_p0, %s24_s20), 0  ;;  %s875_s21 = smov (!%p25_p0, %s27_s21), %s665_s18 }
   0x7   : > { %p190_p3 = pnand %p560_p1, %p189_p2  ;;  %p29_p4 = scmp.ge.s32.totalorder %s875_s21, 2 }
   0x8   : > { %s561_s22 = sshll.u32 (!%p190_p3), %s653_s15, 3  ;;  %p235_p5 = scmp.lt.s32.totalorder (!%p190_p3), %s657_s16, 1  ;;  %v735_v0 = vld [vmem:[%s863_s1] ss:$0 sm:$0xff] (!%p190_p3) }
   0x9   : > { %s877_s21 = smov (%p29_p4, %s875_s21), 0  ;;  %193 = sbr.rel (%p190_p3) target bundleno = 51 (0x33), region = 32 }
   0xa   : > { %p237_p6 = scmp.lt.s32.totalorder (!%p190_p3), %s561_s22, 15  ;;  %v745_v1 = vld [vmem:[%s864_s2] ss:$0 sm:$0xff] (!%p190_p3)  ;;  %s569_s8 = sshll.u32 (!%p190_p3), %s653_s15, 2 }
   0xb   : > { %p768_p7 = scmp.lt.s32.totalorder (!%p190_p3), %s569_s8, 7 }
  0x10   : > { %s879_s16 = smov (!%p235_p5, %s657_s16), 1  ;;  %s881_s22 = smov (!%p237_p6, %s561_s22), 15 }
  0x11   : > { %s563_s23 = sshll.u32 %s879_s16, 5  ;;  %s562_s24 = sshll.u32 %s881_s22, 1 }
  0x12   : > { %s241_s25 = sadd.s32 %s563_s23, %s562_s24  ;;  %s883_s8 = smov (!%p768_p7, %s569_s8), 7 }
  0x13   : > { %s564_s26 = sshll.u32 %s241_s25, 3  ;;  %s570_s13 = sshll.u32 %s879_s16, 3 }
  0x14   : > { %s740_s5 = scalar_lea.vmem %s862_s0, %s564_s26  ;;  %s775_s12 = scalar_lea.vmem %s865_s3, %s564_s26 }
  0x15   : > { %v266_v2 = vld [vmem:[%s740_s5] sm:$0xff]  ;;  %v267_v3 = vld [vmem:[%s740_s5 + $0x8] sm:$0xff]  ;;  %v268_v4 = vld [vmem:[%s740_s5 + $0x10] sm:$0xff]  ;;  %s262_s14 = sadd.s32 %s570_s13, %s883_s8 }
  0x16   : > { %v289_v5 = vmul.f32 %v735_v0, %v266_v2  ;;  %v290_v6 = vmul.f32 %v735_v0, %v267_v3  ;;  %v291_v7 = vmul.f32 %v735_v0, %v268_v4  ;;  %v269_v8 = vld [vmem:[%s740_s5 + $0x18] sm:$0xff]  ;;  %v270_v9 = vld [vmem:[%s740_s5 + $0x20] sm:$0xff]  ;;  %v271_v10 = vld [vmem:[%s740_s5 + $0x28] sm:$0xff]  ;;  %s571_s15 = sshll.u32 %s262_s14, 3 }
  0x17   : > { %v292_v11 = vmul.f32 %v735_v0, %v269_v8  ;;  %v293_v12 = vmul.f32 %v735_v0, %v270_v9  ;;  %v294_v13 = vmul.f32 %v735_v0, %v271_v10  ;;  %v272_v14 = vld [vmem:[%s740_s5 + $0x30] sm:$0xff]  ;;  %v273_v15 = vld [vmem:[%s740_s5 + $0x38] sm:$0xff]  ;;  %v274_v24 = vld [vmem:[%s740_s5 + $0x40] sm:$0xff]  ;;  %s264_s23 = scalar_lea.vmem %s866_s4, %s571_s15 }
  0x18   : > { %v312_v16 = vadd.f32 %v745_v1, %v289_v5  ;;  %v313_v17 = vadd.f32 %v745_v1, %v290_v6  ;;  %v314_v18 = vadd.f32 %v745_v1, %v291_v7  ;;  %v295_v19 = vmul.f32 %v735_v0, %v272_v14  ;;  %v275_v25 = vld [vmem:[%s740_s5 + $0x48] sm:$0xff]  ;;  %v276_v26 = vld [vmem:[%s740_s5 + $0x50] sm:$0xff]  ;;  %v277_v31 = vld [vmem:[%s740_s5 + $0x58] sm:$0xff] }
  0x19   : > { %v315_v20 = vadd.f32 %v745_v1, %v292_v11  ;;  %v316_v21 = vadd.f32 %v745_v1, %v293_v12  ;;  %v317_v22 = vadd.f32 %v745_v1, %v294_v13  ;;  %v296_v23 = vmul.f32 %v735_v0, %v273_v15  ;;  %v278_v32 = vld [vmem:[%s740_s5 + $0x60] sm:$0xff]  ;;  %v279_v33 = vld [vmem:[%s740_s5 + $0x68] sm:$0xff]  ;;  %v280_v38 = vld [vmem:[%s740_s5 + $0x70] sm:$0xff] }
  0x1a   : > { %v328_v27 = vmax.f32 %v312_v16, 0.0  ;;  %v329_v28 = vmax.f32 %v313_v17, 0.0  ;;  %v330_v29 = vmax.f32 %v314_v18, 0.0  ;;  %v318_v30 = vadd.f32 %v745_v1, %v295_v19  ;;  %v281_v43 = vld [vmem:[%s740_s5 + $0x78] sm:$0xff] }
  0x1b   : > { %v331_v34 = vmax.f32 %v315_v20, 0.0  ;;  %v332_v35 = vmax.f32 %v316_v21, 0.0  ;;  %v333_v36 = vmax.f32 %v317_v22, 0.0  ;;  %v319_v37 = vadd.f32 %v745_v1, %v296_v23 }
  0x1c   : > { %344 = vst [vmem:[%s775_s12] sm:$0xff] %v328_v27  ;;  %345 = vst [vmem:[%s775_s12 + $0x8] sm:$0xff] %v329_v28  ;;  %v334_v39 = vmax.f32 %v318_v30, 0.0  ;;  %v297_v40 = vmul.f32 %v735_v0, %v274_v24  ;;  %v298_v41 = vmul.f32 %v735_v0, %v275_v25  ;;  %v299_v42 = vmul.f32 %v735_v0, %v276_v26 }
  0x1d   : > { %346 = vst [vmem:[%s775_s12 + $0x10] sm:$0xff] %v330_v29  ;;  %347 = vst [vmem:[%s775_s12 + $0x18] sm:$0xff] %v331_v34  ;;  %v335_v44 = vmax.f32 %v319_v37, 0.0  ;;  %v300_v45 = vmul.f32 %v735_v0, %v277_v31  ;;  %v301_v46 = vmul.f32 %v735_v0, %v278_v32  ;;  %v302_v47 = vmul.f32 %v735_v0, %v279_v33 }
  0x1e   : > { %348 = vst [vmem:[%s775_s12 + $0x20] sm:$0xff] %v332_v35  ;;  %349 = vst [vmem:[%s775_s12 + $0x28] sm:$0xff] %v333_v36  ;;  %v320_v48 = vadd.f32 %v745_v1, %v297_v40  ;;  %v321_v49 = vadd.f32 %v745_v1, %v298_v41  ;;  %v322_v50 = vadd.f32 %v745_v1, %v299_v42 }
  0x1f   : > { %350 = vst [vmem:[%s775_s12 + $0x30] sm:$0xff] %v334_v39  ;;  %v303_v51 = vmul.f32 %v735_v0, %v280_v38  ;;  %351 = vst [vmem:[%s775_s12 + $0x38] sm:$0xff] %v335_v44  ;;  %v323_v52 = vadd.f32 %v745_v1, %v300_v45  ;;  %v324_v53 = vadd.f32 %v745_v1, %v301_v46 }
  0x20   : > { %v325_v54 = vadd.f32 %v745_v1, %v302_v47  ;;  %v304_v55 = vmul.f32 %v735_v0, %v281_v43  ;;  %v336_v56 = vmax.f32 %v320_v48, 0.0  ;;  %v337_v57 = vmax.f32 %v321_v49, 0.0 }
  0x21   : > { %v338_v58 = vmax.f32 %v322_v50, 0.0  ;;  %v326_v59 = vadd.f32 %v745_v1, %v303_v51  ;;  %v339_v60 = vmax.f32 %v323_v52, 0.0  ;;  %v340_v61 = vmax.f32 %v324_v53, 0.0 }
  0x22   : > { %v341_v62 = vmax.f32 %v325_v54, 0.0  ;;  %v327_v63 = vadd.f32 %v745_v1, %v304_v55  ;;  %352 = vst [vmem:[%s775_s12 + $0x40] sm:$0xff] %v336_v56  ;;  %353 = vst [vmem:[%s775_s12 + $0x48] sm:$0xff] %v337_v57 }
  0x23   : > { %354 = vst [vmem:[%s775_s12 + $0x50] sm:$0xff] %v338_v58  ;;  %v342_v0 = vmax.f32 %v326_v59, 0.0  ;;  %355 = vst [vmem:[%s775_s12 + $0x58] sm:$0xff] %v339_v60  ;;  %v360_v3 = vld [vmem:[%s775_s12] ss:$2 sm:$0xff] }
  0x24   : > { %356 = vst [vmem:[%s775_s12 + $0x60] sm:$0xff] %v340_v61  ;;  %357 = vst [vmem:[%s775_s12 + $0x68] sm:$0xff] %v341_v62  ;;  %v343_v2 = vmax.f32 %v327_v63, 0.0  ;;  %v581_v4 = vld [vmem:[%s775_s12 + $0x1] ss:$2 sm:$0xff] }
  0x25   : > { %358 = vst [vmem:[%s775_s12 + $0x70] sm:$0xff] %v342_v0  ;;  %v574_v5 = vld [vmem:[%s775_s12 + $0x10] ss:$2 sm:$0xff]  ;;  %v582_v1 = vld [vmem:[%s775_s12 + $0x11] ss:$2 sm:$0xff]  ;;  %v391_v6 = vmax.f32 %v360_v3, %v581_v4 }
  0x26   : > { %v575_v7 = vld [vmem:[%s775_s12 + $0x20] ss:$2 sm:$0xff]  ;;  %359 = vst [vmem:[%s775_s12 + $0x78] sm:$0xff] %v343_v2  ;;  %v392_v8 = vmax.f32 %v574_v5, %v582_v1  ;;  %v583_v9 = vld [vmem:[%s775_s12 + $0x21] ss:$2 sm:$0xff] }
  0x27   : > { %v576_v10 = vld [vmem:[%s775_s12 + $0x30] ss:$2 sm:$0xff]  ;;  %v584_v11 = vld [vmem:[%s775_s12 + $0x31] ss:$2 sm:$0xff]  ;;  %v393_v12 = vmax.f32 %v575_v7, %v583_v9 }
  0x28   : > { %v399_v13 = vmax.f32 %v391_v6, %v392_v8  ;;  %v394_v14 = vmax.f32 %v576_v10, %v584_v11 }
  0x29   : > { %v577_v16 = vld [vmem:[%s775_s12 + $0x40] ss:$2 sm:$0xff]  ;;  %v585_v17 = vld [vmem:[%s775_s12 + $0x41] ss:$2 sm:$0xff] }
  0x2a   : > { %403 = vst [vmem:[%s264_s23] sm:$0xff] %v399_v13  ;;  %v400_v15 = vmax.f32 %v393_v12, %v394_v14  ;;  %v578_v18 = vld [vmem:[%s775_s12 + $0x50] ss:$2 sm:$0xff]  ;;  %v586_v19 = vld [vmem:[%s775_s12 + $0x51] ss:$2 sm:$0xff]  ;;  %v395_v20 = vmax.f32 %v577_v16, %v585_v17 }
  0x2b   : > { %v579_v21 = vld [vmem:[%s775_s12 + $0x60] ss:$2 sm:$0xff]  ;;  %v396_v22 = vmax.f32 %v578_v18, %v586_v19  ;;  %v587_v23 = vld [vmem:[%s775_s12 + $0x61] ss:$2 sm:$0xff] }
  0x2c   : > { %404 = vst [vmem:[%s264_s23 + $0x8] sm:$0xff] %v400_v15  ;;  %v397_v26 = vmax.f32 %v579_v21, %v587_v23 }
  0x2d   : > { %v580_v24 = vld [vmem:[%s775_s12 + $0x70] ss:$2 sm:$0xff]  ;;  %v588_v25 = vld [vmem:[%s775_s12 + $0x71] ss:$2 sm:$0xff]  ;;  %v401_v27 = vmax.f32 %v395_v20, %v396_v22 }
  0x2e   : > { %v398_v28 = vmax.f32 %v580_v24, %v588_v25 }
  0x2f   : > { %405 = vst [vmem:[%s264_s23 + $0x10] sm:$0xff] %v401_v27 }
  0x30   : > { %v402_v29 = vmax.f32 %v397_v26, %v398_v28 }
  0x32   : > { %406 = vst [vmem:[%s264_s23 + $0x18] sm:$0xff] %v402_v29 }
  0x33 PF: > { %s15_s19 = sadd.s32 1, %s669_s19   ;;  %s868_s15 = smov %s661_s17 }
  0x34   : > { %p12_p8 = scmp.ge.s32.totalorder %s15_s19, 6   ;;  %s869_s16 = smov %s665_s18 }
  0x35   : > { %s870_s17 = smov %s873_s20  ;;  %s871_s18 = smov %s877_s21 }
  0x36   :  { %14 = sbr.rel (!%p12_p8) target bundleno = 3 (0x3), region = 89 }

// kernel: down_block_forward.3
= control target key start
LH: loop header
LB: loop body
LE: loop exit
PB: predicated region body
PF: predicated region fallthrough
CT: control target
= control target key end

     0   :  { %s3247_s24 = smov 0   ;;  %s3249_s25 = smov 0   ;;  %s4049_s0 = inlined_call_operand.vmem [shape: f32[2,16,16,4], index: 0, kind: input, shape index: {}, may-alias: {0,1,2}]   ;;  %s4050_s1 = inlined_call_operand.vmem [shape: f32[2,16,16,4], index: 1, kind: input, shape index: {}, may-alias: {0,1,2}]   ;;  %s4051_s2 = inlined_call_operand.vmem [shape: f32[2,16,16,4], index: 2, kind: input, shape index: {}, may-alias: {0,1,2}]   ;;  %s4052_s3 = inlined_call_operand.vmem [shape: bf16[36,128], index: 3, kind: input, shape index: {}]   ;;  %s4053_s4 = inlined_call_operand.vmem [shape: f32[1,4], index: 4, kind: input, shape index: {}]   ;;  %s4054_s5 = inlined_call_operand.vmem [shape: f32[1,4], index: 5, kind: input, shape index: {}]   ;;  %s4055_s6 = inlined_call_operand.vmem [shape: f32[2,16,16,128], index: 6, kind: output, shape index: {0}]   ;;  %s4056_s7 = inlined_call_operand.vmem [shape: f32[2,2,2,128], index: 7, kind: output, shape index: {1}]  }
   0x1   :  { %s3251_s26 = smov 0   ;;  %s3253_s27 = smov 0  }
   0x2   :  { %s3255_s28 = smov 0  }
   0x3 LB: > { %s27_s4 = sadd.s32 1, %s3188_s26  ;;  %s30_s5 = sadd.s32 1, %s3192_s27  ;;  %s3196_s28 = sphi %s3255_s28, %s18_s28   ;;  %s3192_s27 = sphi %s3253_s27, %s4073_s27   ;;  %s3188_s26 = sphi %s3251_s26, %s4072_s26   ;;  %s3184_s25 = sphi %s3249_s25, %s4071_s25   ;;  %s3180_s24 = sphi %s3247_s24, %s4070_s24  }
   0x4   : > { %p28_p0 = scmp.ge.s32.totalorder %s27_s4, 2  ;;  %p2860_p1 = scmp.ge.s32.totalorder %s3196_s28, 1 }
   0x5   : > { %p328_p2 = scmp.lt.s32.totalorder %s3196_s28, 5 }
   0x6   : > { %s4075_s4 = smov (%p28_p0, %s27_s4), 0  ;;  %s4077_s5 = smov (!%p28_p0, %s30_s5), %s3192_s27 }
   0x7   : > { %p329_p3 = pnand %p2860_p1, %p328_p2  ;;  %p32_p4 = scmp.ge.s32.totalorder %s4077_s5, 2 }
   0x8   : > { %s3282_s29 = sshll.u32 (!%p329_p3), %s3180_s24, 3  ;;  %p405_p5 = scmp.lt.s32.totalorder (!%p329_p3), %s3184_s25, 1  ;;  %vm509_vm0 = vcmask (!%p329_p3), 27648   ;;  %vm512_vm1 = vcmask (!%p329_p3), 24576   ;;  %v3198_v0 = vmov (!%p329_p3), 0   ;;  %vm1268_vm8 = vcmask (!%p329_p3), 1042432  }
   0x9   : > { %s4079_s5 = smov (%p32_p4, %s4077_s5), 0  ;;  %332 = sbr.rel (%p329_p3) target bundleno = 588 (0x24c), region = 44 }
   0xa   : > { %p407_p6 = scmp.lt.s32.totalorder (!%p329_p3), %s3282_s29, 15  ;;  %517 = vst.msk [vmem:[#allocation2 + $0x18] sm:$0xf] (!%p329_p3), %vm509_vm0, %v3198_v0  ;;  %518 = vst.msk [vmem:[#allocation2 + $0x1c] sm:$0xf] (!%p329_p3), %vm509_vm0, %v3198_v0  ;;  %s3345_s15 = sadd.s32 (!%p329_p3), 4294967295, %s3282_s29 }
   0xb   : > { %510 = vst.msk [vmem:[#allocation2] sm:$0xf] (!%p329_p3), %vm509_vm0, %v3198_v0  ;;  %511 = vst.msk [vmem:[#allocation2 + $0x4] sm:$0xf] (!%p329_p3), %vm509_vm0, %v3198_v0  ;;  %vm581_vm2 = vsmask.f32 (!%p329_p3), 256 }
   0xc   : > { %513 = vst.msk [vmem:[#allocation2 + $0x8] sm:$0x1] (!%p329_p3), %vm512_vm1, %v3198_v0  ;;  %516 = vst.msk [vmem:[#allocation2 + $0x14] sm:$0x1] (!%p329_p3), %vm512_vm1, %v3198_v0  ;;  %vm582_vm3 = vsmask.f32 (!%p329_p3), 4368 }
   0xd   : > { %514 = vst.msk [vmem:[#allocation2 + $0xc] sm:$0xf] (!%p329_p3), %vm509_vm0, %v3198_v0  ;;  %515 = vst.msk [vmem:[#allocation2 + $0x10] sm:$0xf] (!%p329_p3), %vm509_vm0, %v3198_v0  ;;  %vm746_vm4 = vsmask.f32 (!%p329_p3), 7938 }
   0xe   : > { %519 = vst.msk [vmem:[#allocation2 + $0x20] sm:$0x1] (!%p329_p3), %vm512_vm1, %v3198_v0  ;;  %522 = vst.msk [vmem:[#allocation2 + $0x2c] sm:$0x1] (!%p329_p3), %vm512_vm1, %v3198_v0  ;;  %p417_p7 = scmp.gt.s32.totalorder (!%p329_p3), %s3345_s15, 0  ;;  %p2867_p8 = scmp.lt.s32.totalorder (!%p329_p3), %s3345_s15, 15 }
   0xf   : > { %520 = vst.msk [vmem:[#allocation2 + $0x24] sm:$0xf] (!%p329_p3), %vm509_vm0, %v3198_v0  ;;  %521 = vst.msk [vmem:[#allocation2 + $0x28] sm:$0xf] (!%p329_p3), %vm509_vm0, %v3198_v0  ;;  %p493_p9 = scmp.gt.s32.totalorder (!%p329_p3), %s3180_s24, 0  ;;  %vm1269_vm9 = vcmask (!%p329_p3), 1046532  }
  0x10   : > { %523 = vst.msk [vmem:[#allocation2 + $0x30] sm:$0xf] %vm509_vm0, %v3198_v0  ;;  %524 = vst.msk [vmem:[#allocation2 + $0x34] sm:$0xf] %vm509_vm0, %v3198_v0  ;;  %s4081_s25 = smov (!%p405_p5, %s3184_s25), 1  ;;  %s3199_s21 = smov 12  }
  0x11   : > { %525 = vst.msk [vmem:[#allocation2 + $0x38] sm:$0x1] %vm512_vm1, %v3198_v0  ;;  %528 = vst.msk [vmem:[#allocation2 + $0x44] sm:$0x1] %vm512_vm1, %v3198_v0  ;;  %s408_s30 = scalar_select %p407_p6, %s3282_s29, 15 }
  0x12   : > { %526 = vst.msk [vmem:[#allocation2 + $0x3c] sm:$0xf] %vm509_vm0, %v3198_v0  ;;  %527 = vst.msk [vmem:[#allocation2 + $0x40] sm:$0xf] %vm509_vm0, %v3198_v0  ;;  %s3325_s8 = sshll.u32 %s4081_s25, 5  ;;  %s3200_s22 = smov 24  }
  0x13   : > { %529 = vst.msk [vmem:[#allocation2 + $0x48] sm:$0xf] %vm509_vm0, %v3198_v0  ;;  %530 = vst.msk [vmem:[#allocation2 + $0x4c] sm:$0xf] %vm509_vm0, %v3198_v0  ;;  %s2862_s9 = sshll.u32 %s408_s30, 1  ;;  %s3201_s12 = smov 20  }
  0x14   : > { %531 = vst.msk [vmem:[#allocation2 + $0x50] sm:$0x1] %vm512_vm1, %v3198_v0  ;;  %534 = vst.msk [vmem:[#allocation2 + $0x5c] sm:$0x1] %vm512_vm1, %v3198_v0  ;;  %s3328_s10 = sadd.s32 %s3325_s8, %s2862_s9  ;;  %v757_v17 = vld [vmem:[#allocation2 + $0x18] sm:$0xf] }
  0x15   : > { %532 = vst.msk [vmem:[#allocation2 + $0x54] sm:$0xf] %vm509_vm0, %v3198_v0  ;;  %533 = vst.msk [vmem:[#allocation2 + $0x58] sm:$0xf] %vm509_vm0, %v3198_v0  ;;  %s2864_s11 = sshll.u32 %s3328_s10, 3  ;;  %s3202_s13 = smov 8  }
  0x16   : > { %535 = vst.msk [vmem:[#allocation2 + $0x60] sm:$0xf] %vm509_vm0, %v3198_v0  ;;  %536 = vst.msk [vmem:[#allocation2 + $0x64] sm:$0xf] %vm509_vm0, %v3198_v0  ;;  %s3336_s14 = scalar_lea.vmem %s4049_s0, %s2864_s11  ;;  %v748_v25 = vld [vmem:[#allocation2 + $0xc] sm:$0xf] }
  0x17   : > { %537 = vst.msk [vmem:[#allocation2 + $0x68] sm:$0x1] %vm512_vm1, %v3198_v0  ;;  %540 = vst.msk [vmem:[#allocation2 + $0x74] sm:$0x1] %vm512_vm1, %v3198_v0  ;;  %v471_v1 = vld [vmem:[%s3336_s14 + $0x10] sm:$0xff]  ;;  %v472_v2 = vld [vmem:[%s3336_s14 + $0x18] sm:$0xff] }
  0x18   : > { %538 = vst.msk [vmem:[#allocation2 + $0x6c] sm:$0xf] %vm509_vm0, %v3198_v0  ;;  %539 = vst.msk [vmem:[#allocation2 + $0x70] sm:$0xf] %vm509_vm0, %v3198_v0  ;;  %v469_v3 = vld [vmem:[%s3336_s14] sm:$0xff]  ;;  %v3027_v4 = vpack.c.bf16 %v471_v1, %v471_v1  ;;  %v3028_v5 = vpack.c.bf16 %v472_v2, %v472_v2  ;;  %v470_v6 = vld [vmem:[%s3336_s14 + $0x8] sm:$0xff] }
  0x19   : > { %v3025_v7 = vpack.c.bf16 %v469_v3, %v469_v3  ;;  %v473_v8 = vld [vmem:[%s3336_s14 + $0x20] sm:$0xff]  ;;  %v474_v9 = vld [vmem:[%s3336_s14 + $0x28] sm:$0xff]  ;;  %v3026_v10 = vpack.c.bf16 %v470_v6, %v470_v6  ;;  %vm3349_vm5 = vmor %vm581_vm2, %vm582_vm3  ;;  %s418_s16 = scalar_select %p417_p7, %s3345_s15, 0  ;;  %vm968_vm11 = vsmask.f32 3328  ;;  %vm1375_vm3 = vcmask 97344  }
  0x1a   : > { %v3029_v11 = vpack.c.bf16 %v473_v8, %v473_v8  ;;  %v3030_v12 = vpack.c.bf16 %v474_v9, %v474_v9  ;;  %v602_v13 = vshrl.u32 %v3027_v4, 16  ;;  %v605_v14 = vshll.u32 %v3027_v4, 16  ;;  %vm3357_vm6 = vmand %vm509_vm0, %vm746_vm4  ;;  %v754_v33 = vld [vmem:[#allocation2 + $0x14] sm:$0x1]  ;;  %v761_v39 = vld [vmem:[#allocation2 + $0x20] sm:$0x1] }
  0x1b   : > { %v610_v15 = vshrl.u32 %v3028_v5, 16  ;;  %v613_v16 = vshll.u32 %v3028_v5, 16  ;;  %v585_v18 = vshrl.u32 %v3025_v7, 16  ;;  %v588_v19 = vshll.u32 %v3025_v7, 16  ;;  %vm3363_vm7 = vmand %vm512_vm1, %vm581_vm2  ;;  %v475_v48 = vld [vmem:[%s3336_s14 + $0x30] sm:$0xff]  ;;  %v476_v49 = vld [vmem:[%s3336_s14 + $0x38] sm:$0xff] }
  0x1c   : > { %v593_v20 = vshrl.u32 %v3026_v10, 16  ;;  %v596_v21 = vshll.u32 %v3026_v10, 16  ;;  %v604_v23 = vrot.slane %v602_v13, 7  ;;  %v619_v26 = vshrl.u32 %v3029_v11, 16  ;;  %s4083_s16 = smov (!%p2867_p8, %s418_s16), 15  ;;  %v477_v50 = vld [vmem:[%s3336_s14 + $0x40] sm:$0xff]  ;;  %vm3408_vm10 = vmor %vm1268_vm8, %vm1269_vm9 }
  0x1d   : > { %v612_v24 = vrot.slane %v610_v15, 7  ;;  %v622_v27 = vshll.u32 %v3029_v11, 16  ;;  %v587_v29 = vrot.slane %v585_v18, 7  ;;  %v627_v31 = vshrl.u32 %v3030_v12, 16  ;;  %v764_v53 = vld [vmem:[#allocation2 + $0x24] sm:$0xf] }
  0x1e   : > { %v595_v30 = vrot.slane %v593_v20, 7  ;;  %v630_v32 = vshll.u32 %v3030_v12, 16  ;;  %v607_v34 = vor.u32 %v605_v14, %v604_v23  ;;  %v608_v35 = vrot.slane %v604_v23, 4  ;;  %v768_v56 = vld [vmem:[#allocation2 + $0x2c] sm:$0x1]  ;;  %s2872_s17 = sshll.u32 %s4083_s16, 1 }
  0x1f   : > { %v615_v36 = vor.u32 %v613_v16, %v612_v24  ;;  %v617_v37 = vrot.slane %v612_v24, 4  ;;  %v590_v40 = vor.u32 %v588_v19, %v587_v29  ;;  %v591_v41 = vrot.slane %v587_v29, 4  ;;  %s3400_s18 = sadd.s32 %s2872_s17, %s3325_s8  ;;  %v771_v7 = vld [vmem:[#allocation2 + $0x30] sm:$0xf]  ;;  %v775_v13 = vld [vmem:[#allocation2 + $0x38] sm:$0x1] }
  0x20   : > { %v598_v42 = vor.u32 %v596_v21, %v595_v30  ;;  %v600_v43 = vrot.slane %v595_v30, 4  ;;  %v758_v45 = vsel %vm3357_vm6, %v607_v34, %v757_v17  ;;  %v621_v46 = vrot.slane %v619_v26, 7  ;;  %s3405_s19 = scalar_select %p493_p9, 1, 0  ;;  %v778_v14 = vld [vmem:[#allocation2 + $0x3c] sm:$0xf] }
  0x21   : > { %v616_v44 = vsel %vm3349_vm5, %v608_v35, %v615_v36  ;;  %v629_v47 = vrot.slane %v627_v31, 7  ;;  %759 = vst [vmem:[#allocation2 + $0x18] sm:$0xf] %v758_v45  ;;  %v749_v52 = vsel %vm3357_vm6, %v590_v40, %v748_v25  ;;  %v762_v55 = vsel %vm3363_vm7, %v617_v37, %v761_v39  ;;  %s2874_s20 = sshll.u32 %s3400_s18, 3  ;;  %s3203_s15 = smov 32  }
  0x22   : > { %760 = vst.msk [vmem:[#allocation2 + $0x1c] sm:$0xf] %vm509_vm0, %v616_v44  ;;  %v599_v51 = vsel %vm3349_vm5, %v591_v41, %v598_v42  ;;  %v755_v54 = vsel %vm3363_vm7, %v600_v43, %v754_v33  ;;  %750 = vst [vmem:[#allocation2 + $0xc] sm:$0xf] %v749_v52  ;;  %v624_v57 = vor.u32 %v622_v27, %v621_v46  ;;  %v625_v58 = vrot.slane %v621_v46, 4  ;;  %s427_s9 = scalar_lea.vmem %s4050_s1, %s2874_s20  ;;  %s3024_s16 = sadd.s32 8, %s3282_s29 }
  0x23   : > { %751 = vst.msk [vmem:[#allocation2 + $0x10] sm:$0xf] %vm509_vm0, %v599_v51  ;;  %v632_v59 = vor.u32 %v630_v32, %v629_v47  ;;  %v634_v60 = vrot.slane %v629_v47, 4  ;;  %756 = vst [vmem:[#allocation2 + $0x14] sm:$0x1] %v755_v54  ;;  %v3031_v61 = vpack.c.bf16 %v475_v48, %v475_v48  ;;  %v3032_v62 = vpack.c.bf16 %v476_v49, %v476_v49  ;;  %v478_v54 = vld [vmem:[%s3336_s14 + $0x48] sm:$0xff] }
  0x24   : > { %763 = vst [vmem:[#allocation2 + $0x20] sm:$0x1] %v762_v55  ;;  %v3033_v63 = vpack.c.bf16 %v477_v50, %v477_v50  ;;  %v765_v1 = vsel %vm3357_vm6, %v624_v57, %v764_v53  ;;  %vm969_vm12 = vsmask.f32 7440  ;;  %p3478_p10 = scmp.lt.s32.totalorder %s3024_s16, 15  ;;  %s3204_s20 = smov 16  }
  0x25   : > { %v633_v0 = vsel %vm3349_vm5, %v625_v58, %v632_v59  ;;  %v769_v2 = vsel %vm3363_vm7, %v634_v60, %v768_v56  ;;  %766 = vst [vmem:[#allocation2 + $0x24] sm:$0xf] %v765_v1  ;;  %v636_v3 = vshrl.u32 %v3031_v61, 16  ;;  %v639_v4 = vshll.u32 %v3031_v61, 16  ;;  %vm3487_vm13 = vmor %vm968_vm11, %vm969_vm12  ;;  %s3205_s23 = smov 28   ;;  %s3206_s30 = smov 4  }
  0x26   : > { %767 = vst.msk [vmem:[#allocation2 + $0x28] sm:$0xf] %vm509_vm0, %v633_v0  ;;  %770 = vst [vmem:[#allocation2 + $0x2c] sm:$0x1] %v769_v2  ;;  %v644_v5 = vshrl.u32 %v3032_v62, 16  ;;  %v647_v6 = vshll.u32 %v3032_v62, 16  ;;  %v498_v60 = vstv %s3405_s19 }
  0x27   : > { %v653_v8 = vshrl.u32 %v3033_v63, 16  ;;  %v656_v9 = vshll.u32 %v3033_v63, 16  ;;  %v638_v11 = vrot.slane %v636_v3, 7  ;;  %v3446_v3 = vld [vmem:[%s427_s9] sm:$0xff]  ;;  %s4085_s16 = smov (!%p3478_p10, %s3024_s16), 15  ;;  %vm3519_vm14 = vcmp.eq.s32.totalorder %v498_v60, 1 }
  0x28   : > { %v646_v12 = vrot.slane %v644_v5, 7  ;;  %v2270_v43 = vld [vmem:[#allocation2 + $0x18] sm:$0xe]  ;;  %s4087_s16 = smov (!%p3478_p10, %s4085_s16), 15  ;;  %p462_p11 = scmp.lt.s32.totalorder %s3180_s24, 1  ;;  %vm935_vm1 = vcmask 31744  }
  0x29   : > { %v3131_v15 = vld [vmem:[#allocation2 + $0x18] sm:$0xff]   ;;  %v3413_v16 = vrot.slane %v653_v8, 7  ;;  %v641_v18 = vor.u32 %v639_v4, %v638_v11  ;;  %v642_v19 = vrot.slane %v638_v11, 4  ;;  %v1746_v25 = vld [vmem:[#allocation2 + $0xc] sm:$0xe]  ;;  %v2988_v51 = vrot.slane %v2270_v43, 9 }
  0x2a   : > { %v3132_v17 = vld [vmem:[#allocation2 + $0xc] sm:$0xff]   ;;  %v649_v20 = vor.u32 %v647_v6, %v646_v12  ;;  %1442 = vrot.lane.b32.xlu1 %v3131_v15, %s3199_s21  ;;  %v3134_v21 = vld [vmem:[#allocation2 + $0x18] sm:$0xff]   ;;  %v651_v23 = vrot.slane %v646_v12, 4  ;;  %v1748_v27 = vld [vmem:[#allocation2 + $0x14] sm:$0x1]  ;;  %v2956_v32 = vrot.slane %v1746_v25, 9 }
  0x2b   : > { %v658_v24 = vor.u32 %v656_v9, %v3413_v16  ;;  %1440 = vrot.lane.b32.xlu0 %v3132_v17, %s3199_s21  ;;  %v1747_v26 = vld [vmem:[#allocation2 + $0x10] sm:$0xf]  ;;  %v772_v30 = vsel %vm3357_vm6, %v641_v18, %v771_v7  ;;  %v1799_v36 = vrot.slane %v1748_v27, 5  ;;  %v1223_v37 = vld [vmem:[#allocation2 + $0xc] sm:$0xe]  ;;  %v3453_v17 = vpack.c.bf16 %v478_v54, %v478_v54  ;;  %s3498_s29 = sshll.u32 %s4087_s16, 1 }
  0x2c   : > { %v650_v29 = vsel %vm3349_vm5, %v642_v19, %v649_v20  ;;  %773 = vst [vmem:[#allocation2 + $0x30] sm:$0xf] %v772_v30  ;;  %v776_v33 = vsel %vm3363_vm7, %v651_v23, %v775_v13  ;;  %v1796_v35 = vrot.slane %v1747_v26, 5  ;;  %v1224_v39 = vld [vmem:[#allocation2 + $0x10] sm:$0xf]  ;;  %v2925_v41 = vrot.slane %v1223_v37, 9  ;;  %s442_s18 = sadd.s32 %s3498_s29, %s3325_s8 }
  0x2d   : > { %v3133_v31 = vld [vmem:[#allocation2 + $0x24] sm:$0xff]   ;;  %774 = vst.msk [vmem:[#allocation2 + $0x34] sm:$0xf] %vm509_vm0, %v650_v29  ;;  %v779_v34 = vsel %vm3357_vm6, %v658_v24, %v778_v14  ;;  %777 = vst [vmem:[#allocation2 + $0x38] sm:$0x1] %v776_v33  ;;  %v1280_v42 = vrot.slane %v1224_v39, 5 }
  0x2e   : > { %780 = vst [vmem:[#allocation2 + $0x3c] sm:$0xf] %v779_v34  ;;  %1966 = vrot.lane.b32.xlu1 %v3133_v31, %s3200_s22  ;;  %v1225_v40 = vld [vmem:[#allocation2 + $0x14] sm:$0x1]  ;;  %v1797_v44 = vsel %vm3408_vm10, %v2956_v32, %v1796_v35  ;;  %v1798_v45 = vrot.slane %v1796_v35, 4  ;;  %v3448_v9 = vld [vmem:[%s427_s9 + $0x8] sm:$0xff] }
  0x2f   : > { %1964 = vrot.lane.b32.xlu0 %v3134_v21, %s3200_s22  ;;  %v1283_v46 = vrot.slane %v1225_v40, 5  ;;  %v2271_v47 = vld [vmem:[#allocation2 + $0x1c] sm:$0xf]  ;;  %v2272_v48 = vld [vmem:[#allocation2 + $0x20] sm:$0x1]  ;;  %v1281_v49 = vsel %vm3408_vm10, %v2925_v41, %v1280_v42  ;;  %v1282_v50 = vrot.slane %v1280_v42, 4 }
  0x30   : > { %v2320_v52 = vrot.slane %v2271_v47, 5  ;;  %v1749_v53 = vld [vmem:[#allocation2 + $0x18] sm:$0xe]  ;;  %v1800_v55 = vsel %vm3408_vm10, %v1798_v45, %v1799_v36  ;;  %v2323_v56 = vrot.slane %v2272_v48, 5  ;;  %v1750_v57 = vld [vmem:[#allocation2 + $0x1c] sm:$0xf]  ;;  %v496_v36 = vpack.c.bf16 %v3448_v9, %v3446_v3 }
  0x31   : > { %v1751_v58 = vld [vmem:[#allocation2 + $0x20] sm:$0x1]  ;;  %v2957_v59 = vrot.slane %v1749_v53, 9  ;;  %v2964_v61 = vcombine.low %v1797_v44, %v1800_v55  ;;  %v1284_v62 = vsel %vm3408_vm10, %v1282_v50, %v1283_v46  ;;  %v2273_v1 = vld [vmem:[#allocation2 + $0x24] sm:$0xe]  ;;  %v1803_v5 = vrot.slane %v1750_v57, 5 }
  0x32   : > { %v2321_v63 = vsel %vm3408_vm10, %v2988_v51, %v2320_v52  ;;  %v2322_v0 = vrot.slane %v2320_v52, 4  ;;  %v2274_v2 = vld [vmem:[#allocation2 + $0x28] sm:$0xf]  ;;  %v2933_v4 = vcombine.low %v1281_v49, %v1284_v62  ;;  %v1806_v6 = vrot.slane %v1751_v58, 5  ;;  %v2275_v7 = vld [vmem:[#allocation2 + $0x2c] sm:$0x1] }
  0x33   : > { %v2989_v8 = vrot.slane %v2273_v1, 9  ;;  %1874 = vrot.lane.b32.xlu0 %v2964_v61, %s3201_s12  ;;  %v2327_v12 = vrot.slane %v2274_v2, 5  ;;  %v2330_v13 = vrot.slane %v2275_v7, 5  ;;  %v1229_v14 = vld [vmem:[#allocation2 + $0x24] sm:$0xe]  ;;  %v1804_v19 = vsel %vm3408_vm10, %v2957_v59, %v1803_v5  ;;  %s3716_s19 = sshll.u32 %s442_s18, 3 }
  0x34   : > { %v2324_v11 = vsel %vm3408_vm10, %v2322_v0, %v2323_v56  ;;  %v1230_v15 = vld [vmem:[#allocation2 + $0x28] sm:$0xf]  ;;  %1353 = vrot.lane.b32.xlu1 %v2933_v4, %s3202_s13  ;;  %v1805_v20 = vrot.slane %v1803_v5, 4  ;;  %v1231_v21 = vld [vmem:[#allocation2 + $0x2c] sm:$0x1]  ;;  %v2927_v23 = vrot.slane %v1229_v14, 9  ;;  %s444_s18 = scalar_lea.vmem %s4051_s2, %s3716_s19 }
  0x35   : > { %v2996_v18 = vcombine.low %v2321_v63, %v2324_v11  ;;  %v1226_v24 = vld [vmem:[#allocation2 + $0x18] sm:$0xe]  ;;  %v2328_v25 = vsel %vm3408_vm10, %v2989_v8, %v2327_v12  ;;  %v2329_v26 = vrot.slane %v2327_v12, 4  ;;  %v1294_v27 = vrot.slane %v1230_v15, 5  ;;  %v1227_v30 = vld [vmem:[#allocation2 + $0x1c] sm:$0xf] }
  0x36   : > { %v1297_v29 = vrot.slane %v1231_v21, 5  ;;  %v1807_v31 = vsel %vm3408_vm10, %v1805_v20, %v1806_v6  ;;  %v1228_v32 = vld [vmem:[#allocation2 + $0x20] sm:$0x1]  ;;  %v2926_v33 = vrot.slane %v1226_v24, 9  ;;  %v1287_v34 = vrot.slane %v1227_v30, 5  ;;  %s4089_s24 = smov (!%p462_p11, %s3180_s24), 1 }
  0x37   : > { %v1476_v35 = vld [vmem:[#allocation2 + $0x18] sm:$0xf]  ;;  %2398 = vrot.lane.b32.xlu0 %v2996_v18, %s3203_s15  ;;  %v2965_v37 = vcombine.low %v1804_v19, %v1807_v31  ;;  %v2331_v39 = vsel %vm3408_vm10, %v2329_v26, %v2330_v13  ;;  %v1295_v40 = vsel %vm3408_vm10, %v2927_v23, %v1294_v27  ;;  %v1296_v41 = vrot.slane %v1294_v27, 4  ;;  %v1477_v42 = vld [vmem:[#allocation2 + $0x1c] sm:$0xf]  ;;  %s2886_s10 = sshll.u32 %s4081_s25, 1 }
  0x38   : > { %v1478_v43 = vld [vmem:[#allocation2 + $0x20] sm:$0x1]  ;;  %v2997_v44 = vcombine.low %v2328_v25, %v2331_v39  ;;  %v1288_v45 = vsel %vm3408_vm10, %v2926_v33, %v1287_v34  ;;  %v1289_v46 = vrot.slane %v1287_v34, 4  ;;  %v1290_v47 = vrot.slane %v1228_v32, 5  ;;  %v2000_v52 = vld [vmem:[#allocation2 + $0x24] sm:$0xf] }
  0x39   : > { %1876 = vrot.lane.b32.xlu1 %v2965_v37, %s3201_s12  ;;  %v1298_v48 = vsel %vm3408_vm10, %v1296_v41, %v1297_v29  ;;  %v1522_v49 = vshrl.u32 %v1476_v35, 16  ;;  %v1525_v50 = vshll.u32 %v1476_v35, 16  ;;  %v1531_v51 = vshll.u32 %v1477_v42, 16  ;;  %v2001_v57 = vld [vmem:[#allocation2 + $0x28] sm:$0xf] }
  0x3a   : > { %v2935_v53 = vcombine.low %v1295_v40, %v1298_v48  ;;  %v1291_v54 = vsel %vm3408_vm10, %v1289_v46, %v1290_v47  ;;  %v1535_v55 = vshrl.u32 %v1477_v42, 16  ;;  %v1541_v56 = vshll.u32 %v1478_v43, 16  ;;  %v2002_v58 = vld [vmem:[#allocation2 + $0x2c] sm:$0x1]  ;;  %v948_v18 = vld [vmem:[#allocation2 + $0x10] sm:$0xf] }
  0x3b   : > { %2400 = vrot.lane.b32.xlu0 %v2997_v44, %s3203_s15  ;;  %v2934_v59 = vcombine.low %v1288_v45, %v1291_v54  ;;  %v1524_v61 = vrot.slane %v1522_v49, 4  ;;  %v1527_v62 = vrot.slane %v1525_v50, 5  ;;  %v1533_v63 = vrot.slane %v1531_v51, 5  ;;  %v947_v0 = vld [vmem:[#allocation2 + $0xc] sm:$0xf] }
  0x3c   : > { %v1537_v1 = vrot.slane %v1535_v55, 4  ;;  %v1543_v2 = vrot.slane %v1541_v56, 5  ;;  %v2046_v4 = vshrl.u32 %v2000_v52, 16  ;;  %v2049_v5 = vshll.u32 %v2000_v52, 16  ;;  %v949_v25 = vld [vmem:[#allocation2 + $0x14] sm:$0x1] }
  0x3d   : > { %1357 = vrot.lane.b32.xlu1 %v2935_v53, %s3202_s13  ;;  %v1528_v6 = vor.u32 %v1527_v62, %v1524_v61  ;;  %v2055_v7 = vshll.u32 %v2001_v57, 16  ;;  %v2059_v8 = vshrl.u32 %v2001_v57, 16  ;;  %v2065_v11 = vshll.u32 %v2002_v58, 16  ;;  %v950_v35 = vld [vmem:[#allocation2 + $0x18] sm:$0xf] }
  0x3e   : > { %v1538_v13 = vor.u32 %v1537_v1, %v1533_v63  ;;  %v2048_v14 = vrot.slane %v2046_v4, 4  ;;  %v2051_v15 = vrot.slane %v2049_v5, 5  ;;  %v996_v19 = vshrl.u32 %v947_v0, 16  ;;  %v951_v42 = vld [vmem:[#allocation2 + $0x1c] sm:$0xf] }
  0x3f   : > { %1355 = vrot.lane.b32.xlu0 %v2934_v59, %s3202_s13  ;;  %v1529_v20 = vrot.slane %v1528_v6, 4  ;;  %v2057_v21 = vrot.slane %v2055_v7, 5  ;;  %v2061_v23 = vrot.slane %v2059_v8, 4  ;;  %v2067_v24 = vrot.slane %v2065_v11, 5  ;;  %v952_v50 = vld [vmem:[#allocation2 + $0x20] sm:$0x1] }
  0x40   : > { %v1539_v26 = vrot.slane %v1538_v13, 4  ;;  %v2052_v27 = vor.u32 %v2051_v15, %v2048_v14  ;;  %v998_v29 = vrot.slane %v996_v19, 4  ;;  %v999_v30 = vshll.u32 %v947_v0, 16  ;;  %v1473_v52 = vld [vmem:[#allocation2 + $0xc] sm:$0xf] }
  0x41   : > { %v1534_v31 = vsel %vm3487_vm13, %v1529_v20, %v1533_v63  ;;  %v2062_v32 = vor.u32 %v2061_v23, %v2057_v21  ;;  %v1005_v33 = vshll.u32 %v948_v18, 16  ;;  %v1009_v34 = vshrl.u32 %v948_v18, 16  ;;  %v1474_v57 = vld [vmem:[#allocation2 + $0x10] sm:$0xf]  ;;  %v1475_v63 = vld [vmem:[#allocation2 + $0x14] sm:$0x1] }
  0x42   : > { %v1544_v37 = vsel %vm3487_vm13, %v1539_v26, %v1543_v2  ;;  %v2053_v39 = vrot.slane %v2052_v27, 4  ;;  %v1001_v40 = vrot.slane %v999_v30, 5  ;;  %v1015_v41 = vshll.u32 %v949_v25, 16  ;;  %v953_v18 = vld [vmem:[#allocation2 + $0x24] sm:$0xf] }
  0x43   : > { %v2949_v43 = vcombine.low %v1534_v31, %v1544_v37  ;;  %v2063_v44 = vrot.slane %v2062_v32, 4  ;;  %v1007_v45 = vrot.slane %v1005_v33, 5  ;;  %v1011_v46 = vrot.slane %v1009_v34, 4  ;;  %v955_v32 = vld [vmem:[#allocation2 + $0x2c] sm:$0x1] }
  0x44   : > { %v2058_v47 = vsel %vm3487_vm13, %v2053_v39, %v2057_v21  ;;  %v1002_v48 = vor.u32 %v1001_v40, %v998_v29  ;;  %v1017_v49 = vrot.slane %v1015_v41, 5  ;;  %v1020_v51 = vshrl.u32 %v950_v35, 16  ;;  %v1997_v41 = vld [vmem:[#allocation2 + $0x18] sm:$0xf] }
  0x45   : > { %1715 = vrot.lane.b32.xlu1 %v2949_v43, %s3204_s20  ;;  %v2068_v53 = vsel %vm3487_vm13, %v2063_v44, %v2067_v24  ;;  %v1012_v54 = vor.u32 %v1011_v46, %v1007_v45  ;;  %v1023_v55 = vshll.u32 %v950_v35, 16  ;;  %v1029_v56 = vshll.u32 %v951_v42, 16  ;;  %v954_v24 = vld [vmem:[#allocation2 + $0x28] sm:$0xf]  ;;  %v1998_v46 = vld [vmem:[#allocation2 + $0x1c] sm:$0xf] }
  0x46   : > { %v2981_v58 = vcombine.low %v2058_v47, %v2068_v53  ;;  %v1003_v59 = vrot.slane %v1002_v48, 4  ;;  %v1022_v61 = vrot.slane %v1020_v51, 4  ;;  %v1033_v62 = vshrl.u32 %v951_v42, 16  ;;  %v1484_v47 = vld [vmem:[#allocation2 + $0x38] sm:$0x1] }
  0x47   : > { %v1013_v0 = vrot.slane %v1012_v54, 4  ;;  %v1025_v1 = vrot.slane %v1023_v55, 5  ;;  %v1031_v2 = vrot.slane %v1029_v56, 5  ;;  %v1039_v4 = vshll.u32 %v952_v50, 16  ;;  %v1999_v55 = vld [vmem:[#allocation2 + $0x20] sm:$0x1] }
  0x48   : > { %v1008_v5 = vsel %vm3487_vm13, %v1003_v59, %v1007_v45  ;;  %v1035_v6 = vrot.slane %v1033_v62, 4  ;;  %v1498_v7 = vshrl.u32 %v1473_v52, 16  ;;  %v1501_v8 = vshll.u32 %v1473_v52, 16 }
  0x49   : > { %2239 = vrot.lane.b32.xlu1 %v2981_v58, %s3205_s23  ;;  %v1018_v11 = vsel %vm3487_vm13, %v1013_v0, %v1017_v49  ;;  %v1026_v13 = vor.u32 %v1025_v1, %v1022_v61  ;;  %v1041_v14 = vrot.slane %v1039_v4, 5  ;;  %v1507_v15 = vshll.u32 %v1474_v57, 16 }
  0x4a   : > { %v2917_v19 = vcombine.low %v1008_v5, %v1018_v11  ;;  %v1036_v20 = vor.u32 %v1035_v6, %v1031_v2  ;;  %v1500_v21 = vrot.slane %v1498_v7, 4  ;;  %v1503_v23 = vrot.slane %v1501_v8, 5  ;;  %v1480_v7 = vld [vmem:[#allocation2 + $0x28] sm:$0xf] }
  0x4b   : > { %v1027_v25 = vrot.slane %v1026_v13, 4  ;;  %v1509_v26 = vrot.slane %v1507_v15, 5  ;;  %v1511_v27 = vshrl.u32 %v1474_v57, 16  ;;  %v1517_v29 = vshll.u32 %v1475_v63, 16  ;;  %v1479_v57 = vld [vmem:[#allocation2 + $0x24] sm:$0xf] }
  0x4c   : > { %1189 = vrot.lane.b32.xlu0 %v2917_v19, %s3206_s30  ;;  %v1037_v30 = vrot.slane %v1036_v20, 4  ;;  %v1504_v31 = vor.u32 %v1503_v23, %v1500_v21  ;;  %v1044_v33 = vshrl.u32 %v953_v18, 16  ;;  %v1047_v34 = vshll.u32 %v953_v18, 16 }
  0x4d   : > { %v1032_v35 = vsel %vm3487_vm13, %v1027_v25, %v1031_v2  ;;  %v1513_v37 = vrot.slane %v1511_v27, 4  ;;  %v1519_v39 = vrot.slane %v1517_v29, 5  ;;  %v1053_v40 = vshll.u32 %v954_v24, 16 }
  0x4e   : > { %v1042_v42 = vsel %vm3487_vm13, %v1037_v30, %v1041_v14  ;;  %v1505_v43 = vrot.slane %v1504_v31, 4  ;;  %v1046_v44 = vrot.slane %v1044_v33, 4  ;;  %v1049_v45 = vrot.slane %v1047_v34, 5 }
  0x4f   : > { %v2918_v48 = vcombine.low %v1032_v35, %v1042_v42  ;;  %v1514_v49 = vor.u32 %v1513_v37, %v1509_v26  ;;  %v1055_v50 = vrot.slane %v1053_v40, 5  ;;  %v1057_v51 = vshrl.u32 %v954_v24, 16  ;;  %v1481_v24 = vld [vmem:[#allocation2 + $0x2c] sm:$0x1]  ;;  %v1482_v37 = vld [vmem:[#allocation2 + $0x30] sm:$0xf] }
  0x50   : > { %v1510_v52 = vsel %vm3487_vm13, %v1505_v43, %v1509_v26  ;;  %v1050_v53 = vor.u32 %v1049_v45, %v1046_v44  ;;  %v1063_v54 = vshll.u32 %v955_v32, 16  ;;  %v2022_v56 = vshrl.u32 %v1997_v41, 16  ;;  %v3136_v44 = vld [vmem:[#allocation2 + $0x30] sm:$0xff]  }
  0x51   : > { %1191 = vrot.lane.b32.xlu1 %v2918_v48, %s3206_s30  ;;  %v1515_v58 = vrot.slane %v1514_v49, 4  ;;  %v1059_v59 = vrot.slane %v1057_v51, 4  ;;  %v2025_v60 = vshll.u32 %v1997_v41, 16  ;;  %v2031_v61 = vshll.u32 %v1998_v46, 16 }
  0x52   : > { %v1051_v62 = vrot.slane %v1050_v53, 4  ;;  %v1065_v63 = vrot.slane %v1063_v54, 5  ;;  %v2024_v0 = vrot.slane %v2022_v56, 4  ;;  %v2035_v1 = vshrl.u32 %v1998_v46, 16 }
  0x53   : > { %v1520_v2 = vsel %vm3487_vm13, %v1515_v58, %v1519_v39  ;;  %v1060_v4 = vor.u32 %v1059_v59, %v1055_v50  ;;  %v2027_v5 = vrot.slane %v2025_v60, 5  ;;  %v2033_v6 = vrot.slane %v2031_v61, 5  ;;  %v831_v58 = vld [vmem:[#allocation2] sm:$0xf]  ;;  %v835_v59 = vld [vmem:[#allocation2 + $0x8] sm:$0x1] }
  0x54   : > { %v2948_v8 = vcombine.low %v1510_v52, %v1520_v2  ;;  %v1056_v11 = vsel %vm3487_vm13, %v1051_v62, %v1055_v50  ;;  %v2037_v13 = vrot.slane %v2035_v1, 4  ;;  %v2041_v14 = vshll.u32 %v1999_v55, 16  ;;  %v1483_v52 = vld [vmem:[#allocation2 + $0x34] sm:$0xf]  ;;  %v1752_v62 = vld [vmem:[#allocation2 + $0x24] sm:$0xe] }
  0x55   : > { %v1061_v15 = vrot.slane %v1060_v4, 4  ;;  %v2028_v18 = vor.u32 %v2027_v5, %v2024_v0  ;;  %v1546_v19 = vshrl.u32 %v1479_v57, 16  ;;  %v1549_v20 = vshll.u32 %v1479_v57, 16  ;;  %v1753_v4 = vld [vmem:[#allocation2 + $0x28] sm:$0xf] }
  0x56   : > { %1713 = vrot.lane.b32.xlu0 %v2948_v8, %s3204_s20  ;;  %v2038_v21 = vor.u32 %v2037_v13, %v2033_v6  ;;  %v2043_v23 = vrot.slane %v2041_v14, 5  ;;  %v1555_v25 = vshll.u32 %v1480_v7, 16  ;;  %v1559_v26 = vshrl.u32 %v1480_v7, 16  ;;  %v1754_v5 = vld [vmem:[#allocation2 + $0x2c] sm:$0x1] }
  0x57   : > { %v1066_v27 = vsel %vm3487_vm13, %v1061_v15, %v1065_v63  ;;  %v2029_v29 = vrot.slane %v2028_v18, 4  ;;  %v1548_v30 = vrot.slane %v1546_v19, 4  ;;  %v1551_v31 = vrot.slane %v1549_v20, 5  ;;  %v1755_v19 = vld [vmem:[#allocation2 + $0x30] sm:$0xe] }
  0x58   : > { %v2919_v32 = vcombine.low %v1056_v11, %v1066_v27  ;;  %v2039_v33 = vrot.slane %v2038_v21, 4  ;;  %v1557_v34 = vrot.slane %v1555_v25, 5  ;;  %v1561_v35 = vrot.slane %v1559_v26, 4  ;;  %v1756_v20 = vld [vmem:[#allocation2 + $0x34] sm:$0xf] }
  0x59   : > { %v2034_v39 = vsel %vm3487_vm13, %v2029_v29, %v2033_v6  ;;  %v1552_v40 = vor.u32 %v1551_v31, %v1548_v30  ;;  %v1565_v41 = vshll.u32 %v1481_v24, 16  ;;  %v500_v42 = vsel %vm3519_vm14, %v496_v36, 0  ;;  %v3135_v36 = vld [vmem:[#allocation2 + $0x24] sm:$0xff]   ;;  %v3550_v26 = vld [vmem:[#allocation2 + $0x38] sm:$0x1]  ;;  %v479_v27 = vld [vmem:[%s3336_s14 + $0x50] sm:$0xff] }
  0x5a   : > { %1193 = vrot.lane.b32.xlu1 %v2919_v32, %s3206_s30  ;;  %v2044_v43 = vsel %vm3487_vm13, %v2039_v33, %v2043_v23  ;;  %v1562_v45 = vor.u32 %v1561_v35, %v1557_v34  ;;  %v2904_v46 = vcombine.low %v500_v42, %v500_v42  ;;  %v2905_v48 = vcombine.high %v500_v42, %v500_v42  ;;  %v480_v33 = vld [vmem:[%s3336_s14 + $0x58] sm:$0xff] }
  0x5b   : > { %v2980_v49 = vcombine.low %v2034_v39, %v2044_v43  ;;  %v1553_v50 = vrot.slane %v1552_v40, 4  ;;  %v1567_v51 = vrot.slane %v1565_v41, 5  ;;  %v1570_v53 = vshrl.u32 %v1482_v37, 16  ;;  %v482_v41 = vld [vmem:[%s3336_s14 + $0x68] sm:$0xff] }
  0x5c   : > { %v1563_v54 = vrot.slane %v1562_v45, 4  ;;  %v812_v55 = vshrl.u32 %v2904_v46, 16  ;;  %v815_v3 = vshll.u32 %v2904_v46, 16  ;;  %v820_v9 = vshrl.u32 %v2905_v48, 16  ;;  %v2003_v45 = vld [vmem:[#allocation2 + $0x30] sm:$0xf] }
  0x5d   : > { %2237 = vrot.lane.b32.xlu0 %v2980_v49, %s3205_s23  ;;  %v1558_v56 = vsel %vm3487_vm13, %v1553_v50, %v1557_v34  ;;  %v823_v57 = vshll.u32 %v2905_v48, 16  ;;  %v1572_v60 = vrot.slane %v1570_v53, 4  ;;  %v1573_v61 = vshll.u32 %v1482_v37, 16  ;;  %v481_v34 = vld [vmem:[%s3336_s14 + $0x60] sm:$0xff]  ;;  %v483_v48 = vld [vmem:[%s3336_s14 + $0x70] sm:$0xff] }
  0x5e   : > { %1446 = vrot.lane.b32.xlu1 %v3136_v44, %s3199_s21  ;;  %v1568_v63 = vsel %vm3487_vm13, %v1563_v54, %v1567_v51  ;;  %v814_v0 = vrot.slane %v812_v55, 7  ;;  %v822_v1 = vrot.slane %v820_v9, 7  ;;  %v1579_v2 = vshll.u32 %v1483_v52, 16  ;;  %v2004_v9 = vld [vmem:[#allocation2 + $0x34] sm:$0xf] }
  0x5f   : > { %v2950_v6 = vcombine.low %v1558_v56, %v1568_v63  ;;  %v1575_v7 = vrot.slane %v1573_v61, 5  ;;  %v1583_v8 = vshrl.u32 %v1483_v52, 16  ;;  %v1589_v11 = vshll.u32 %v1484_v47, 16 }
  0x60   : > { %v817_v13 = vor.u32 %v815_v3, %v814_v0  ;;  %v818_v14 = vrot.slane %v814_v0, 4  ;;  %v825_v15 = vor.u32 %v823_v57, %v822_v1  ;;  %v827_v18 = vrot.slane %v822_v1, 4 }
  0x61   : > { %1444 = vrot.lane.b32.xlu0 %v3135_v36, %s3199_s21  ;;  %v1576_v21 = vor.u32 %v1575_v7, %v1572_v60  ;;  %v1581_v23 = vrot.slane %v1579_v2, 5  ;;  %v1585_v24 = vrot.slane %v1583_v8, 4  ;;  %v1591_v25 = vrot.slane %v1589_v11, 5 }
  0x62   : > { %v826_v29 = vsel %vm3349_vm5, %v818_v14, %v825_v15  ;;  %v832_v30 = vsel %vm3357_vm6, %v817_v13, %v831_v58  ;;  %v836_v31 = vsel %vm3363_vm7, %v827_v18, %v835_v59  ;;  %v2958_v32 = vrot.slane %v1752_v62, 9 }
  0x63   : > { %833 = vst [vmem:[#allocation2] sm:$0xf] %v832_v30  ;;  %834 = vst.msk [vmem:[#allocation2 + $0x4] sm:$0xf] %vm509_vm0, %v826_v29  ;;  %v1577_v35 = vrot.slane %v1576_v21, 4  ;;  %v1586_v37 = vor.u32 %v1585_v24, %v1581_v23  ;;  %v1810_v39 = vrot.slane %v1753_v4, 5  ;;  %v3564_v46 = vpack.c.bf16 %v479_v27, %v479_v27 }
  0x64   : > { %837 = vst [vmem:[#allocation2 + $0x8] sm:$0x1] %v836_v31  ;;  %v1813_v40 = vrot.slane %v1754_v5, 5  ;;  %v2959_v42 = vrot.slane %v1755_v19, 9  ;;  %v1817_v43 = vrot.slane %v1756_v20, 5  ;;  %v1820_v44 = vrot.slane %v3550_v26, 5 }
  0x65   : > { %1717 = vrot.lane.b32.xlu0 %v2950_v6, %s3204_s20  ;;  %v1587_v49 = vrot.slane %v1586_v37, 4  ;;  %v1812_v50 = vrot.slane %v1810_v39, 4  ;;  %v3568_v51 = vpack.c.bf16 %v480_v33, %v480_v33  ;;  %v3570_v52 = vpack.c.bf16 %v481_v34, %v481_v34  ;;  %v2005_v24 = vld [vmem:[#allocation2 + $0x38] sm:$0x1]  ;;  %v782_v26 = vld [vmem:[#allocation2 + $0x44] sm:$0x1] }
  0x66   : > { %v1582_v53 = vsel %vm3487_vm13, %v1577_v35, %v1581_v23  ;;  %v3576_v54 = vsel %vm3408_vm10, %v2958_v32, %v1810_v39  ;;  %v661_v55 = vshrl.u32 %v3453_v17, 16  ;;  %v664_v3 = vshll.u32 %v3453_v17, 16  ;;  %v2006_v32 = vld [vmem:[#allocation2 + $0x3c] sm:$0xf] }
  0x67   : > { %v1592_v47 = vsel %vm3487_vm13, %v1587_v49, %v1591_v25  ;;  %v3584_v36 = vsel %vm3408_vm10, %v1812_v50, %v1813_v40  ;;  %v2070_v56 = vshrl.u32 %v2003_v45, 16  ;;  %v2073_v57 = vshll.u32 %v2003_v45, 16  ;;  %v2277_v50 = vld [vmem:[#allocation2 + $0x34] sm:$0xf] }
  0x68   : > { %v659_v58 = vrot.slane %v3413_v16, 4  ;;  %v663_v59 = vrot.slane %v661_v55, 7  ;;  %v3587_v60 = vpack.c.bf16 %v482_v41, %v482_v41  ;;  %v3589_v61 = vpack.c.bf16 %v483_v48, %v483_v48 }
  0x69   : > { %v1819_v62 = vrot.slane %v1817_v43, 4  ;;  %v2072_v63 = vrot.slane %v2070_v56, 4  ;;  %v2075_v17 = vrot.slane %v2073_v57, 5  ;;  %v2079_v0 = vshll.u32 %v2004_v9, 16  ;;  %v2276_v56 = vld [vmem:[#allocation2 + $0x30] sm:$0xe] }
  0x6a   : > { %v1220_v1 = vld [vmem:[#allocation2] sm:$0xe]  ;;  %v1221_v2 = vld [vmem:[#allocation2 + $0x4] sm:$0xf]  ;;  %v3591_v5 = vcombine.low %v1582_v53, %v1592_v47  ;;  %v2966_v6 = vcombine.low %v3576_v54, %v3584_v36  ;;  %v3597_v16 = vsel %vm3408_vm10, %v2959_v42, %v1817_v43  ;;  %v666_v7 = vor.u32 %v664_v3, %v663_v59 }
  0x6b   : > { %v1222_v4 = vld [vmem:[#allocation2 + $0x8] sm:$0x1]  ;;  %v2924_v8 = vrot.slane %v1220_v1, 9  ;;  %v1273_v11 = vrot.slane %v1221_v2, 5  ;;  %v944_v14 = vld [vmem:[#allocation2] sm:$0xf]  ;;  %v2076_v25 = vor.u32 %v2075_v17, %v2072_v63  ;;  %v3606_v37 = vsel %vm3408_vm10, %v1819_v62, %v1820_v44 }
  0x6c   : > { %v1276_v13 = vrot.slane %v1222_v4, 5  ;;  %v668_v15 = vrot.slane %v663_v59, 4  ;;  %v945_v18 = vld [vmem:[#allocation2 + $0x4] sm:$0xf]  ;;  %v946_v19 = vld [vmem:[#allocation2 + $0x8] sm:$0x1]  ;;  %v667_v23 = vsel %vm3349_vm5, %v659_v58, %v666_v7  ;;  %v2967_v17 = vcombine.low %v3597_v16, %v3606_v37 }
  0x6d   : > { %v972_v20 = vshrl.u32 %v944_v14, 16  ;;  %v975_v21 = vshll.u32 %v944_v14, 16  ;;  %v1274_v27 = vsel %vm3408_vm10, %v2924_v8, %v1273_v11  ;;  %v1275_v29 = vrot.slane %v1273_v11, 4  ;;  %781 = vst.msk [vmem:[#allocation2 + $0x40] sm:$0xf] %vm509_vm0, %v667_v23  ;;  %v3152_v4 = vld [vmem:[%s4052_s3 + $0x8] sm:$0xff]  }
  0x6e   : > { %v981_v30 = vshll.u32 %v945_v18, 16  ;;  %v985_v31 = vshrl.u32 %v945_v18, 16  ;;  %v991_v35 = vshll.u32 %v946_v19, 16  ;;  %v2077_v42 = vrot.slane %v2076_v25, 4  ;;  %v2278_v62 = vld [vmem:[#allocation2 + $0x38] sm:$0x1] }
  0x6f   : > { %v974_v33 = vrot.slane %v972_v20, 4  ;;  %v977_v34 = vrot.slane %v975_v21, 5  ;;  %v1277_v39 = vsel %vm3408_vm10, %v1275_v29, %v1276_v13  ;;  %v2081_v48 = vrot.slane %v2079_v0, 5  ;;  %v956_v2 = vld [vmem:[#allocation2 + $0x30] sm:$0xf] }
  0x70   : > { %v983_v40 = vrot.slane %v981_v30, 5  ;;  %v987_v41 = vrot.slane %v985_v31, 4  ;;  %v2932_v43 = vcombine.low %v1274_v27, %v1277_v39  ;;  %v2083_v49 = vshrl.u32 %v2004_v9, 16  ;;  %v3151_v9 = vld [vmem:[%s4052_s3] sm:$0xff]   ;;  %v957_v20 = vld [vmem:[#allocation2 + $0x34] sm:$0xf] }
  0x71   : > { %v978_v45 = vor.u32 %v977_v34, %v974_v33  ;;  %v993_v55 = vrot.slane %v991_v35, 5  ;;  %v2089_v3 = vshll.u32 %v2005_v24, 16  ;;  %v783_v47 = vsel %vm3363_vm7, %v668_v15, %v782_v26  ;;  %3052 = vmatprep.subr.bf16.mxu0 %v3151_v9  ;;  %3074 = vmatprep.subr.bf16.mxu1 %v3151_v9  ;;  %v958_v31 = vld [vmem:[#allocation2 + $0x38] sm:$0x1]  ;;  %v959_v37 = vld [vmem:[#allocation2 + $0x3c] sm:$0xf] }
  0x72   : > { %v988_v53 = vor.u32 %v987_v41, %v983_v40  ;;  %1351 = vrot.lane.b32.xlu1 %v2932_v43, %s3202_s13  ;;  %v2085_v57 = vrot.slane %v2083_v49, 4  ;;  %784 = vst [vmem:[#allocation2 + $0x44] sm:$0x1] %v783_v47  ;;  %v2094_v58 = vshrl.u32 %v2006_v32, 16  ;;  %v2097_v59 = vshll.u32 %v2006_v32, 16  ;;  %3053 = vmatpush3.bf16.msra.mxu0 %v3151_v9 }
  0x73   : > { %v979_v44 = vrot.slane %v978_v45, 4  ;;  %v2091_v0 = vrot.slane %v2089_v3, 5  ;;  %v2334_v1 = vrot.slane %v2277_v50, 5  ;;  %v2990_v14 = vrot.slane %v2276_v56, 9  ;;  %3077 = vmatpush3.bf16.msra.mxu1 %v3151_v9  ;;  %3054 = vmatprep.subr.bf16.mxu0 %v3152_v4  ;;  %v2279_v32 = vld [vmem:[#allocation2 + $0x3c] sm:$0xe] }
  0x74   : > { %v989_v63 = vrot.slane %v988_v53, 4  ;;  %v2086_v8 = vor.u32 %v2085_v57, %v2081_v48  ;;  %v2007_v11 = vld [vmem:[#allocation2 + $0x40] sm:$0xf]  ;;  %v2096_v13 = vrot.slane %v2094_v58, 4  ;;  %v2099_v16 = vrot.slane %v2097_v59, 5  ;;  %3075 = vmatprep.subr.bf16.mxu1 %v3152_v4  ;;  %v3137_v58 = vld [vmem:[#allocation2 + $0x30] sm:$0xff]  }
  0x75   : > { %v984_v7 = vsel %vm3487_vm13, %v979_v44, %v983_v40  ;;  %v2103_v18 = vshll.u32 %v2007_v11, 16  ;;  %v2107_v19 = vshrl.u32 %v2007_v11, 16  ;;  %v2082_v23 = vsel %vm3487_vm13, %v2077_v42, %v2081_v48  ;;  %v2280_v45 = vld [vmem:[#allocation2 + $0x40] sm:$0xf] }
  0x76   : > { %v994_v15 = vsel %vm3487_vm13, %v989_v63, %v993_v55  ;;  %1719 = vrot.lane.b32.xlu1 %v3591_v5, %s3204_s20  ;;  %v2087_v24 = vrot.slane %v2086_v8, 4  ;;  %v2336_v25 = vrot.slane %v2334_v1, 4  ;;  %v2100_v26 = vor.u32 %v2099_v16, %v2096_v13  ;;  %3055 = vmatpush3.bf16.msra.mxu0 %v3152_v4  ;;  %v3138_v48 = vld [vmem:[#allocation2 + $0x3c] sm:$0xff]  }
  0x77   : > { %v2916_v21 = vcombine.low %v984_v7, %v994_v15  ;;  %v2105_v27 = vrot.slane %v2103_v18, 5  ;;  %v2109_v29 = vrot.slane %v2107_v19, 4  ;;  %v2337_v30 = vrot.slane %v2278_v62, 5  ;;  %3078 = vmatpush3.bf16.msra.mxu1 %v3152_v4  ;;  %v1232_v7 = vld [vmem:[#allocation2 + $0x30] sm:$0xe] }
  0x78   : > { %v2092_v33 = vsel %vm3487_vm13, %v2087_v24, %v2091_v0  ;;  %v1068_v34 = vshrl.u32 %v956_v2, 16  ;;  %v1071_v5 = vshll.u32 %v956_v2, 16  ;;  %v1077_v35 = vshll.u32 %v957_v20, 16  ;;  %v960_v2 = vld [vmem:[#allocation2 + $0x40] sm:$0xf] }
  0x79   : > { %1187 = vrot.lane.b32.xlu0 %v2916_v21, %s3206_s30  ;;  %v3632_v39 = vcombine.low %v2082_v23, %v2092_v33  ;;  %v2008_v40 = vld [vmem:[#allocation2 + $0x44] sm:$0x1]  ;;  %v2101_v41 = vrot.slane %v2100_v26, 4  ;;  %v2110_v42 = vor.u32 %v2109_v29, %v2105_v27  ;;  %v3636_v43 = vsel %vm3408_vm10, %v2990_v14, %v2334_v1  ;;  %v1233_v18 = vld [vmem:[#allocation2 + $0x34] sm:$0xf] }
  0x7a   : > { %1880 = vrot.lane.b32.xlu1 %v2967_v17, %s3201_s12  ;;  %v2113_v49 = vshll.u32 %v2008_v40, 16  ;;  %v3641_v50 = vsel %vm3408_vm10, %v2336_v25, %v2337_v30  ;;  %v1070_v53 = vrot.slane %v1068_v34, 4  ;;  %v1073_v55 = vrot.slane %v1071_v5, 5  ;;  %v2281_v3 = vld [vmem:[#allocation2 + $0x44] sm:$0x1] }
  0x7b   : > { %v2106_v47 = vsel %vm3487_vm13, %v2101_v41, %v2105_v27  ;;  %v2111_v56 = vrot.slane %v2110_v42, 4  ;;  %v1079_v44 = vrot.slane %v1077_v35, 5  ;;  %v1081_v57 = vshrl.u32 %v957_v20, 16  ;;  %v961_v54 = vld [vmem:[#allocation2 + $0x44] sm:$0x1] }
  0x7c   : > { %v2115_v59 = vrot.slane %v2113_v49, 5  ;;  %v1074_v62 = vor.u32 %v1073_v55, %v1070_v53  ;;  %v1087_v9 = vshll.u32 %v958_v31, 16  ;;  %v2991_v63 = vrot.slane %v2279_v32, 9  ;;  %v1234_v24 = vld [vmem:[#allocation2 + $0x38] sm:$0x1] }
  0x7d   : > { %1878 = vrot.lane.b32.xlu0 %v2966_v6, %s3201_s12  ;;  %v1083_v17 = vrot.slane %v1081_v57, 4  ;;  %v2341_v0 = vrot.slane %v2280_v45, 5  ;;  %v2344_v1 = vrot.slane %v2281_v3, 5  ;;  %v1092_v4 = vshrl.u32 %v959_v37, 16  ;;  %v1235_v30 = vld [vmem:[#allocation2 + $0x3c] sm:$0xe] }
  0x7e   : > { %1970 = vrot.lane.b32.xlu1 %v3138_v48, %s3200_s22  ;;  %v2116_v8 = vsel %vm3487_vm13, %v2111_v56, %v2115_v59  ;;  %v1075_v11 = vrot.slane %v1074_v62, 4  ;;  %v1089_v13 = vrot.slane %v1087_v9, 5  ;;  %v1095_v36 = vshll.u32 %v959_v37, 16  ;;  %v1236_v5 = vld [vmem:[#allocation2 + $0x40] sm:$0xf] }
  0x7f   : > { %v2983_v6 = vcombine.low %v2106_v47, %v2116_v8  ;;  %v1084_v14 = vor.u32 %v1083_v17, %v1079_v44  ;;  %v3654_v15 = vsel %vm3408_vm10, %v2991_v63, %v2341_v0  ;;  %v2343_v16 = vrot.slane %v2341_v0, 4  ;;  %v1237_v42 = vld [vmem:[#allocation2 + $0x44] sm:$0x1] }
  0x80   : > { %v1080_v19 = vsel %vm3487_vm13, %v1075_v11, %v1079_v44  ;;  %v1094_v20 = vrot.slane %v1092_v4, 4  ;;  %v1097_v21 = vrot.slane %v1095_v36, 5  ;;  %v1101_v23 = vshll.u32 %v960_v2, 16  ;;  %v1487_v8 = vld [vmem:[#allocation2 + $0x44] sm:$0x1] }
  0x81   : > { %1968 = vrot.lane.b32.xlu0 %v3137_v58, %s3200_s22  ;;  %v1085_v25 = vrot.slane %v1084_v14, 4  ;;  %v2345_v26 = vsel %vm3408_vm10, %v2343_v16, %v2344_v1  ;;  %v1105_v27 = vshrl.u32 %v960_v2, 16  ;;  %v1111_v29 = vshll.u32 %v961_v54, 16  ;;  %v1485_v58 = vld [vmem:[#allocation2 + $0x3c] sm:$0xf] }
  0x82   : > { %2243 = vrot.lane.b32.xlu1 %v2983_v6, %s3205_s23  ;;  %v2998_v31 = vcombine.low %v3636_v43, %v3641_v50  ;;  %v1098_v32 = vor.u32 %v1097_v21, %v1094_v20  ;;  %v1103_v33 = vrot.slane %v1101_v23, 5  ;;  %v2928_v34 = vrot.slane %v1232_v7, 9  ;;  %v785_v7 = vld [vmem:[#allocation2 + $0x48] sm:$0xf]  ;;  %v1759_v20 = vld [vmem:[#allocation2 + $0x40] sm:$0xf] }
  0x83   : > { %v1090_v35 = vsel %vm3487_vm13, %v1085_v25, %v1089_v13  ;;  %v2999_v37 = vcombine.low %v3654_v15, %v2345_v26  ;;  %v1107_v40 = vrot.slane %v1105_v27, 4  ;;  %v1301_v41 = vrot.slane %v1233_v18, 5  ;;  %v1758_v15 = vld [vmem:[#allocation2 + $0x3c] sm:$0xe]  ;;  %v789_v26 = vld [vmem:[#allocation2 + $0x50] sm:$0x1] }
  0x84   : > { %v2920_v45 = vcombine.low %v1080_v19, %v1090_v35  ;;  %v1099_v48 = vrot.slane %v1098_v32, 4  ;;  %v1304_v49 = vrot.slane %v1234_v24, 5  ;;  %v2929_v53 = vrot.slane %v1235_v30, 9  ;;  %v1760_v32 = vld [vmem:[#allocation2 + $0x44] sm:$0x1] }
  0x85   : > { %2241 = vrot.lane.b32.xlu0 %v3632_v39, %s3205_s23  ;;  %v1108_v43 = vor.u32 %v1107_v40, %v1103_v33  ;;  %v1113_v50 = vrot.slane %v1111_v29, 5  ;;  %v1303_v55 = vrot.slane %v1301_v41, 4  ;;  %v1308_v3 = vrot.slane %v1236_v5, 5 }
  0x86   : > { %1195 = vrot.lane.b32.xlu1 %v2920_v45, %s3206_s30  ;;  %v1302_v47 = vsel %vm3408_vm10, %v2928_v34, %v1301_v41  ;;  %v1311_v56 = vrot.slane %v1237_v42, 5  ;;  %v670_v44 = vshrl.u32 %v3564_v46, 16  ;;  %v673_v57 = vshll.u32 %v3564_v46, 16  ;;  %v1486_v46 = vld [vmem:[#allocation2 + $0x40] sm:$0xf] }
  0x87   : > { %v1104_v39 = vsel %vm3487_vm13, %v1099_v48, %v1103_v33  ;;  %v1109_v59 = vrot.slane %v1108_v43, 4  ;;  %v1305_v62 = vsel %vm3408_vm10, %v1303_v55, %v1304_v49  ;;  %v1310_v9 = vrot.slane %v1308_v3, 4  ;;  %v3139_v45 = vld [vmem:[#allocation2 + $0x3c] sm:$0xff]  }
  0x88   : > { %v1309_v63 = vsel %vm3408_vm10, %v2929_v53, %v1308_v3  ;;  %v672_v17 = vrot.slane %v670_v44, 7  ;;  %v678_v0 = vshrl.u32 %v3568_v51, 16  ;;  %v681_v1 = vshll.u32 %v3568_v51, 16 }
  0x89   : > { %2402 = vrot.lane.b32.xlu0 %v2998_v31, %s3203_s15  ;;  %v1114_v2 = vsel %vm3487_vm13, %v1109_v59, %v1113_v50  ;;  %v1312_v4 = vsel %vm3408_vm10, %v1310_v9, %v1311_v56  ;;  %v1594_v11 = vshrl.u32 %v1485_v58, 16  ;;  %v1597_v13 = vshll.u32 %v1485_v58, 16  ;;  %v792_v59 = vld [vmem:[#allocation2 + $0x54] sm:$0xf] }
  0x8a   : > { %v2921_v54 = vcombine.low %v1104_v39, %v1114_v2  ;;  %v2936_v36 = vcombine.low %v1302_v47, %v1305_v62  ;;  %v675_v6 = vor.u32 %v673_v57, %v672_v17  ;;  %v676_v14 = vrot.slane %v672_v17, 4 }
  0x8b   : > { %v680_v16 = vrot.slane %v678_v0, 7  ;;  %v1596_v18 = vrot.slane %v1594_v11, 4  ;;  %v1599_v19 = vrot.slane %v1597_v13, 5  ;;  %v1603_v51 = vshll.u32 %v1486_v46, 16  ;;  %v796_v0 = vld [vmem:[#allocation2 + $0x5c] sm:$0x1] }
  0x8c   : > { %1197 = vrot.lane.b32.xlu1 %v2921_v54, %s3206_s30  ;;  %v2937_v21 = vcombine.low %v1309_v63, %v1312_v4  ;;  %v786_v23 = vsel %vm3357_vm6, %v675_v6, %v785_v7  ;;  %v1607_v24 = vshrl.u32 %v1486_v46, 16  ;;  %v1613_v25 = vshll.u32 %v1487_v8, 16  ;;  %v799_v54 = vld [vmem:[#allocation2 + $0x60] sm:$0xf] }
  0x8d   : > { %2404 = vrot.lane.b32.xlu0 %v2999_v37, %s3203_s15  ;;  %v683_v27 = vor.u32 %v681_v1, %v680_v16  ;;  %v685_v29 = vrot.slane %v680_v16, 4  ;;  %787 = vst [vmem:[#allocation2 + $0x48] sm:$0xf] %v786_v23  ;;  %v1600_v30 = vor.u32 %v1599_v19, %v1596_v18  ;;  %v1605_v31 = vrot.slane %v1603_v51, 5 }
  0x8e   : > { %v1609_v33 = vrot.slane %v1607_v24, 4  ;;  %v1615_v34 = vrot.slane %v1613_v25, 5  ;;  %v2960_v5 = vrot.slane %v1758_v15, 9  ;;  %v1824_v35 = vrot.slane %v1759_v20, 5 }
  0x8f   : > { %v684_v37 = vsel %vm3349_vm5, %v676_v14, %v683_v27  ;;  %v1601_v40 = vrot.slane %v1600_v30, 4  ;;  %v790_v41 = vsel %vm3363_vm7, %v685_v29, %v789_v26  ;;  %v687_v42 = vshrl.u32 %v3570_v52, 16 }
  0x90   : > { %1361 = vrot.lane.b32.xlu1 %v2937_v21, %s3202_s13  ;;  %788 = vst.msk [vmem:[#allocation2 + $0x4c] sm:$0xf] %vm509_vm0, %v684_v37  ;;  %v1610_v48 = vor.u32 %v1609_v33, %v1605_v31  ;;  %791 = vst [vmem:[#allocation2 + $0x50] sm:$0x1] %v790_v41  ;;  %v1826_v49 = vrot.slane %v1824_v35, 4  ;;  %v1827_v53 = vrot.slane %v1760_v32, 5  ;;  %v1825_v63 = vsel %vm3408_vm10, %v2960_v5, %v1824_v35 }
  0x91   : > { %1359 = vrot.lane.b32.xlu0 %v2936_v36, %s3202_s13  ;;  %v690_v43 = vshll.u32 %v3570_v52, 16  ;;  %v689_v50 = vrot.slane %v687_v42, 7  ;;  %v695_v55 = vshrl.u32 %v3587_v60, 16  ;;  %v1606_v3 = vsel %vm3487_vm13, %v1601_v40, %v1605_v31 }
  0x92   : > { %v1611_v47 = vrot.slane %v1610_v48, 4  ;;  %v698_v56 = vshll.u32 %v3587_v60, 16  ;;  %v704_v44 = vshrl.u32 %v3589_v61, 16  ;;  %v707_v62 = vshll.u32 %v3589_v61, 16 }
  0x93   : > { %v692_v57 = vor.u32 %v690_v43, %v689_v50  ;;  %v693_v58 = vrot.slane %v689_v50, 4  ;;  %v697_v39 = vrot.slane %v695_v55, 7  ;;  %v1828_v60 = vsel %vm3408_vm10, %v1826_v49, %v1827_v53  ;;  %v484_v49 = vld [vmem:[%s3336_s14 + $0x78] sm:$0xff]  ;;  %s3822_s14 = scalar_select %p462_p11, 1, 0 }
  0x94   : > { %v1616_v52 = vsel %vm3487_vm13, %v1611_v47, %v1615_v34  ;;  %v1488_v9 = vld [vmem:[#allocation2 + $0x48] sm:$0xf]  ;;  %v3720_v13 = vrot.slane %v704_v44, 7  ;;  %v2968_v15 = vcombine.low %v1825_v63, %v1828_v60  ;;  %v3744_v47 = vld [vmem:[%s444_s18] sm:$0xff]  ;;  %v3752_v60 = vpack.c.bf16 %v484_v49, %v484_v49 }
  0x95   : > { %1448 = vrot.lane.b32.xlu0 %v3139_v45, %s3199_s21  ;;  %v1761_v17 = vld [vmem:[#allocation2 + $0x48] sm:$0xe]  ;;  %v2952_v1 = vcombine.low %v1606_v3, %v1616_v52  ;;  %v1618_v46 = vshrl.u32 %v1488_v9, 16  ;;  %v1621_v2 = vshll.u32 %v1488_v9, 16  ;;  %v700_v61 = vor.u32 %v698_v56, %v697_v39 }
  0x96   : > { %v2961_v4 = vrot.slane %v1761_v17, 9  ;;  %v702_v7 = vrot.slane %v697_v39, 4  ;;  %v793_v8 = vsel %vm3357_vm6, %v692_v57, %v792_v59  ;;  %v2009_v11 = vld [vmem:[#allocation2 + $0x48] sm:$0xf]  ;;  %v709_v27 = vor.u32 %v707_v62, %v3720_v13 }
  0x97   : > { %v3140_v36 = vld [vmem:[#allocation2 + $0x48] sm:$0xff]   ;;  %v1620_v14 = vrot.slane %v1618_v46, 4  ;;  %794 = vst [vmem:[#allocation2 + $0x54] sm:$0xf] %v793_v8  ;;  %v1490_v16 = vld [vmem:[#allocation2 + $0x50] sm:$0x1]  ;;  %v701_v20 = vsel %vm3349_vm5, %v693_v58, %v700_v61 }
  0x98   : > { %v1489_v6 = vld [vmem:[#allocation2 + $0x4c] sm:$0xf]  ;;  %v1623_v18 = vrot.slane %v1621_v2, 5  ;;  %1450 = vrot.lane.b32.xlu1 %v3140_v36, %s3199_s21  ;;  %v1637_v21 = vshll.u32 %v1490_v16, 16  ;;  %v1763_v24 = vld [vmem:[#allocation2 + $0x50] sm:$0x1]  ;;  %v797_v26 = vsel %vm3363_vm7, %v702_v7, %v796_v0  ;;  %v800_v37 = vsel %vm3357_vm6, %v709_v27, %v799_v54 }
  0x99   : > { %1721 = vrot.lane.b32.xlu0 %v2952_v1, %s3204_s20  ;;  %v1627_v19 = vshll.u32 %v1489_v6, 16  ;;  %v1631_v51 = vshrl.u32 %v1489_v6, 16  ;;  %v1762_v23 = vld [vmem:[#allocation2 + $0x4c] sm:$0xf]  ;;  %795 = vst.msk [vmem:[#allocation2 + $0x58] sm:$0xf] %vm509_vm0, %v701_v20 }
  0x9a   : > { %v2118_v25 = vshrl.u32 %v2009_v11, 16  ;;  %v1624_v29 = vor.u32 %v1623_v18, %v1620_v14  ;;  %v1831_v32 = vrot.slane %v1762_v23, 5  ;;  %798 = vst [vmem:[#allocation2 + $0x5c] sm:$0x1] %v797_v26  ;;  %v1639_v33 = vrot.slane %v1637_v21, 5  ;;  %v3141_v48 = vld [vmem:[#allocation2 + $0x48] sm:$0xff]  }
  0x9b   : > { %v1629_v30 = vrot.slane %v1627_v19, 5  ;;  %v1633_v31 = vrot.slane %v1631_v51, 4  ;;  %v1834_v34 = vrot.slane %v1763_v24, 5  ;;  %v2010_v5 = vld [vmem:[#allocation2 + $0x4c] sm:$0xf]  ;;  %v2121_v50 = vshll.u32 %v2009_v11, 16 }
  0x9c   : > { %v2011_v35 = vld [vmem:[#allocation2 + $0x50] sm:$0x1]  ;;  %v1625_v40 = vrot.slane %v1624_v29, 4  ;;  %v3739_v42 = vsel %vm3408_vm10, %v2961_v4, %v1831_v32  ;;  %v1833_v45 = vrot.slane %v1831_v32, 4  ;;  %801 = vst [vmem:[#allocation2 + $0x60] sm:$0xf] %v800_v37  ;;  %v3742_v53 = vpop.permute.xlu1 %1442 }
  0x9d   : > { %v1634_v41 = vor.u32 %v1633_v31, %v1629_v30  ;;  %1882 = vrot.lane.b32.xlu0 %v2968_v15, %s3201_s12  ;;  %v2120_v43 = vrot.slane %v2118_v25, 4  ;;  %v2127_v55 = vshll.u32 %v2010_v5, 16  ;;  %v2131_v3 = vshrl.u32 %v2010_v5, 16  ;;  %v3746_v56 = vld [vmem:[%s444_s18 + $0x8] sm:$0xff]  ;;  %v3754_v17 = vpop.permute.xlu0 %1440  ;;  %v2284_v18 = vld [vmem:[#allocation2 + $0x50] sm:$0x1] }
  0x9e   : > { %v1630_v44 = vsel %vm3487_vm13, %v1625_v40, %v1629_v30  ;;  %v1835_v58 = vsel %vm3408_vm10, %v1833_v45, %v1834_v34  ;;  %v2137_v39 = vshll.u32 %v2011_v35, 16  ;;  %v2012_v59 = vld [vmem:[#allocation2 + $0x54] sm:$0xf]  ;;  %v2123_v62 = vrot.slane %v2121_v50, 5  ;;  %v2282_v63 = vld [vmem:[#allocation2 + $0x48] sm:$0xe] }
  0x9f   : > { %v1635_v57 = vrot.slane %v1634_v41, 4  ;;  %v2129_v52 = vrot.slane %v2127_v55, 5  ;;  %v2133_v9 = vrot.slane %v2131_v3, 4  ;;  %v2969_v1 = vcombine.low %v3739_v42, %v1835_v58  ;;  %v2283_v36 = vld [vmem:[#allocation2 + $0x4c] sm:$0xf] }
  0xa0   : > { %v2139_v46 = vrot.slane %v2137_v39, 5  ;;  %v2013_v2 = vld [vmem:[#allocation2 + $0x58] sm:$0xf]  ;;  %v504_v4 = vpack.c.bf16 %v3746_v56, %v3744_v47  ;;  %v2124_v7 = vor.u32 %v2123_v62, %v2120_v43  ;;  %v2142_v54 = vshrl.u32 %v2012_v59, 16  ;;  %v3762_v19 = vpop.permute.xlu1 %1966  ;;  %v962_v24 = vld [vmem:[#allocation2 + $0x48] sm:$0xf] }
  0xa1   : > { %v1640_v0 = vsel %vm3487_vm13, %v1635_v57, %v1639_v33  ;;  %1972 = vrot.lane.b32.xlu0 %v3141_v48, %s3200_s22  ;;  %v2134_v8 = vor.u32 %v2133_v9, %v2129_v52  ;;  %v2014_v11 = vld [vmem:[#allocation2 + $0x5c] sm:$0x1]  ;;  %v2145_v6 = vshll.u32 %v2012_v59, 16  ;;  %v2151_v14 = vshll.u32 %v2013_v2, 16  ;;  %v963_v30 = vld [vmem:[#allocation2 + $0x4c] sm:$0xf]  ;;  %v3769_v5 = vpop.permute.xlu0 %1964 }
  0xa2   : > { %v2953_v61 = vcombine.low %v1630_v44, %v1640_v0  ;;  %v2155_v15 = vshrl.u32 %v2013_v2, 16  ;;  %v2161_v16 = vshll.u32 %v2014_v11, 16  ;;  %v2125_v51 = vrot.slane %v2124_v7, 4  ;;  %v964_v41 = vld [vmem:[#allocation2 + $0x50] sm:$0x1]  ;;  %v3142_v48 = vld [vmem:[#allocation2 + $0x54] sm:$0xff]  }
  0xa3   : > { %v2135_v20 = vrot.slane %v2134_v8, 4  ;;  %v2144_v21 = vrot.slane %v2142_v54, 4  ;;  %v2992_v23 = vrot.slane %v2282_v63, 9  ;;  %v2147_v25 = vrot.slane %v2145_v6, 5  ;;  %v2285_v45 = vld [vmem:[#allocation2 + $0x54] sm:$0xe] }
  0xa4   : > { %1723 = vrot.lane.b32.xlu1 %v2953_v61, %s3204_s20  ;;  %v2153_v26 = vrot.slane %v2151_v14, 5  ;;  %v2157_v27 = vrot.slane %v2155_v15, 4  ;;  %v2163_v29 = vrot.slane %v2161_v16, 5  ;;  %v2130_v31 = vsel %vm3487_vm13, %v2125_v51, %v2129_v52  ;;  %v2286_v3 = vld [vmem:[#allocation2 + $0x58] sm:$0xf] }
  0xa5   : > { %v2140_v32 = vsel %vm3487_vm13, %v2135_v20, %v2139_v46  ;;  %v2348_v33 = vrot.slane %v2283_v36, 5  ;;  %v2351_v34 = vrot.slane %v2284_v18, 5  ;;  %v2148_v37 = vor.u32 %v2147_v25, %v2144_v21  ;;  %v2287_v59 = vld [vmem:[#allocation2 + $0x5c] sm:$0x1]  ;;  %v966_v8 = vld [vmem:[#allocation2 + $0x58] sm:$0xf]  ;;  %v3784_v16 = vpop.permute.xlu0 %1874 }
  0xa6   : > { %v2984_v35 = vcombine.low %v2130_v31, %v2140_v32  ;;  %v2158_v40 = vor.u32 %v2157_v27, %v2153_v26  ;;  %v1116_v42 = vshrl.u32 %v962_v24, 16  ;;  %v1119_v50 = vshll.u32 %v962_v24, 16  ;;  %v3775_v62 = vpop.permute.xlu1 %1353  ;;  %v967_v14 = vld [vmem:[#allocation2 + $0x5c] sm:$0x1]  ;;  %v1238_v15 = vld [vmem:[#allocation2 + $0x48] sm:$0xe] }
  0xa7   : > { %v2349_v49 = vsel %vm3408_vm10, %v2992_v23, %v2348_v33  ;;  %v2350_v43 = vrot.slane %v2348_v33, 4  ;;  %v1125_v55 = vshll.u32 %v963_v30, 16  ;;  %v2149_v44 = vrot.slane %v2148_v37, 4  ;;  %v1239_v27 = vld [vmem:[#allocation2 + $0x4c] sm:$0xf] }
  0xa8   : > { %1884 = vrot.lane.b32.xlu1 %v2969_v1, %s3201_s12  ;;  %2245 = vrot.lane.b32.xlu0 %v2984_v35, %s3205_s23  ;;  %v2159_v57 = vrot.slane %v2158_v40, 4  ;;  %v1118_v58 = vrot.slane %v1116_v42, 4  ;;  %v1129_v39 = vshrl.u32 %v963_v30, 16  ;;  %v1121_v9 = vrot.slane %v1119_v50, 5  ;;  %v965_v1 = vld [vmem:[#allocation2 + $0x54] sm:$0xf] }
  0xa9   : > { %v2352_v52 = vsel %vm3408_vm10, %v2350_v43, %v2351_v34  ;;  %v1127_v63 = vrot.slane %v1125_v55, 5  ;;  %v1135_v0 = vshll.u32 %v964_v41, 16  ;;  %v2154_v46 = vsel %vm3487_vm13, %v2149_v44, %v2153_v26  ;;  %v1240_v33 = vld [vmem:[#allocation2 + $0x50] sm:$0x1]  ;;  %v1241_v42 = vld [vmem:[#allocation2 + $0x54] sm:$0xe] }
  0xaa   : > { %v2164_v2 = vsel %vm3487_vm13, %v2159_v57, %v2163_v29  ;;  %v3000_v61 = vcombine.low %v2349_v49, %v2352_v52  ;;  %v1131_v7 = vrot.slane %v1129_v39, 4  ;;  %v1122_v54 = vor.u32 %v1121_v9, %v1118_v58  ;;  %v1242_v50 = vld [vmem:[#allocation2 + $0x58] sm:$0xf]  ;;  %v1243_v55 = vld [vmem:[#allocation2 + $0x5c] sm:$0x1]  ;;  %v3799_v39 = vpop.permute.xlu0 %2398 }
  0xab   : > { %v2985_v11 = vcombine.low %v2154_v46, %v2164_v2  ;;  %v1137_v36 = vrot.slane %v1135_v0, 5  ;;  %v2993_v6 = vrot.slane %v2285_v45, 9  ;;  %v2355_v51 = vrot.slane %v2286_v3, 5  ;;  %v3789_v34 = vpop.permute.xlu1 %1876  ;;  %v1491_v0 = vld [vmem:[#allocation2 + $0x54] sm:$0xf] }
  0xac   : > { %1974 = vrot.lane.b32.xlu1 %v3142_v48, %s3200_s22  ;;  %2406 = vrot.lane.b32.xlu0 %v3000_v61, %s3203_s15  ;;  %v1132_v18 = vor.u32 %v1131_v7, %v1127_v63  ;;  %v2358_v20 = vrot.slane %v2287_v59, 5  ;;  %v1140_v21 = vshrl.u32 %v965_v1, 16  ;;  %v1123_v23 = vrot.slane %v1122_v54, 4  ;;  %v1492_v7 = vld [vmem:[#allocation2 + $0x58] sm:$0xf] }
  0xad   : > { %v1143_v24 = vshll.u32 %v965_v1, 16  ;;  %v1149_v25 = vshll.u32 %v966_v8, 16  ;;  %v1153_v26 = vshrl.u32 %v966_v8, 16  ;;  %v2356_v30 = vsel %vm3408_vm10, %v2993_v6, %v2355_v51  ;;  %v1493_v6 = vld [vmem:[#allocation2 + $0x5c] sm:$0x1] }
  0xae   : > { %v1133_v29 = vrot.slane %v1132_v18, 4  ;;  %v2357_v31 = vrot.slane %v2355_v51, 4  ;;  %v1142_v32 = vrot.slane %v1140_v21, 4  ;;  %v1128_v35 = vsel %vm3487_vm13, %v1123_v23, %v1127_v63  ;;  %v803_v21 = vld [vmem:[#allocation2 + $0x68] sm:$0x1] }
  0xaf   : > { %v1145_v37 = vrot.slane %v1143_v24, 5  ;;  %v1151_v40 = vrot.slane %v1149_v25, 5  ;;  %v1155_v41 = vrot.slane %v1153_v26, 4  ;;  %v1159_v49 = vshll.u32 %v967_v14, 16  ;;  %v3807_v14 = vpop.permute.xlu1 %1357 }
  0xb0   : > { %2247 = vrot.lane.b32.xlu1 %v2985_v11, %s3205_s23  ;;  %v1138_v45 = vsel %vm3487_vm13, %v1133_v29, %v1137_v36  ;;  %v2359_v48 = vsel %vm3408_vm10, %v2357_v31, %v2358_v20  ;;  %v2930_v43 = vrot.slane %v1238_v15, 9  ;;  %v1315_v52 = vrot.slane %v1239_v27, 5  ;;  %v1494_v31 = vld [vmem:[#allocation2 + $0x60] sm:$0xf] }
  0xb1   : > { %v2922_v3 = vcombine.low %v1128_v35, %v1138_v45  ;;  %v3001_v44 = vcombine.low %v2356_v30, %v2359_v48  ;;  %v1146_v57 = vor.u32 %v1145_v37, %v1142_v32  ;;  %v1156_v58 = vor.u32 %v1155_v41, %v1151_v40  ;;  %v3824_v32 = vpop.permute.xlu0 %2400  ;;  %v3143_v35 = vld [vmem:[#allocation2 + $0x54] sm:$0xff]  }
  0xb2   : > { %v1161_v59 = vrot.slane %v1159_v49, 5  ;;  %v1318_v9 = vrot.slane %v1240_v33, 5  ;;  %v2931_v63 = vrot.slane %v1241_v42, 9  ;;  %v1322_v2 = vrot.slane %v1242_v50, 5 }
  0xb3   : > { %2408 = vrot.lane.b32.xlu0 %v3001_v44, %s3203_s15  ;;  %v1147_v1 = vrot.slane %v1146_v57, 4  ;;  %v1157_v46 = vrot.slane %v1156_v58, 4  ;;  %v1325_v61 = vrot.slane %v1243_v55, 5  ;;  %v1316_v8 = vsel %vm3408_vm10, %v2930_v43, %v1315_v52  ;;  %v1765_v43 = vld [vmem:[#allocation2 + $0x58] sm:$0xf] }
  0xb4   : > { %1199 = vrot.lane.b32.xlu1 %v2922_v3, %s3206_s30  ;;  %v1317_v11 = vrot.slane %v1315_v52, 4  ;;  %v710_v54 = vrot.slane %v3720_v13, 4  ;;  %v712_v36 = vshrl.u32 %v3752_v60, 16  ;;  %v1323_v51 = vsel %vm3408_vm10, %v2931_v63, %v1322_v2  ;;  %v1766_v57 = vld [vmem:[#allocation2 + $0x5c] sm:$0x1] }
  0xb5   : > { %v1152_v15 = vsel %vm3487_vm13, %v1147_v1, %v1151_v40  ;;  %v1162_v18 = vsel %vm3487_vm13, %v1157_v46, %v1161_v59  ;;  %v1324_v20 = vrot.slane %v1322_v2, 4  ;;  %v715_v25 = vshll.u32 %v3752_v60, 16  ;;  %v1764_v60 = vld [vmem:[#allocation2 + $0x54] sm:$0xe] }
  0xb6   : > { %v2923_v23 = vcombine.low %v1152_v15, %v1162_v18  ;;  %v1319_v13 = vsel %vm3408_vm10, %v1317_v11, %v1318_v9  ;;  %v714_v24 = vrot.slane %v712_v36, 7  ;;  %v1642_v29 = vshrl.u32 %v1491_v0, 16  ;;  %v2015_v36 = vld [vmem:[#allocation2 + $0x60] sm:$0xf] }
  0xb7   : > { %v2938_v26 = vcombine.low %v1316_v8, %v1319_v13  ;;  %v1326_v27 = vsel %vm3408_vm10, %v1324_v20, %v1325_v61  ;;  %v1645_v30 = vshll.u32 %v1491_v0, 16  ;;  %v1651_v41 = vshll.u32 %v1492_v7, 16  ;;  %v3832_v58 = vpop.permute.xlu1 %1715  ;;  %v1767_v61 = vld [vmem:[#allocation2 + $0x60] sm:$0xe] }
  0xb8   : > { %1201 = vrot.lane.b32.xlu1 %v2923_v23, %s3206_s30  ;;  %v2939_v33 = vcombine.low %v1323_v51, %v1326_v27  ;;  %v717_v37 = vor.u32 %v715_v25, %v714_v24  ;;  %v719_v40 = vrot.slane %v714_v24, 4  ;;  %v1644_v42 = vrot.slane %v1642_v29, 4 }
  0xb9   : > { %1363 = vrot.lane.b32.xlu0 %v2938_v26, %s3202_s13  ;;  %v1647_v45 = vrot.slane %v1645_v30, 5  ;;  %v1655_v48 = vshrl.u32 %v1492_v7, 16  ;;  %v1661_v49 = vshll.u32 %v1493_v6, 16  ;;  %v1653_v55 = vrot.slane %v1651_v41, 5  ;;  %v3838_v6 = vpop.permute.xlu0 %1355 }
  0xba   : > { %v718_v50 = vsel %vm3349_vm5, %v710_v54, %v717_v37  ;;  %v804_v3 = vsel %vm3363_vm7, %v719_v40, %v803_v21  ;;  %v1666_v44 = vshrl.u32 %v1494_v31, 16  ;;  %v1669_v9 = vshll.u32 %v1494_v31, 16 }
  0xbb   : > { %802 = vst.msk [vmem:[#allocation2 + $0x64] sm:$0xf] %vm509_vm0, %v718_v50  ;;  %v1648_v59 = vor.u32 %v1647_v45, %v1644_v42  ;;  %v1657_v52 = vrot.slane %v1655_v48, 4  ;;  %805 = vst [vmem:[#allocation2 + $0x68] sm:$0x1] %v804_v3  ;;  %v506_v63 = vstv %s3822_s14  ;;  %v1663_v0 = vrot.slane %v1661_v49, 5  ;;  %v3847_v26 = vpop.permute.xlu1 %2239 }
  0xbc   : > { %1365 = vrot.lane.b32.xlu1 %v2939_v33, %s3202_s13  ;;  %v1668_v1 = vrot.slane %v1666_v44, 4  ;;  %v2962_v46 = vrot.slane %v1764_v60, 9  ;;  %v1838_v2 = vrot.slane %v1765_v43, 5  ;;  %v1671_v11 = vrot.slane %v1669_v9, 5 }
  0xbd   : > { %1452 = vrot.lane.b32.xlu0 %v3143_v35, %s3199_s21  ;;  %v1649_v7 = vrot.slane %v1648_v59, 4  ;;  %v1658_v8 = vor.u32 %v1657_v52, %v1653_v55  ;;  %v1841_v54 = vrot.slane %v1766_v57, 5  ;;  %vm507_vm15 = vcmp.eq.s32.totalorder %v506_v63, 1 }
  0xbe   : > { %v1840_v15 = vrot.slane %v1838_v2, 4  ;;  %v1672_v20 = vor.u32 %v1671_v11, %v1668_v1  ;;  %v508_v21 = vsel %vm507_vm15, %v504_v4, 0  ;;  %v1839_v23 = vsel %vm3408_vm10, %v2962_v46, %v1838_v2  ;;  %v3855_v42 = vpop.permute.xlu0 %1189 }
  0xbf   : > { %v1654_v18 = vsel %vm3487_vm13, %v1649_v7, %v1653_v55  ;;  %v1659_v51 = vrot.slane %v1658_v8, 4  ;;  %v2963_v13 = vrot.slane %v1767_v61, 9  ;;  %v2906_v24 = vcombine.low %v508_v21, %v508_v21  ;;  %v864_v7 = vld [vmem:[#allocation2 + $0x6c] sm:$0xf] }
  0xc0   : > { %v2166_v25 = vshrl.u32 %v2015_v36, 16  ;;  %v3851_v29 = vrot.slane %v1672_v20, 4  ;;  %v1842_v30 = vsel %vm3408_vm10, %v1840_v15, %v1841_v54  ;;  %v2169_v31 = vshll.u32 %v2015_v36, 16 }
  0xc1   : > { %v1664_v27 = vsel %vm3487_vm13, %v1659_v51, %v1663_v0  ;;  %v844_v4 = vshrl.u32 %v2906_v24, 16  ;;  %v2907_v60 = vcombine.high %v508_v21, %v508_v21  ;;  %v2970_v48 = vcombine.low %v1839_v23, %v1842_v30  ;;  %v868_v51 = vld [vmem:[#allocation2 + $0x74] sm:$0x1]  ;;  %v3150_v30 = vld [vmem:[#allocation2] sm:$0xff]  }
  0xc2   : > { %v3144_v33 = vld [vmem:[#allocation2 + $0x60] sm:$0xff]   ;;  %v2954_v47 = vcombine.low %v1654_v18, %v1664_v27  ;;  %v1496_v35 = vld [vmem:[#allocation2 + $0x68] sm:$0x1]  ;;  %v847_v52 = vshll.u32 %v2906_v24, 16  ;;  %v2168_v63 = vrot.slane %v2166_v25, 4  ;;  %v2171_v18 = vrot.slane %v2169_v31, 5 }
  0xc3   : > { %v1495_v56 = vld [vmem:[#allocation2 + $0x64] sm:$0xf]  ;;  %1454 = vrot.lane.b32.xlu1 %v3144_v33, %s3199_s21  ;;  %v1685_v45 = vshll.u32 %v1496_v35, 16  ;;  %v1769_v49 = vld [vmem:[#allocation2 + $0x68] sm:$0x1]  ;;  %v846_v44 = vrot.slane %v844_v4, 7  ;;  %v3859_v0 = vpop.permute.xlu1 %1191 }
  0xc4   : > { %v1675_v37 = vshll.u32 %v1495_v56, 16  ;;  %v1679_v40 = vshrl.u32 %v1495_v56, 16  ;;  %v1768_v41 = vld [vmem:[#allocation2 + $0x64] sm:$0xf]  ;;  %1725 = vrot.lane.b32.xlu0 %v2954_v47, %s3204_s20  ;;  %v1848_v3 = vrot.slane %v1769_v49, 5  ;;  %v852_v61 = vshrl.u32 %v2907_v60, 16 }
  0xc5   : > { %v1845_v43 = vrot.slane %v1768_v41, 5  ;;  %v1687_v57 = vrot.slane %v1685_v45, 5  ;;  %v2016_v9 = vld [vmem:[#allocation2 + $0x64] sm:$0xf]  ;;  %v2017_v8 = vld [vmem:[#allocation2 + $0x68] sm:$0x1]  ;;  %v849_v54 = vor.u32 %v847_v52, %v846_v44  ;;  %v2172_v31 = vor.u32 %v2171_v18, %v2168_v63 }
  0xc6   : > { %v1677_v50 = vrot.slane %v1675_v37, 5  ;;  %v1681_v55 = vrot.slane %v1679_v40, 4  ;;  %v3145_v11 = vld [vmem:[#allocation2 + $0x60] sm:$0xff]   ;;  %v850_v36 = vrot.slane %v846_v44, 4  ;;  %v855_v15 = vshll.u32 %v2907_v60, 16  ;;  %v3148_v25 = vld [vmem:[#allocation2 + $0x18] sm:$0xff]  }
  0xc7   : > { %v1847_v59 = vrot.slane %v1845_v43, 4  ;;  %v3866_v2 = vsel %vm3408_vm10, %v2963_v13, %v1845_v43  ;;  %v854_v23 = vrot.slane %v852_v61, 7  ;;  %v2175_v24 = vshll.u32 %v2016_v9, 16  ;;  %v3147_v13 = vld [vmem:[#allocation2 + $0xc] sm:$0xff]   ;;  %v3155_v47 = vld [vmem:[#allocation2 + $0x3c] sm:$0xff]   ;;  %v3157_v41 = vld [vmem:[#allocation2 + $0x54] sm:$0xff]  }
  0xc8   : > { %v1678_v1 = vsel %vm3487_vm13, %v3851_v29, %v1677_v50  ;;  %v1682_v46 = vor.u32 %v1681_v55, %v1677_v50  ;;  %1886 = vrot.lane.b32.xlu0 %v2970_v48, %s3201_s12  ;;  %v3873_v27 = vpop.permute.xlu0 %1713  ;;  %v3149_v29 = vld [vmem:[#allocation2 + $0x24] sm:$0xff]   ;;  %v3154_v33 = vld [vmem:[#allocation2 + $0x30] sm:$0xff]   ;;  %v865_v56 = vsel %vm3357_vm6, %v849_v54, %v864_v7  ;;  %v2179_v4 = vshrl.u32 %v2016_v9, 16  ;;  %v2288_v43 = vld [vmem:[#allocation2 + $0x60] sm:$0xe]  ;;  %937 = vst.msk [vmem:[#allocation3 + $0x8] sm:$0xff] %vm935_vm1, %v3147_v13 }
  0xc9   : > { %v3871_v21 = vsel %vm3408_vm10, %v1847_v59, %v1848_v3  ;;  %v2185_v35 = vshll.u32 %v2017_v8, 16  ;;  %v2289_v37 = vld [vmem:[#allocation2 + $0x64] sm:$0xf]  ;;  %v3156_v40 = vld [vmem:[#allocation2 + $0x48] sm:$0xff]   ;;  %v857_v45 = vor.u32 %v855_v15, %v854_v23  ;;  %v859_v48 = vrot.slane %v854_v23, 4  ;;  %938 = vst.msk [vmem:[#allocation3 + $0x10] sm:$0xff] %vm935_vm1, %v3148_v25 }
  0xca   : > { %v1683_v20 = vrot.slane %v1682_v46, 4  ;;  %866 = vst [vmem:[#allocation2 + $0x6c] sm:$0xf] %v865_v56  ;;  %v2177_v49 = vrot.slane %v2175_v24, 5  ;;  %v2290_v50 = vld [vmem:[#allocation2 + $0x68] sm:$0x1]  ;;  %v2971_v28 = vcombine.low %v3866_v2, %v3871_v21 }
  0xcb   : > { %v2173_v3 = vrot.slane %v2172_v31, 4  ;;  %v2181_v44 = vrot.slane %v2179_v4, 4  ;;  %v858_v52 = vsel %vm3349_vm5, %v850_v36, %v857_v45  ;;  %v2187_v9 = vrot.slane %v2185_v35, 5  ;;  %939 = vst.msk [vmem:[#allocation3 + $0x18] sm:$0xff] %vm935_vm1, %v3149_v29  ;;  %936 = vst.msk [vmem:[#allocation3] sm:$0xff] %vm935_vm1, %v3150_v30 }
  0xcc   : > { %v1688_v60 = vsel %vm3487_vm13, %v1683_v20, %v1687_v57  ;;  %1976 = vrot.lane.b32.xlu0 %v3145_v11, %s3200_s22  ;;  %v1194_v59 = vpop.permute.xlu1 %1193  ;;  %v869_v57 = vsel %vm3363_vm7, %v859_v48, %v868_v51  ;;  %v2362_v63 = vrot.slane %v2289_v37, 5  ;;  %867 = vst.msk [vmem:[#allocation2 + $0x70] sm:$0xf] %vm509_vm0, %v858_v52  ;;  %v2994_v46 = vrot.slane %v2288_v43, 9 }
  0xcd   : > { %v2955_v55 = vcombine.low %v1678_v1, %v1688_v60  ;;  %v2182_v1 = vor.u32 %v2181_v44, %v2177_v49  ;;  %870 = vst [vmem:[#allocation2 + $0x74] sm:$0x1] %v869_v57  ;;  %v2365_v2 = vrot.slane %v2290_v50, 5  ;;  %vm1211_vm2 = vcmask 64544   ;;  %940 = vst.msk [vmem:[#allocation3 + $0x20] sm:$0xff] %vm935_vm1, %v3154_v33 }
  0xce   : > { %v2364_v61 = vrot.slane %v2362_v63, 4  ;;  %941 = vst.msk [vmem:[#allocation3 + $0x28] sm:$0xff] %vm935_vm1, %v3155_v47  ;;  %942 = vst.msk [vmem:[#allocation3 + $0x30] sm:$0xff] %vm935_vm1, %v3156_v40  ;;  %v2178_v38 = vsel %vm3487_vm13, %v2173_v3, %v2177_v49  ;;  %vm1464_vm0 = vcmask 130144   ;;  %vm1737_vm4 = vcmask 162944  }
  0xcf   : > { %1727 = vrot.lane.b32.xlu1 %v2955_v55, %s3204_s20  ;;  %v3888_v22 = vpop.permute.xlu0 %2237  ;;  %943 = vst.msk [vmem:[#allocation3 + $0x38] sm:$0xff] %vm935_vm1, %v3157_v41  ;;  %v2183_v7 = vrot.slane %v2182_v1, 4  ;;  %vm1898_vm5 = vcmask 195744   ;;  %v2363_v54 = vsel %vm3408_vm10, %v2994_v46, %v2362_v63  ;;  %vm1988_vm6 = vcmask 228544  }
  0xd0   : > { %1213 = vst.msk [vmem:[#allocation3 + $0x8] sm:$0xff] %vm1211_vm2, %v3855_v42  ;;  %1214 = vst.msk [vmem:[#allocation3 + $0x10] sm:$0xff] %vm1211_vm2, %v3859_v0  ;;  %v1447_v8 = vpop.permute.xlu1 %1446  ;;  %v3153_v42 = vld [vmem:[%s4052_s3 + $0x10] ss:$0 sps:$4 sm:$0x33]   ;;  %vm2261_vm7 = vcmask 261344  }
  0xd1   : > { %1215 = vst.msk [vmem:[#allocation3 + $0x18] sm:$0xff] %vm1211_vm2, %v1194_v59  ;;  %v2188_v0 = vsel %vm3487_vm13, %v2183_v7, %v2187_v9  ;;  %v2018_v11 = vld [vmem:[#allocation2 + $0x6c] sm:$0xf]  ;;  %vm2422_vm8 = vcmask 294144   ;;  %vm2484_vm9 = vcmask 1041408   ;;  %vm2659_vm11 = vcmask 1040384  }
  0xd2   : > { %1377 = vst.msk [vmem:[#allocation3 + $0x8] sm:$0xff] %vm1375_vm3, %v3775_v62  ;;  %1378 = vst.msk [vmem:[#allocation3 + $0x10] sm:$0xff] %vm1375_vm3, %v3838_v6  ;;  %v2366_v62 = vsel %vm3408_vm10, %v2364_v61, %v2365_v2  ;;  %v2190_v6 = vshrl.u32 %v2018_v11, 16  ;;  %v2193_v36 = vshll.u32 %v2018_v11, 16  ;;  %v2291_v18 = vld [vmem:[#allocation2 + $0x6c] sm:$0xe]  ;;  %3080 = vmatprep.subr.msk.bf16.mxu0 %vm2484_vm9, %v3153_v42  ;;  %3081 = vmatprep.subr.msk.bf16.mxu1 %vm2484_vm9, %v3153_v42 }
  0xd3   : > { %1379 = vst.msk [vmem:[#allocation3 + $0x18] sm:$0xff] %vm1375_vm3, %v3807_v14  ;;  %1888 = vrot.lane.b32.xlu1 %v2971_v28, %s3201_s12  ;;  %v2986_v14 = vcombine.low %v2178_v38, %v2188_v0  ;;  %v1445_v15 = vpop.permute.xlu0 %1444  ;;  %v3146_v51 = vld [vmem:[#allocation2 + $0x6c] sm:$0xff]   ;;  %v3002_v21 = vcombine.low %v2363_v54, %v2366_v62  ;;  %v2995_v4 = vrot.slane %v2291_v18, 9 }
  0xd4   : > { %1466 = vst.msk [vmem:[#allocation3 + $0x8] sm:$0xff] %vm1464_vm0, %v3742_v53  ;;  %1468 = vst.msk [vmem:[#allocation3 + $0x18] sm:$0xff] %vm1464_vm0, %v1447_v8  ;;  %v2019_v53 = vld [vmem:[#allocation2 + $0x70] sm:$0xf]  ;;  %v2192_v20 = vrot.slane %v2190_v6, 4  ;;  %v2195_v23 = vrot.slane %v2193_v36, 5 }
  0xd5   : > { %1739 = vst.msk [vmem:[#allocation3 + $0x8] sm:$0xff] %vm1737_vm4, %v3832_v58  ;;  %2249 = vrot.lane.b32.xlu0 %v2986_v14, %s3205_s23  ;;  %v2020_v58 = vld [vmem:[#allocation2 + $0x74] sm:$0x1]  ;;  %v2199_v24 = vshll.u32 %v2019_v53, 16  ;;  %v2203_v13 = vshrl.u32 %v2019_v53, 16 }
  0xd6   : > { %1900 = vst.msk [vmem:[#allocation3 + $0x8] sm:$0xff] %vm1898_vm5, %v3789_v34  ;;  %v2486_v34 = vsel %vm2484_vm9, %v3153_v42, 0  ;;  %v2209_v25 = vshll.u32 %v2020_v58, 16  ;;  %v2292_v29 = vld [vmem:[#allocation2 + $0x70] sm:$0xf] }
  0xd7   : > { %1467 = vst.msk [vmem:[#allocation3 + $0x10] sm:$0xff] %vm1464_vm0, %v1445_v15  ;;  %1978 = vrot.lane.b32.xlu1 %v3146_v51, %s3200_s22  ;;  %v2293_v30 = vld [vmem:[#allocation2 + $0x74] sm:$0x1]  ;;  %v1718_v33 = vpop.permute.xlu0 %1717  ;;  %3057 = vmatpush3.bf16.msra.mxu0 %v2486_v34  ;;  %v2201_v47 = vrot.slane %v2199_v24, 5  ;;  %v2205_v56 = vrot.slane %v2203_v13, 4  ;;  %v2369_v31 = vrot.slane %v2292_v29, 5 }
  0xd8   : > { %1990 = vst.msk [vmem:[#allocation3 + $0x8] sm:$0xff] %vm1988_vm6, %v3762_v19  ;;  %v2196_v19 = vor.u32 %v2195_v23, %v2192_v20  ;;  %3079 = vmatpush3.bf16.msra.mxu1 %v2486_v34  ;;  %v2372_v41 = vrot.slane %v2293_v30, 5 }
  0xd9   : > { %2263 = vst.msk [vmem:[#allocation3 + $0x8] sm:$0xff] %vm2261_vm7, %v3847_v26  ;;  %v2211_v26 = vrot.slane %v2209_v25, 5  ;;  %2410 = vrot.lane.b32.xlu0 %v3002_v21, %s3203_s15  ;;  %v2206_v37 = vor.u32 %v2205_v56, %v2201_v47  ;;  %v2371_v40 = vrot.slane %v2369_v31, 4  ;;  %v2370_v48 = vsel %vm3408_vm10, %v2995_v4, %v2369_v31 }
  0xda   : > { %2424 = vst.msk [vmem:[#allocation3 + $0x8] sm:$0xff] %vm2422_vm8, %v3824_v32  ;;  %v2197_v35 = vrot.slane %v2196_v19, 4 }
  0xdb   : > { %1740 = vst.msk [vmem:[#allocation3 + $0x10] sm:$0xff] %vm1737_vm4, %v1718_v33  ;;  %v2207_v60 = vrot.slane %v2206_v37, 4  ;;  %v2373_v49 = vsel %vm3408_vm10, %v2371_v40, %v2372_v41  ;;  %vm2459_vm10 = vcmask 293888  }
  0xdc   : > { %v2202_v32 = vsel %vm3487_vm13, %v2197_v35, %v2201_v47  ;;  %v3003_v50 = vcombine.low %v2370_v48, %v2373_v49 }
  0xdd   : > { %v2212_v45 = vsel %vm3487_vm13, %v2207_v60, %v2211_v26 }
  0xde   : > { %v2987_v43 = vcombine.low %v2202_v32, %v2212_v45 }
  0xe0   : > { %2251 = vrot.lane.b32.xlu1 %v2987_v43, %s3205_s23 }
  0xe1   : > { %v2432_v9 = vld [vmem:[#allocation3 + $0x8] sm:$0xff] }
  0xe4   : > { %v1352_v55 = vpop.permute.xlu1 %1351  ;;  %2412 = vrot.lane.b32.xlu1 %v3003_v50, %s3203_s15  ;;  %s4009_s15 = scalar_lea.vmem %s4055_s6, %s2864_s11  ;;  %s465_s11 = sadd.s32 %s2886_s10, %s4089_s24 }
  0xe5   : > { %s2887_s20 = sshll.u32 %s465_s11, 1 }
  0xe6   : > { %s467_s9 = scalar_lea.vmem %s4056_s7, %s2887_s20 }
  0xe8   : > { %v1720_v28 = vpop.permute.xlu1 %1719 }
  0xe9   : > { %1741 = vst.msk [vmem:[#allocation3 + $0x18] sm:$0xff] %vm1737_vm4, %v1720_v28 }
  0xeb   : > { %v1188_v3 = vpop.permute.xlu0 %1187 }
  0xec   : > { %1212 = vst.msk [vmem:[#allocation3] sm:$0xff] %vm1211_vm2, %v1188_v3  ;;  %v1881_v12 = vpop.permute.xlu1 %1880 }
  0xed   : > { %1376 = vst.msk [vmem:[#allocation3] sm:$0xff] %vm1375_vm3, %v1352_v55 }
  0xee   : > { %1465 = vst.msk [vmem:[#allocation3] sm:$0xff] %vm1464_vm0, %v3754_v17 }
  0xef   : > { %1902 = vst.msk [vmem:[#allocation3 + $0x18] sm:$0xff] %vm1898_vm5, %v1881_v12  ;;  %v1879_v10 = vpop.permute.xlu0 %1878 }
  0xf0   : > { %1738 = vst.msk [vmem:[#allocation3] sm:$0xff] %vm1737_vm4, %v3873_v27  ;;  %v1971_v44 = vpop.permute.xlu1 %1970 }
  0xf1   : > { %1899 = vst.msk [vmem:[#allocation3] sm:$0xff] %vm1898_vm5, %v3784_v16  ;;  %1901 = vst.msk [vmem:[#allocation3 + $0x10] sm:$0xff] %vm1898_vm5, %v1879_v10 }
  0xf2   : > { %1989 = vst.msk [vmem:[#allocation3] sm:$0xff] %vm1988_vm6, %v3769_v5  ;;  %1992 = vst.msk [vmem:[#allocation3 + $0x18] sm:$0xff] %vm1988_vm6, %v1971_v44 }
  0xf3   : > { %2262 = vst.msk [vmem:[#allocation3] sm:$0xff] %vm2261_vm7, %v3888_v22  ;;  %v1969_v17 = vpop.permute.xlu0 %1968 }
  0xf4   : > { %2423 = vst.msk [vmem:[#allocation3] sm:$0xff] %vm2422_vm8, %v3799_v39  ;;  %v2244_v27 = vpop.permute.xlu1 %2243 }
  0xf5   : > { %1991 = vst.msk [vmem:[#allocation3 + $0x10] sm:$0xff] %vm1988_vm6, %v1969_v17 }
  0xf6   : > { %2265 = vst.msk [vmem:[#allocation3 + $0x18] sm:$0xff] %vm2261_vm7, %v2244_v27 }
  0xf7   : > { %v2242_v16 = vpop.permute.xlu0 %2241 }
  0xf8   : > { %2264 = vst.msk [vmem:[#allocation3 + $0x10] sm:$0xff] %vm2261_vm7, %v2242_v16  ;;  %v1196_v5 = vpop.permute.xlu1 %1195 }
  0xf9   : > { %1216 = vst.msk [vmem:[#allocation3 + $0x20] sm:$0xff] %vm1211_vm2, %v1196_v5 }
  0xfb   : > { %v2431_v59 = vld [vmem:[#allocation3] sm:$0xff]  ;;  %v2403_v52 = vpop.permute.xlu0 %2402 }
  0xfc   : > { %3058 = vmatprep.mubr.msk.bf16.mxu0 %vm2459_vm10, %v2431_v59  ;;  %2425 = vst.msk [vmem:[#allocation3 + $0x10] sm:$0xff] %vm2422_vm8, %v2403_v52 }
  0xfd   : > { %3059 = vmatmul.mubr.msk.bf16.vlgmr.msra.gmra.mrb[0].mxu0 %vm2459_vm10, %v2432_v9 }
  0xfe   : > { %v1198_v57 = vpop.permute.xlu1 %1197 }
  0xff   : > { %v2405_v39 = vpop.permute.xlu0 %2404  ;;  %1217 = vst.msk [vmem:[#allocation3 + $0x28] sm:$0xff] %vm1211_vm2, %v1198_v57 }
 0x100   : > { %2426 = vst.msk [vmem:[#allocation3 + $0x18] sm:$0xff] %vm2422_vm8, %v2405_v39 }
 0x102   : > { %v1362_v1 = vpop.permute.xlu1 %1361 }
 0x103   : > { %v1360_v63 = vpop.permute.xlu0 %1359  ;;  %v2433_v46 = vld [vmem:[#allocation3 + $0x10] sm:$0xff]  ;;  %1381 = vst.msk [vmem:[#allocation3 + $0x28] sm:$0xff] %vm1375_vm3, %v1362_v1 }
 0x104   : > { %1380 = vst.msk [vmem:[#allocation3 + $0x20] sm:$0xff] %vm1375_vm3, %v1360_v63  ;;  %3062 = vmatprep.mubr.msk.bf16.mxu0 %vm2459_vm10, %v2433_v46 }
 0x107   : > { %v1449_v2 = vpop.permute.xlu0 %1448  ;;  %v2434_v61 = vld [vmem:[#allocation3 + $0x18] sm:$0xff] }
 0x108   : > { %1469 = vst.msk [vmem:[#allocation3 + $0x20] sm:$0xff] %vm1464_vm0, %v1449_v2  ;;  %3063 = vmatmul.mubr.msk.bf16.gmra.mrb[4].mxu0 %vm2459_vm10, %v2434_v61 }
 0x10a   : > { %v1451_v38 = vpop.permute.xlu1 %1450 }
 0x10b   : > { %v1722_v22 = vpop.permute.xlu0 %1721  ;;  %1470 = vst.msk [vmem:[#allocation3 + $0x28] sm:$0xff] %vm1464_vm0, %v1451_v38 }
 0x10c   : > { %1742 = vst.msk [vmem:[#allocation3 + $0x20] sm:$0xff] %vm1737_vm4, %v1722_v22 }
 0x10f   : > { %v1883_v7 = vpop.permute.xlu0 %1882 }
 0x110   : > { %1903 = vst.msk [vmem:[#allocation3 + $0x20] sm:$0xff] %vm1898_vm5, %v1883_v7 }
 0x113   : > { %v1973_v8 = vpop.permute.xlu0 %1972 }
 0x114   : > { %1993 = vst.msk [vmem:[#allocation3 + $0x20] sm:$0xff] %vm1988_vm6, %v1973_v8 }
 0x116   : > { %v1724_v42 = vpop.permute.xlu1 %1723 }
 0x117   : > { %1743 = vst.msk [vmem:[#allocation3 + $0x28] sm:$0xff] %vm1737_vm4, %v1724_v42 }
 0x11a   : > { %v1885_v0 = vpop.permute.xlu1 %1884  ;;  %v2246_v11 = vpop.permute.xlu0 %2245 }
 0x11b   : > { %1904 = vst.msk [vmem:[#allocation3 + $0x28] sm:$0xff] %vm1898_vm5, %v1885_v0 }
 0x11c   : > { %2266 = vst.msk [vmem:[#allocation3 + $0x20] sm:$0xff] %vm2261_vm7, %v2246_v11 }
 0x11e   : > { %v1975_v54 = vpop.permute.xlu1 %1974  ;;  %v2407_v62 = vpop.permute.xlu0 %2406 }
 0x11f   : > { %1994 = vst.msk [vmem:[#allocation3 + $0x28] sm:$0xff] %vm1988_vm6, %v1975_v54 }
 0x120   : > { %2427 = vst.msk [vmem:[#allocation3 + $0x20] sm:$0xff] %vm2422_vm8, %v2407_v62 }
 0x122   : > { %v2248_v14 = vpop.permute.xlu1 %2247 }
 0x123   : > { %2267 = vst.msk [vmem:[#allocation3 + $0x28] sm:$0xff] %vm2261_vm7, %v2248_v14 }
 0x125   : > { %v2409_v36 = vpop.permute.xlu0 %2408 }
 0x126   : > { %v1200_v6 = vpop.permute.xlu1 %1199  ;;  %2428 = vst.msk [vmem:[#allocation3 + $0x28] sm:$0xff] %vm2422_vm8, %v2409_v36 }
 0x127   : > { %1218 = vst.msk [vmem:[#allocation3 + $0x30] sm:$0xff] %vm1211_vm2, %v1200_v6  ;;  %v2435_v15 = vld [vmem:[#allocation3 + $0x20] sm:$0xff] }
 0x128   : > { %3066 = vmatprep.mubr.msk.bf16.mxu1 %vm2459_vm10, %v2435_v15 }
 0x12a   : > { %v1202_v18 = vpop.permute.xlu1 %1201 }
 0x12b   : > { %1219 = vst.msk [vmem:[#allocation3 + $0x38] sm:$0xff] %vm1211_vm2, %v1202_v18  ;;  %v1364_v51 = vpop.permute.xlu0 %1363 }
 0x12c   : > { %1382 = vst.msk [vmem:[#allocation3 + $0x30] sm:$0xff] %vm1375_vm3, %v1364_v51 }
 0x12d   : > { %v2436_v53 = vld [vmem:[#allocation3 + $0x28] sm:$0xff] }
 0x12e   : > { %v1366_v20 = vpop.permute.xlu1 %1365  ;;  %3067 = vmatmul.mubr.msk.bf16.vlgmr.msra.gmra.mrb[0].mxu1 %vm2459_vm10, %v2436_v53 }
 0x12f   : > { %1383 = vst.msk [vmem:[#allocation3 + $0x38] sm:$0xff] %vm1375_vm3, %v1366_v20  ;;  %v1453_v21 = vpop.permute.xlu0 %1452 }
 0x130   : > { %1471 = vst.msk [vmem:[#allocation3 + $0x30] sm:$0xff] %vm1464_vm0, %v1453_v21 }
 0x135   : > { %v1455_v58 = vpop.permute.xlu1 %1454 }
 0x136   : > { %v1726_v23 = vpop.permute.xlu0 %1725  ;;  %1472 = vst.msk [vmem:[#allocation3 + $0x38] sm:$0xff] %vm1464_vm0, %v1455_v58 }
 0x137   : > { %1744 = vst.msk [vmem:[#allocation3 + $0x30] sm:$0xff] %vm1737_vm4, %v1726_v23 }
 0x13a   : > { %v1887_v24 = vpop.permute.xlu0 %1886 }
 0x13b   : > { %1905 = vst.msk [vmem:[#allocation3 + $0x30] sm:$0xff] %vm1898_vm5, %v1887_v24 }
 0x13e   : > { %v1977_v13 = vpop.permute.xlu0 %1976 }
 0x13f   : > { %1995 = vst.msk [vmem:[#allocation3 + $0x30] sm:$0xff] %vm1988_vm6, %v1977_v13 }
 0x141   : > { %v1728_v34 = vpop.permute.xlu1 %1727 }
 0x142   : > { %1745 = vst.msk [vmem:[#allocation3 + $0x38] sm:$0xff] %vm1737_vm4, %v1728_v34 }
 0x145   : > { %v1889_v25 = vpop.permute.xlu1 %1888 }
 0x146   : > { %1906 = vst.msk [vmem:[#allocation3 + $0x38] sm:$0xff] %vm1898_vm5, %v1889_v25 }
 0x147   : > { %v2250_v29 = vpop.permute.xlu0 %2249 }
 0x148   : > { %2268 = vst.msk [vmem:[#allocation3 + $0x30] sm:$0xff] %vm2261_vm7, %v2250_v29 }
 0x149   : > { %v1979_v30 = vpop.permute.xlu1 %1978 }
 0x14a   : > { %1996 = vst.msk [vmem:[#allocation3 + $0x38] sm:$0xff] %vm1988_vm6, %v1979_v30 }
 0x14b   : > { %v2411_v33 = vpop.permute.xlu0 %2410 }
 0x14c   : > { %2429 = vst.msk [vmem:[#allocation3 + $0x30] sm:$0xff] %vm2422_vm8, %v2411_v33 }
 0x152   : > { %v2252_v19 = vpop.permute.xlu1 %2251 }
 0x153   : > { %v2437_v47 = vld [vmem:[#allocation3 + $0x30] sm:$0xff]  ;;  %2269 = vst.msk [vmem:[#allocation3 + $0x38] sm:$0xff] %vm2261_vm7, %v2252_v19 }
 0x154   : > { %3070 = vmatprep.mubr.msk.bf16.mxu1 %vm2459_vm10, %v2437_v47 }
 0x156   : > { %v2413_v56 = vpop.permute.xlu1 %2412 }
 0x157   : > { %2430 = vst.msk [vmem:[#allocation3 + $0x38] sm:$0xff] %vm2422_vm8, %v2413_v56 }
 0x15e   : > { %v2438_v31 = vld [vmem:[#allocation3 + $0x38] sm:$0xff] }
 0x15f   : > { %3071 = vmatmul.mubr.msk.bf16.gmra.mrb[4].mxu1 %vm2459_vm10, %v2438_v31 }
 0x1d0   : > { %v3060_v26 = vpop.f32.mrb[0].mxu0 }
 0x1d1   : > { %2587 = vst [vmem:[%s4009_s15 + $0x10] sm:$0xff] %v3060_v26  ;;  %v2522_v4 = vpop.f32.mrb[1].mxu0  ;;  %v2624_v60 = vmul.f32 %v3060_v26, %v3060_v26 }
 0x1d2   : > { %2585 = vst [vmem:[%s4009_s15] sm:$0xff] %v2522_v4  ;;  %v3061_v35 = vpop.f32.mrb[2].mxu0  ;;  %v2622_v40 = vmul.f32 %v2522_v4, %v2522_v4 }
 0x1d3   : > { %2588 = vst [vmem:[%s4009_s15 + $0x18] sm:$0xff] %v3061_v35  ;;  %v2525_v37 = vpop.f32.mrb[3].mxu0  ;;  %v2625_v49 = vmul.f32 %v3061_v35, %v3061_v35 }
 0x1d4   : > { %2586 = vst [vmem:[%s4009_s15 + $0x8] sm:$0xff] %v2525_v37  ;;  %v2601_v41 = vadd.f32 %v2525_v37, %v2522_v4  ;;  %v2623_v32 = vmul.f32 %v2525_v37, %v2525_v37 }
 0x1d6   : > { %v2602_v45 = vadd.f32 %v3060_v26, %v2601_v41  ;;  %v2638_v48 = vadd.f32 %v2623_v32, %v2622_v40 }
 0x1d8   : > { %v2639_v43 = vadd.f32 %v2638_v48, %v2624_v60  ;;  %v2603_v50 = vadd.f32 %v3061_v35, %v2602_v45 }
 0x1da   : > { %v2640_v55 = vadd.f32 %v2639_v43, %v2625_v49 }
 0x1db   : > { %v3064_v28 = vpop.f32.mrb[4].mxu0 }
 0x1dc   : > { %2591 = vst [vmem:[%s4009_s15 + $0x30] sm:$0xff] %v3064_v28  ;;  %v2538_v3 = vpop.f32.mrb[5].mxu0  ;;  %v2628_v59 = vmul.f32 %v3064_v28, %v3064_v28 }
 0x1dd   : > { %2589 = vst [vmem:[%s4009_s15 + $0x20] sm:$0xff] %v2538_v3  ;;  %v2604_v12 = vadd.f32 %v2603_v50, %v2538_v3  ;;  %v2626_v10 = vmul.f32 %v2538_v3, %v2538_v3  ;;  %v3065_v44 = vpop.f32.mrb[6].mxu0 }
 0x1de   : > { %2592 = vst [vmem:[%s4009_s15 + $0x38] sm:$0xff] %v3065_v44  ;;  %v2541_v17 = vpop.f32.mrb[7].mxu0  ;;  %v2629_v39 = vmul.f32 %v3065_v44, %v3065_v44 }
 0x1df   : > { %v2641_v27 = vadd.f32 %v2640_v55, %v2626_v10  ;;  %2590 = vst [vmem:[%s4009_s15 + $0x28] sm:$0xff] %v2541_v17  ;;  %v2605_v16 = vadd.f32 %v2604_v12, %v2541_v17  ;;  %v2627_v5 = vmul.f32 %v2541_v17, %v2541_v17 }
 0x1e1   : > { %v2606_v52 = vadd.f32 %v3064_v28, %v2605_v16  ;;  %v2642_v9 = vadd.f32 %v2641_v27, %v2627_v5 }
 0x1e3   : > { %v2643_v57 = vadd.f32 %v2642_v9, %v2628_v59  ;;  %v2607_v63 = vadd.f32 %v3065_v44, %v2606_v52 }
 0x1e5   : > { %v2644_v1 = vadd.f32 %v2643_v57, %v2629_v39 }
 0x201   : > { %v3068_v46 = vpop.f32.mrb[0].mxu1 }
 0x202   : > { %2595 = vst [vmem:[%s4009_s15 + $0x50] sm:$0xff] %v3068_v46  ;;  %v2554_v2 = vpop.f32.mrb[1].mxu1  ;;  %v2632_v11 = vmul.f32 %v3068_v46, %v3068_v46 }
 0x203   : > { %2593 = vst [vmem:[%s4009_s15 + $0x40] sm:$0xff] %v2554_v2  ;;  %v2608_v61 = vadd.f32 %v2607_v63, %v2554_v2  ;;  %v2630_v22 = vmul.f32 %v2554_v2, %v2554_v2  ;;  %v3069_v38 = vpop.f32.mrb[2].mxu1 }
 0x204   : > { %2596 = vst [vmem:[%s4009_s15 + $0x58] sm:$0xff] %v3069_v38  ;;  %v2557_v7 = vpop.f32.mrb[3].mxu1  ;;  %v2633_v14 = vmul.f32 %v3069_v38, %v3069_v38 }
 0x205   : > { %v2645_v8 = vadd.f32 %v2644_v1, %v2630_v22  ;;  %2594 = vst [vmem:[%s4009_s15 + $0x48] sm:$0xff] %v2557_v7  ;;  %v2609_v42 = vadd.f32 %v2608_v61, %v2557_v7  ;;  %v2631_v0 = vmul.f32 %v2557_v7, %v2557_v7 }
 0x207   : > { %v2610_v54 = vadd.f32 %v3068_v46, %v2609_v42  ;;  %v2646_v62 = vadd.f32 %v2645_v8, %v2631_v0 }
 0x209   : > { %v2647_v6 = vadd.f32 %v2646_v62, %v2632_v11  ;;  %v2611_v36 = vadd.f32 %v3069_v38, %v2610_v54 }
 0x20b   : > { %v2648_v15 = vadd.f32 %v2647_v6, %v2633_v14 }
 0x232   : > { %v3072_v18 = vpop.f32.mrb[4].mxu1 }
 0x233   : > { %2599 = vst [vmem:[%s4009_s15 + $0x70] sm:$0xff] %v3072_v18  ;;  %v2570_v51 = vpop.f32.mrb[5].mxu1  ;;  %v2636_v34 = vmul.f32 %v3072_v18, %v3072_v18 }
 0x234   : > { %2597 = vst [vmem:[%s4009_s15 + $0x60] sm:$0xff] %v2570_v51  ;;  %v2612_v53 = vadd.f32 %v2611_v36, %v2570_v51  ;;  %v2634_v20 = vmul.f32 %v2570_v51, %v2570_v51  ;;  %v3073_v21 = vpop.f32.mrb[6].mxu1 }
 0x235   : > { %2600 = vst [vmem:[%s4009_s15 + $0x78] sm:$0xff] %v3073_v21  ;;  %v2573_v58 = vpop.f32.mrb[7].mxu1  ;;  %v2637_v30 = vmul.f32 %v3073_v21, %v3073_v21 }
 0x236   : > { %v2649_v23 = vadd.f32 %v2648_v15, %v2634_v20  ;;  %2598 = vst [vmem:[%s4009_s15 + $0x68] sm:$0xff] %v2573_v58  ;;  %v2613_v24 = vadd.f32 %v2612_v53, %v2573_v58  ;;  %v2635_v13 = vmul.f32 %v2573_v58, %v2573_v58 }
 0x238   : > { %v2614_v25 = vadd.f32 %v3072_v18, %v2613_v24  ;;  %v2650_v29 = vadd.f32 %v2649_v23, %v2635_v13 }
 0x23a   : > { %v2615_v33 = vadd.f32 %v3073_v21, %v2614_v25  ;;  %v2651_v19 = vadd.f32 %v2650_v29, %v2636_v34 }
 0x23c   : > { %v2616_v47 = vrot.slane %v2615_v33, 4  ;;  %v2652_v56 = vadd.f32 %v2651_v19, %v2637_v30 }
 0x23e   : > { %v2617_v31 = vadd.f32 %v2616_v47, %v2615_v33  ;;  %v2653_v26 = vrot.slane %v2652_v56, 4 }
 0x240   : > { %v2618_v4 = vrot.slane %v2617_v31, 2  ;;  %v2654_v35 = vadd.f32 %v2653_v26, %v2652_v56 }
 0x242   : > { %v2619_v37 = vadd.f32 %v2618_v4, %v2617_v31  ;;  %v2655_v40 = vrot.slane %v2654_v35, 2 }
 0x244   : > { %v2620_v41 = vrot.slane %v2619_v37, 1  ;;  %v2656_v32 = vadd.f32 %v2655_v40, %v2654_v35 }
 0x246   : > { %v2657_v60 = vrot.slane %v2656_v32, 1  ;;  %v2621_v45 = vadd.f32 %v2620_v41, %v2619_v37 }
 0x248   : > { %v2658_v48 = vadd.f32 %v2657_v60, %v2656_v32 }
 0x24a   : > { %v2660_v49 = vsel %vm2659_vm11, %v2621_v45, %v2658_v48 }
 0x24b   : > { %2661 = vst [vmem:[%s467_s9] sm:$0x3] %v2660_v49 }
 0x24c PF: > { %s18_s28 = sadd.s32 1, %s3196_s28   ;;  %s4070_s24 = smov %s3188_s26 }
 0x24d   : > { %p15_p12 = scmp.ge.s32.totalorder %s18_s28, 6   ;;  %s4071_s25 = smov %s3192_s27 }
 0x24e   : > { %s4072_s26 = smov %s4075_s4  ;;  %s4073_s27 = smov %s4079_s5 }
 0x24f   :  { %17 = sbr.rel (!%p15_p12) target bundleno = 3 (0x3), region = 95 }

// kernel: down_block_forward.4
= control target key start
LH: loop header
LB: loop body
LE: loop exit
PB: predicated region body
PF: predicated region fallthrough
CT: control target
= control target key end

     0   :  { %s4560_s24 = smov 0   ;;  %s4562_s25 = smov 0   ;;  %s5455_s0 = inlined_call_operand.vmem [shape: f32[2,16,16,128], index: 0, kind: input, shape index: {}, may-alias: {0,1,2}]   ;;  %s5456_s1 = inlined_call_operand.vmem [shape: f32[2,16,16,128], index: 1, kind: input, shape index: {}, may-alias: {0,1,2}]   ;;  %s5457_s2 = inlined_call_operand.vmem [shape: f32[2,16,16,128], index: 2, kind: input, shape index: {}, may-alias: {0,1,2}]   ;;  %s5458_s3 = inlined_call_operand.vmem [shape: bf16[1152,128], index: 3, kind: input, shape index: {}]   ;;  %s5459_s4 = inlined_call_operand.vmem [shape: f32[1,128], index: 4, kind: input, shape index: {}]   ;;  %s5460_s5 = inlined_call_operand.vmem [shape: f32[1,128], index: 5, kind: input, shape index: {}]   ;;  %s5461_s6 = inlined_call_operand.vmem [shape: f32[2,16,16,128], index: 6, kind: output, shape index: {0}]   ;;  %s5462_s7 = inlined_call_operand.vmem [shape: f32[2,2,2,128], index: 7, kind: output, shape index: {1}]  }
   0x1   :  { %s4564_s26 = smov 0   ;;  %s4566_s27 = smov 0  }
   0x2   :  { %s4568_s28 = smov 0  }
   0x3 LB: > { %s27_s29 = sadd.s32 1, %s4509_s26  ;;  %s30_s30 = sadd.s32 1, %s4513_s27  ;;  %s4517_s28 = sphi %s4568_s28, %s18_s28   ;;  %s4513_s27 = sphi %s4566_s27, %s5481_s27   ;;  %s4509_s26 = sphi %s4564_s26, %s5480_s26   ;;  %s4505_s25 = sphi %s4562_s25, %s5479_s25   ;;  %s4501_s24 = sphi %s4560_s24, %s5478_s24  }
   0x4   : > { %p28_p0 = scmp.ge.s32.totalorder %s27_s29, 2  ;;  %p3774_p1 = scmp.ge.s32.totalorder %s4517_s28, 1 }
   0x5   : > { %p328_p2 = scmp.lt.s32.totalorder %s4517_s28, 5 }
   0x6   : > { %s5483_s29 = smov (%p28_p0, %s27_s29), 0  ;;  %s5485_s30 = smov (!%p28_p0, %s30_s30), %s4513_s27 }
   0x7   : > { %p329_p3 = pnand %p3774_p1, %p328_p2  ;;  %p32_p4 = scmp.ge.s32.totalorder %s5485_s30, 2 }
   0x8   : > { %v4379_v0 = vld [vmem:[%s5458_s3 + $0xc0] sm:$0xff] (!%p329_p3)   ;;  %v4382_v3 = vld [vmem:[%s5458_s3 + $0xc8] sm:$0xff] (!%p329_p3)   ;;  %s4613_s20 = sshll.u32 (!%p329_p3), %s4501_s24, 3  ;;  %v4386_v7 = vld [vmem:[%s5458_s3 + $0xd0] sm:$0xff] (!%p329_p3)   ;;  %v4519_v9 = vmov (!%p329_p3), 0   ;;  %p405_p6 = scmp.lt.s32.totalorder (!%p329_p3), %s4505_s25, 1 }
   0x9   : > { %s5487_s30 = smov (%p32_p4, %s5485_s30), 0  ;;  %332 = sbr.rel (%p329_p3) target bundleno = 495 (0x1ef), region = 44 }
   0xa   : > { %v4380_v1 = vld [vmem:[%s5458_s3 + $0x80] sm:$0xff] (!%p329_p3)   ;;  %4082 = vmatprep.subr.bf16.mxu1 (!%p329_p3), %v4379_v0  ;;  %v4384_v5 = vld [vmem:[%s5458_s3 + $0x88] sm:$0xff] (!%p329_p3)   ;;  %p407_p5 = scmp.lt.s32.totalorder (!%p329_p3), %s4613_s20, 15  ;;  %586 = vst [vmem:[#allocation2 + $0xc] sm:$0xf] (!%p329_p3), %v4519_v9  ;;  %v4388_v10 = vld [vmem:[%s5458_s3 + $0x90] sm:$0xff] (!%p329_p3)  }
   0xb   : > { %v4381_v2 = vld [vmem:[%s5458_s3 + $0x40] sm:$0xff] (!%p329_p3)   ;;  %4083 = vmatpush3.bf16.msra.mxu1 (!%p329_p3), %v4380_v1  ;;  %v4385_v6 = vld [vmem:[%s5458_s3 + $0x48] sm:$0xff] (!%p329_p3)   ;;  %587 = vst [vmem:[#allocation2 + $0x10] sm:$0xf] (!%p329_p3), %v4519_v9  ;;  %583 = vst [vmem:[#allocation2] sm:$0xf] (!%p329_p3), %v4519_v9 }
   0xc   : > { %4018 = vmatprep.subr.bf16.mxu0 (!%p329_p3), %v4381_v2  ;;  %v4383_v4 = vld [vmem:[%s5458_s3] sm:$0xff] (!%p329_p3)   ;;  %4084 = vmatprep.subr.bf16.mxu1 (!%p329_p3), %v4382_v3  ;;  %v4387_v8 = vld [vmem:[%s5458_s3 + $0x8] sm:$0xff] (!%p329_p3)   ;;  %584 = vst [vmem:[#allocation2 + $0x4] sm:$0xf] (!%p329_p3), %v4519_v9  ;;  %585 = vst [vmem:[#allocation2 + $0x8] sm:$0x1] (!%p329_p3), %v4519_v9 }
   0xd   : > { %4019 = vmatpush3.bf16.msra.mxu0 (!%p329_p3), %v4383_v4  ;;  %588 = vst [vmem:[#allocation2 + $0x14] sm:$0x1] (!%p329_p3), %v4519_v9  ;;  %589 = vst [vmem:[#allocation2 + $0x18] sm:$0xf] (!%p329_p3), %v4519_v9  ;;  %v4389_v11 = vld [vmem:[%s5458_s3 + $0x50] sm:$0xff] (!%p329_p3)   ;;  %v4390_v12 = vld [vmem:[%s5458_s3 + $0xd8] sm:$0xff] (!%p329_p3)  }
   0xe   : > { %4020 = vmatprep.subr.bf16.mxu0 (!%p329_p3), %v4385_v6  ;;  %590 = vst [vmem:[#allocation2 + $0x1c] sm:$0xf] (!%p329_p3), %v4519_v9  ;;  %591 = vst [vmem:[#allocation2 + $0x20] sm:$0x1] (!%p329_p3), %v4519_v9  ;;  %s3780_s18 = sadd.s32 (!%p329_p3), 4294967295, %s4613_s20  ;;  %v4391_v13 = vld [vmem:[%s5458_s3 + $0x10] sm:$0xff] (!%p329_p3)  }
   0xf   : > { %4085 = vmatpush3.bf16.msra.mxu1 (!%p329_p3), %v4384_v5  ;;  %592 = vst [vmem:[#allocation2 + $0x24] sm:$0xf] (!%p329_p3), %v4519_v9  ;;  %593 = vst [vmem:[#allocation2 + $0x28] sm:$0xf] (!%p329_p3), %v4519_v9  ;;  %p417_p7 = scmp.gt.s32.totalorder (!%p329_p3), %s3780_s18, 0  ;;  %v4392_v14 = vld [vmem:[%s5458_s3 + $0x98] sm:$0xff] (!%p329_p3)  }
  0x10   : > { %594 = vst [vmem:[#allocation2 + $0x2c] sm:$0x1] %v4519_v9  ;;  %595 = vst [vmem:[#allocation2 + $0x30] sm:$0xf] %v4519_v9  ;;  %4086 = vmatprep.subr.bf16.mxu1 %v4386_v7  ;;  %s4635_s15 = scalar_select %p407_p5, %s4613_s20, 15  ;;  %v4393_v15 = vld [vmem:[%s5458_s3 + $0x58] sm:$0xff]  }
  0x11   : > { %596 = vst [vmem:[#allocation2 + $0x34] sm:$0xf] %v4519_v9  ;;  %597 = vst [vmem:[#allocation2 + $0x38] sm:$0x1] %v4519_v9  ;;  %4021 = vmatpush3.bf16.msra.mxu0 %v4387_v8  ;;  %p3781_p8 = scmp.lt.s32.totalorder %s3780_s18, 15  ;;  %v4394_v16 = vld [vmem:[%s5458_s3 + $0xe0] sm:$0xff]  }
  0x12   : > { %598 = vst [vmem:[#allocation2 + $0x3c] sm:$0xf] %v4519_v9  ;;  %599 = vst [vmem:[#allocation2 + $0x40] sm:$0xf] %v4519_v9  ;;  %4022 = vmatprep.subr.bf16.mxu0 %v4389_v11  ;;  %s418_s10 = scalar_select %p417_p7, %s3780_s18, 0  ;;  %v4395_v17 = vld [vmem:[%s5458_s3 + $0x18] sm:$0xff]  }
  0x13   : > { %600 = vst [vmem:[#allocation2 + $0x44] sm:$0x1] %v4519_v9  ;;  %601 = vst [vmem:[#allocation2 + $0x48] sm:$0xf] %v4519_v9  ;;  %4087 = vmatpush3.bf16.msra.mxu1 %v4388_v10  ;;  %s5489_s25 = smov (!%p405_p6, %s4505_s25), 1  ;;  %v4396_v18 = vld [vmem:[%s5458_s3 + $0xa0] sm:$0xff]  }
  0x14   : > { %602 = vst [vmem:[#allocation2 + $0x4c] sm:$0xf] %v4519_v9  ;;  %603 = vst [vmem:[#allocation2 + $0x50] sm:$0x1] %v4519_v9  ;;  %4088 = vmatprep.subr.bf16.mxu1 %v4390_v12  ;;  %s3776_s19 = sshll.u32 %s4635_s15, 1  ;;  %v4397_v19 = vld [vmem:[%s5458_s3 + $0x60] sm:$0xff]  }
  0x15   : > { %604 = vst [vmem:[#allocation2 + $0x54] sm:$0xf] %v4519_v9  ;;  %605 = vst [vmem:[#allocation2 + $0x58] sm:$0xf] %v4519_v9  ;;  %4023 = vmatpush3.bf16.msra.mxu0 %v4391_v13  ;;  %s5491_s10 = smov (!%p3781_p8, %s418_s10), 15  ;;  %v4398_v20 = vld [vmem:[%s5458_s3 + $0xe8] sm:$0xff]  }
  0x16   : > { %606 = vst [vmem:[#allocation2 + $0x5c] sm:$0x1] %v4519_v9  ;;  %607 = vst [vmem:[#allocation2 + $0x60] sm:$0xf] %v4519_v9  ;;  %4024 = vmatprep.subr.bf16.mxu0 %v4393_v15  ;;  %v4399_v21 = vld [vmem:[%s5458_s3 + $0x20] sm:$0xff]   ;;  %s4676_s12 = sshll.u32 %s5489_s25, 5 }
  0x17   : > { %608 = vst [vmem:[#allocation2 + $0x64] sm:$0xf] %v4519_v9  ;;  %609 = vst [vmem:[#allocation2 + $0x68] sm:$0x1] %v4519_v9  ;;  %4089 = vmatpush3.bf16.msra.mxu1 %v4392_v14  ;;  %v4400_v22 = vld [vmem:[%s5458_s3 + $0xa8] sm:$0xff]   ;;  %s4682_s18 = sadd.s32 %s4676_s12, %s3776_s19  ;;  %s3786_s17 = sshll.u32 %s5491_s10, 1 }
  0x18   : > { %610 = vst [vmem:[#allocation2 + $0x6c] sm:$0xf] %v4519_v9  ;;  %611 = vst [vmem:[#allocation2 + $0x70] sm:$0xf] %v4519_v9  ;;  %4090 = vmatprep.subr.bf16.mxu1 %v4394_v16  ;;  %v4401_v23 = vld [vmem:[%s5458_s3 + $0x68] sm:$0xff]   ;;  %v4402_v24 = vld [vmem:[%s5458_s3 + $0xf0] sm:$0xff]   ;;  %s425_s15 = sadd.s32 %s3786_s17, %s4676_s12 }
  0x19   : > { %612 = vst [vmem:[#allocation2 + $0x74] sm:$0x1] %v4519_v9  ;;  %4025 = vmatpush3.bf16.msra.mxu0 %v4395_v17  ;;  %v4403_v25 = vld [vmem:[%s5458_s3 + $0x28] sm:$0xff]   ;;  %s3778_s19 = sshll.u32 %s4682_s18, 3  ;;  %v4404_v26 = vld [vmem:[%s5458_s3 + $0xb0] sm:$0xff]   ;;  %v4406_v28 = vld [vmem:[%s5458_s3 + $0xf8] sm:$0xff]  }
  0x1a   : > { %4026 = vmatprep.subr.bf16.mxu0 %v4397_v19  ;;  %v4405_v27 = vld [vmem:[%s5458_s3 + $0x70] sm:$0xff]   ;;  %s4709_s23 = scalar_lea.vmem %s5455_s0, %s3778_s19  ;;  %p555_p9 = scmp.gt.s32.totalorder %s4501_s24, 0  ;;  %v4408_v30 = vld [vmem:[%s5458_s3 + $0xb8] sm:$0xff]   ;;  %v4723_v33 = vld [vmem:[%s5459_s4] ss:$0 sm:$0xff]  ;;  %vm817_vm2 = vcmask 1043456  }
  0x1b   : > { %4091 = vmatpush3.bf16.msra.mxu1 %v4396_v18  ;;  %v4407_v29 = vld [vmem:[%s5458_s3 + $0x30] sm:$0xff]   ;;  %s3788_s9 = sshll.u32 %s425_s15, 3  ;;  %v469_v31 = vld [vmem:[%s4709_s23] sm:$0xff]  ;;  %v470_v32 = vld [vmem:[%s4709_s23 + $0x8] sm:$0xff]  ;;  %vm653_vm0 = vsmask.f32 256  ;;  %s5401_s17 = scalar_lea.vmem %s5461_s6, %s3778_s19 }
  0x1c   : > { %4092 = vmatprep.subr.bf16.mxu1 %v4398_v20  ;;  %v492_v34 = vmul.f32 %v4723_v33, %v469_v31  ;;  %v493_v35 = vmul.f32 %v4723_v33, %v470_v32  ;;  %s427_s21 = scalar_lea.vmem %s5456_s1, %s3788_s9  ;;  %v4733_v36 = vld [vmem:[%s5460_s5] ss:$0 sm:$0xff]  ;;  %v4410_v39 = vld [vmem:[%s5458_s3 + $0x78] sm:$0xff]   ;;  %vm654_vm1 = vsmask.f32 4368  ;;  %vm824_vm4 = vcmask 1040384  }
  0x1d   : > { %4027 = vmatpush3.bf16.msra.mxu0 %v4399_v21  ;;  %s565_s8 = scalar_select %p555_p9, 1, 0  ;;  %v556_v40 = vld [vmem:[%s427_s21] sm:$0xff]  ;;  %v557_v41 = vld [vmem:[%s427_s21 + $0x8] sm:$0xff]  ;;  %vm818_vm3 = vsmask.f32 7938  ;;  %vm4762_vm6 = vmand %vm824_vm4, %vm653_vm0 }
  0x1e   : > { %4028 = vmatprep.subr.bf16.mxu0 %v4401_v23  ;;  %v515_v37 = vadd.f32 %v4733_v36, %v492_v34  ;;  %v516_v38 = vadd.f32 %v4733_v36, %v493_v35  ;;  %v558_v45 = vmul.f32 %v4723_v33, %v556_v40  ;;  %v559_v46 = vmul.f32 %v4723_v33, %v557_v41  ;;  %v4411_v47 = vld [vmem:[%s5458_s3 + $0x38] sm:$0xff]   ;;  %v4412_v52 = vld [vmem:[%s5458_s3 + $0x140] sm:$0xff]   ;;  %v471_v58 = vld [vmem:[%s4709_s23 + $0x10] sm:$0xff]  ;;  %s4001_s10 = sadd.s32 8, %s4613_s20  ;;  %p462_p11 = scmp.lt.s32.totalorder %s4501_s24, 1 }
  0x1f   : > { %4093 = vmatpush3.bf16.msra.mxu1 %v4400_v22  ;;  %v566_v42 = vstv %s565_s8  ;;  %v472_v59 = vld [vmem:[%s4709_s23 + $0x18] sm:$0xff]  ;;  %v494_v62 = vmul.f32 %v4723_v33, %v471_v58  ;;  %v820_v3 = vld [vmem:[#allocation2 + $0xc] sm:$0xf]  ;;  %vm4770_vm7 = vmor %vm653_vm0, %vm654_vm1  ;;  %vm1322_vm9 = vcmask 1042432   ;;  %vm1323_vm10 = vcmask 1046532   ;;  %p5166_p10 = scmp.lt.s32.totalorder %s4001_s10, 15 }
  0x20   : > { %4094 = vmatprep.subr.bf16.mxu1 %v4402_v24  ;;  %v531_v43 = vmax.f32 %v515_v37, 0.0  ;;  %v532_v44 = vmax.f32 %v516_v38, 0.0  ;;  %v560_v50 = vadd.f32 %v4733_v36, %v558_v45  ;;  %v561_v51 = vadd.f32 %v4733_v36, %v559_v46  ;;  %v826_v12 = vld [vmem:[#allocation2 + $0x14] sm:$0x1]  ;;  %v473_v13 = vld [vmem:[%s4709_s23 + $0x20] sm:$0xff]  ;;  %vm4777_vm8 = vmand %vm817_vm2, %vm818_vm3  ;;  %s5497_s24 = smov (!%p462_p11, %s4501_s24), 1 }
  0x21   : > { %4029 = vmatpush3.bf16.msra.mxu0 %v4403_v25  ;;  %vm4752_vm5 = vcmp.eq.s32.totalorder %v566_v42, 1  ;;  %v495_v63 = vmul.f32 %v4723_v33, %v472_v59  ;;  %v517_v5 = vadd.f32 %v4733_v36, %v494_v62  ;;  %v496_v18 = vmul.f32 %v4723_v33, %v473_v13  ;;  %v474_v23 = vld [vmem:[%s4709_s23 + $0x28] sm:$0xff]  ;;  %v903_v32 = vld [vmem:[#allocation2] sm:$0xf]  ;;  %v829_v45 = vld [vmem:[#allocation2 + $0x18] sm:$0xf] }
  0x22   : > { %4030 = vmatprep.subr.bf16.mxu0 %v4405_v27  ;;  %v4002_v48 = vpack.c.bf16 %v531_v43, %v531_v43  ;;  %v4003_v49 = vpack.c.bf16 %v532_v44, %v532_v44  ;;  %v562_v60 = vmax.f32 %v560_v50, 0.0  ;;  %v563_v61 = vmax.f32 %v561_v51, 0.0  ;;  %v4421_v27 = vld [vmem:[%s5458_s3 + $0x1c0] sm:$0xff]   ;;  %v907_v41 = vld [vmem:[#allocation2 + $0x8] sm:$0x1]  ;;  %vm4818_vm13 = vmor %vm1322_vm9, %vm1323_vm10  ;;  %s5493_s10 = smov (!%p5166_p10, %s4001_s10), 15 }
  0x23   : > { %4095 = vmatpush3.bf16.msra.mxu1 %v4404_v26  ;;  %v518_v6 = vadd.f32 %v4733_v36, %v495_v63  ;;  %v533_v16 = vmax.f32 %v517_v5, 0.0  ;;  %v519_v42 = vadd.f32 %v4733_v36, %v496_v18  ;;  %v497_v46 = vmul.f32 %v4723_v33, %v474_v23  ;;  %v833_v51 = vld [vmem:[#allocation2 + $0x20] sm:$0x1]  ;;  %s5495_s10 = smov (!%p5166_p10, %s5493_s10), 15  ;;  %s3800_s18 = sshll.u32 %s5489_s25, 1 }
  0x24   : > { %4096 = vmatprep.subr.bf16.mxu1 %v4406_v28  ;;  %v657_v54 = vshrl.u32 %v4002_v48, 16  ;;  %v660_v55 = vshll.u32 %v4002_v48, 16  ;;  %v665_v56 = vshrl.u32 %v4003_v49, 16  ;;  %v668_v57 = vshll.u32 %v4003_v49, 16  ;;  %s5212_s20 = sshll.u32 %s5495_s10, 1  ;;  %s465_s19 = sadd.s32 %s3800_s18, %s5497_s24 }
  0x25   : > { %4031 = vmatpush3.bf16.msra.mxu0 %v4407_v29  ;;  %v564_v4 = vpack.c.bf16 %v563_v61, %v562_v60  ;;  %v534_v17 = vmax.f32 %v518_v6, 0.0  ;;  %v4004_v24 = vpack.c.bf16 %v533_v16, %v533_v16  ;;  %v535_v61 = vmax.f32 %v519_v42, 0.0  ;;  %s442_s8 = sadd.s32 %s5212_s20, %s4676_s12  ;;  %s3801_s20 = sshll.u32 %s465_s19, 1 }
  0x26   : > { %4032 = vmatprep.subr.bf16.mxu0 %v4410_v39  ;;  %v659_v0 = vrot.slane %v657_v54, 7  ;;  %v667_v1 = vrot.slane %v665_v56, 7  ;;  %vm1039_vm11 = vsmask.f32 3328  ;;  %vm1040_vm12 = vsmask.f32 7440  ;;  %s467_s11 = scalar_lea.vmem %s5462_s7, %s3801_s20 }
  0x27   : > { %4097 = vmatpush3.bf16.msra.mxu1 %v4408_v30  ;;  %v568_v15 = vsel %vm4752_vm5, %v564_v4, 0  ;;  %v4005_v25 = vpack.c.bf16 %v534_v17, %v534_v17  ;;  %v674_v34 = vshrl.u32 %v4004_v24, 16  ;;  %v677_v35 = vshll.u32 %v4004_v24, 16  ;;  %vm4847_vm14 = vmor %vm1039_vm11, %vm1040_vm12  ;;  %s3795_s12 = sshll.u32 %s442_s8, 3 }
  0x28   : > { %v662_v8 = vor.u32 %v660_v55, %v659_v0  ;;  %v663_v9 = vrot.slane %v659_v0, 4  ;;  %v670_v10 = vor.u32 %v668_v57, %v667_v1  ;;  %v672_v11 = vrot.slane %v667_v1, 4  ;;  %4210 = vmatprep.subr.bf16.mxu1 %v4421_v27  ;;  %s444_s9 = scalar_lea.vmem %s5457_s2, %s3795_s12 }
  0x29   : > { %4033 = vmatpush3.bf16.msra.mxu0 %v4411_v47  ;;  %v3820_v21 = vcombine.low %v568_v15, %v568_v15  ;;  %v3821_v22 = vcombine.high %v568_v15, %v568_v15  ;;  %v682_v37 = vshrl.u32 %v4005_v25, 16  ;;  %v685_v38 = vshll.u32 %v4005_v25, 16  ;;  %s5244_s10 = scalar_select %p462_p11, 1, 0 }
  0x2a   : > { %4146 = vmatprep.subr.bf16.mxu0 %v4412_v52  ;;  %v671_v19 = vsel %vm4770_vm7, %v663_v9, %v670_v10  ;;  %v821_v20 = vsel %vm4777_vm8, %v662_v8, %v820_v3  ;;  %v827_v26 = vsel %vm4762_vm6, %v672_v11, %v826_v12  ;;  %v676_v43 = vrot.slane %v674_v34, 7  ;;  %v475_v52 = vld [vmem:[%s4709_s23 + $0x30] sm:$0xff]  ;;  %v476_v10 = vld [vmem:[%s4709_s23 + $0x38] sm:$0xff] }
  0x2b   : > { %822 = vst [vmem:[#allocation2 + $0xc] sm:$0xf] %v821_v20  ;;  %823 = vst [vmem:[#allocation2 + $0x10] sm:$0xf] %v671_v19  ;;  %v884_v28 = vshrl.u32 %v3820_v21, 16  ;;  %v887_v29 = vshll.u32 %v3820_v21, 16  ;;  %v520_v9 = vadd.f32 %v4733_v36, %v497_v46  ;;  %v4811_v16 = vpack.c.bf16 %v535_v61, %v535_v61 }
  0x2c   : > { %v892_v30 = vshrl.u32 %v3821_v22, 16  ;;  %v895_v31 = vshll.u32 %v3821_v22, 16  ;;  %828 = vst [vmem:[#allocation2 + $0x14] sm:$0x1] %v827_v26  ;;  %v684_v44 = vrot.slane %v682_v37, 7  ;;  %v679_v53 = vor.u32 %v677_v35, %v676_v43 }
  0x2d   : > { %v886_v39 = vrot.slane %v884_v28, 7  ;;  %v680_v54 = vrot.slane %v676_v43, 4  ;;  %v498_v17 = vmul.f32 %v4723_v33, %v475_v52  ;;  %v536_v27 = vmax.f32 %v520_v9, 0.0 }
  0x2e   : > { %v894_v40 = vrot.slane %v892_v30, 7  ;;  %v687_v55 = vor.u32 %v685_v38, %v684_v44  ;;  %v689_v56 = vrot.slane %v684_v44, 4  ;;  %v830_v63 = vsel %vm4777_vm8, %v679_v53, %v829_v45 }
  0x2f   : > { %v889_v47 = vor.u32 %v887_v29, %v886_v39  ;;  %v890_v48 = vrot.slane %v886_v39, 4  ;;  %831 = vst [vmem:[#allocation2 + $0x18] sm:$0xf] %v830_v63  ;;  %v691_v29 = vshrl.u32 %v4811_v16, 16  ;;  %v4824_v30 = vmul.f32 %v4723_v33, %v476_v10 }
  0x30   : > { %v897_v49 = vor.u32 %v895_v31, %v894_v40  ;;  %v899_v50 = vrot.slane %v894_v40, 4  ;;  %v688_v62 = vsel %vm4770_vm7, %v680_v54, %v687_v55  ;;  %v834_v4 = vsel %vm4762_vm6, %v689_v56, %v833_v51  ;;  %v4424_v56 = vld [vmem:[%s5458_s3 + $0x180] sm:$0xff]  }
  0x31   : > { %v904_v59 = vsel %vm4777_vm8, %v889_v47, %v903_v32  ;;  %832 = vst [vmem:[#allocation2 + $0x1c] sm:$0xf] %v688_v62  ;;  %835 = vst [vmem:[#allocation2 + $0x20] sm:$0x1] %v834_v4  ;;  %v4835_v39 = vadd.f32 %v4733_v36, %v498_v17  ;;  %v694_v17 = vshll.u32 %v4811_v16, 16 }
  0x32   : > { %v4409_v57 = vld [vmem:[#allocation2 + $0xc] sm:$0xff]   ;;  %v898_v58 = vsel %vm4770_vm7, %v890_v48, %v897_v49  ;;  %v908_v60 = vsel %vm4762_vm6, %v899_v50, %v907_v41  ;;  %905 = vst [vmem:[#allocation2] sm:$0xf] %v904_v59  ;;  %v4007_v50 = vpack.c.bf16 %v536_v27, %v536_v27 }
  0x33   : > { %906 = vst [vmem:[#allocation2 + $0x4] sm:$0xf] %v898_v58  ;;  %909 = vst [vmem:[#allocation2 + $0x8] sm:$0x1] %v908_v60  ;;  %v1277_v0 = vld [vmem:[#allocation2 + $0xc] sm:$0xe]  ;;  %3143 = vmatprep.mubr.bf16.mxu1 %v4409_v57 }
  0x34   : > { %v1278_v1 = vld [vmem:[#allocation2 + $0x10] sm:$0xf]  ;;  %v1279_v3 = vld [vmem:[#allocation2 + $0x14] sm:$0x1]  ;;  %v3841_v5 = vrot.slane %v1277_v0, 9 }
  0x35   : > { %v1334_v6 = vrot.slane %v1278_v1, 5  ;;  %v1018_v8 = vld [vmem:[#allocation2 + $0xc] sm:$0xf]  ;;  %v1019_v11 = vld [vmem:[#allocation2 + $0x10] sm:$0xf]  ;;  %v1337_v19 = vrot.slane %v1279_v3, 5 }
  0x36   : > { %v1020_v12 = vld [vmem:[#allocation2 + $0x14] sm:$0x1]  ;;  %v1067_v13 = vshrl.u32 %v1018_v8, 16  ;;  %v1070_v15 = vshll.u32 %v1018_v8, 16  ;;  %v1076_v20 = vshll.u32 %v1019_v11, 16  ;;  %v1080_v21 = vshrl.u32 %v1019_v11, 16 }
  0x37   : > { %v1336_v18 = vrot.slane %v1334_v6, 4  ;;  %v1086_v24 = vshll.u32 %v1020_v12, 16  ;;  %v4828_v35 = vsel %vm4818_vm13, %v3841_v5, %v1334_v6  ;;  %v836_v8 = vld [vmem:[#allocation2 + $0x24] sm:$0xf]  ;;  %v1280_v9 = vld [vmem:[#allocation2 + $0x18] sm:$0xe] }
  0x38   : > { %v1069_v22 = vrot.slane %v1067_v13, 4  ;;  %v1072_v23 = vrot.slane %v1070_v15, 5  ;;  %v4814_v25 = vrot.slane %v1076_v20, 5  ;;  %v1082_v26 = vrot.slane %v1080_v21, 4  ;;  %v4415_v55 = vld [vmem:[#allocation2 + $0x18] sm:$0xff]   ;;  %v4427_v11 = vld [vmem:[%s5458_s3 + $0x1c8] sm:$0xff]  }
  0x39   : > { %v1274_v31 = vld [vmem:[#allocation2] sm:$0xe]  ;;  %v4832_v37 = vsel %vm4818_vm13, %v1336_v18, %v1337_v19  ;;  %v1088_v44 = vrot.slane %v1086_v24, 5  ;;  %v1281_v10 = vld [vmem:[#allocation2 + $0x1c] sm:$0xf]  ;;  %v693_v15 = vrot.slane %v691_v29, 7 }
  0x3a   : > { %v1275_v32 = vld [vmem:[#allocation2 + $0x4] sm:$0xf]  ;;  %v1276_v34 = vld [vmem:[#allocation2 + $0x8] sm:$0x1]  ;;  %v1073_v38 = vor.u32 %v1072_v23, %v1069_v22  ;;  %v3840_v40 = vrot.slane %v1274_v31, 9  ;;  %v1083_v49 = vor.u32 %v1082_v26, %v4814_v25  ;;  %v3849_v1 = vcombine.low %v4828_v35, %v4832_v37 }
  0x3b   : > { %v1327_v41 = vrot.slane %v1275_v32, 5  ;;  %v1330_v42 = vrot.slane %v1276_v34, 5  ;;  %v1015_v43 = vld [vmem:[#allocation2] sm:$0xf]  ;;  %v1016_v45 = vld [vmem:[#allocation2 + $0x4] sm:$0xf]  ;;  %v696_v27 = vor.u32 %v694_v17, %v693_v15 }
  0x3c   : > { %v1017_v46 = vld [vmem:[#allocation2 + $0x8] sm:$0x1]  ;;  %v1043_v47 = vshrl.u32 %v1015_v43, 16  ;;  %v1046_v48 = vshll.u32 %v1015_v43, 16  ;;  %v1052_v53 = vshll.u32 %v1016_v45, 16  ;;  %v1056_v54 = vshrl.u32 %v1016_v45, 16 }
  0x3d   : > { %v1328_v51 = vsel %vm4818_vm13, %v3840_v40, %v1327_v41  ;;  %v1329_v52 = vrot.slane %v1327_v41, 4  ;;  %v1062_v59 = vshll.u32 %v1017_v46, 16  ;;  %v1074_v60 = vrot.slane %v1073_v38, 4  ;;  %v1282_v18 = vld [vmem:[#allocation2 + $0x20] sm:$0x1]  ;;  %v4430_v19 = vld [vmem:[%s5458_s3 + $0x188] sm:$0xff]  }
  0x3e   : > { %v1045_v57 = vrot.slane %v1043_v47, 4  ;;  %v1048_v58 = vrot.slane %v1046_v48, 5  ;;  %v1054_v63 = vrot.slane %v1052_v53, 5  ;;  %v1058_v0 = vrot.slane %v1056_v54, 4  ;;  %v1021_v24 = vld [vmem:[#allocation2 + $0x18] sm:$0xf] }
  0x3f   : > { %v1331_v61 = vsel %vm4818_vm13, %v1329_v52, %v1330_v42  ;;  %v1064_v5 = vrot.slane %v1062_v59, 5  ;;  %v1079_v6 = vsel %vm4847_vm14, %v1074_v60, %v4814_v25  ;;  %v1084_v13 = vrot.slane %v1083_v49, 4  ;;  %v1022_v31 = vld [vmem:[#allocation2 + $0x1c] sm:$0xf]  ;;  %v1023_v16 = vld [vmem:[#allocation2 + $0x20] sm:$0x1] }
  0x40   : > { %v3848_v3 = vcombine.low %v1328_v51, %v1331_v61  ;;  %v1049_v4 = vor.u32 %v1048_v58, %v1045_v57  ;;  %v1059_v12 = vor.u32 %v1058_v0, %v1054_v63  ;;  %v699_v21 = vshrl.u32 %v4007_v50, 16  ;;  %v4413_v42 = vld [vmem:[#allocation2] sm:$0xff]   ;;  %v4416_v48 = vld [vmem:[%s5458_s3 + $0x148] sm:$0xff]  }
  0x41   : > { %v702_v22 = vshll.u32 %v4007_v50, 16  ;;  %v3842_v23 = vrot.slane %v1280_v9, 9  ;;  %v1089_v26 = vsel %vm4847_vm14, %v1084_v13, %v1088_v44  ;;  %v697_v29 = vrot.slane %v693_v15, 4  ;;  %v4414_v47 = vld [vmem:[%s5458_s3 + $0x100] sm:$0xff]  }
  0x42   : > { %3144 = vmatmul.mubr.bf16.vlgmr.msra.gmra.mrb[0].mxu1 %v3848_v3  ;;  %v1050_v20 = vrot.slane %v1049_v4, 4  ;;  %v1060_v25 = vrot.slane %v1059_v12, 4  ;;  %v701_v34 = vrot.slane %v699_v21, 7  ;;  %v1341_v38 = vrot.slane %v1281_v10, 5  ;;  %v477_v61 = vld [vmem:[%s4709_s23 + $0x40] sm:$0xff] }
  0x43   : > { %3151 = vmatprep.mubr.bf16.mxu1 %v4415_v55  ;;  %4211 = vmatpush3.bf16.msra.mxu1 %v4424_v56  ;;  %v522_v40 = vadd.f32 %v4733_v36, %v4824_v30  ;;  %v3833_v43 = vcombine.low %v1079_v6, %v1089_v26  ;;  %v837_v44 = vsel %vm4777_vm8, %v696_v27, %v836_v8  ;;  %v1091_v45 = vshrl.u32 %v1021_v24, 16  ;;  %v840_v55 = vld [vmem:[#allocation2 + $0x2c] sm:$0x1]  ;;  %v4433_v8 = vld [vmem:[%s5458_s3 + $0x1d0] sm:$0xff]  }
  0x44   : > { %v1055_v32 = vsel %vm4847_vm14, %v1050_v20, %v1054_v63  ;;  %4212 = vmatprep.subr.bf16.mxu1 %v4427_v11  ;;  %v1065_v41 = vsel %vm4847_vm14, %v1060_v25, %v1064_v5  ;;  %v704_v30 = vor.u32 %v702_v22, %v701_v34  ;;  %v706_v49 = vrot.slane %v701_v34, 4  ;;  %838 = vst [vmem:[#allocation2 + $0x24] sm:$0xf] %v837_v44  ;;  %v4418_v56 = vld [vmem:[%s5458_s3 + $0x108] sm:$0xff]   ;;  %v4420_v5 = vld [vmem:[%s5458_s3 + $0x150] sm:$0xff]  }
  0x45   : > { %v3832_v46 = vcombine.low %v1055_v32, %v1065_v41  ;;  %v1344_v50 = vrot.slane %v1282_v18, 5  ;;  %v1343_v51 = vrot.slane %v1341_v38, 4  ;;  %v1093_v52 = vrot.slane %v1091_v45, 4  ;;  %v478_v63 = vld [vmem:[%s4709_s23 + $0x48] sm:$0xff]  ;;  %v4423_v18 = vld [vmem:[%s5458_s3 + $0x110] sm:$0xff]   ;;  %v4426_v32 = vld [vmem:[%s5458_s3 + $0x158] sm:$0xff]  }
  0x46   : > { %v1094_v53 = vshll.u32 %v1021_v24, 16  ;;  %v1100_v54 = vshll.u32 %v1022_v31, 16  ;;  %v705_v57 = vsel %vm4770_vm7, %v697_v29, %v704_v30  ;;  %v1104_v58 = vshrl.u32 %v1022_v31, 16  ;;  %v4417_v20 = vld [vmem:[#allocation2 + $0xc] sm:$0xff]   ;;  %v4429_v30 = vld [vmem:[%s5458_s3 + $0x118] sm:$0xff]  }
  0x47   : > { %4213 = vmatpush3.bf16.msra.mxu1 %v4430_v19  ;;  %3046 = vmatprep.mubr.bf16.mxu0 %v3832_v46  ;;  %v1110_v59 = vshll.u32 %v1023_v16, 16  ;;  %v537_v60 = vmax.f32 %v4835_v39, 0.0  ;;  %839 = vst [vmem:[#allocation2 + $0x28] sm:$0xf] %v705_v57  ;;  %v4889_v0 = vsel %vm4818_vm13, %v3842_v23, %v1341_v38  ;;  %v538_v6 = vmax.f32 %v522_v40, 0.0  ;;  %v4436_v19 = vld [vmem:[%s5458_s3 + $0x190] sm:$0xff]  }
  0x48   : > { %3047 = vmatmul.mubr.bf16.vlgmr.msra.gmra.mrb[0].mxu0 %v4413_v42  ;;  %v1096_v3 = vrot.slane %v1094_v53, 5  ;;  %v1102_v4 = vrot.slane %v1100_v54, 5  ;;  %v1345_v39 = vsel %vm4818_vm13, %v1343_v51, %v1344_v50  ;;  %v1106_v9 = vrot.slane %v1104_v58, 4  ;;  %4214 = vmatprep.subr.bf16.mxu1 %v4433_v8  ;;  %v843_v24 = vld [vmem:[#allocation2 + $0x30] sm:$0xf] }
  0x49   : > { %4147 = vmatpush3.bf16.msra.mxu0 %v4414_v47  ;;  %v1112_v10 = vrot.slane %v1110_v59, 5  ;;  %v4008_v11 = vpack.c.bf16 %v537_v60, %v537_v60  ;;  %3054 = vmatprep.mubr.bf16.mxu0 %v3833_v43  ;;  %v4009_v13 = vpack.c.bf16 %v538_v6, %v538_v6  ;;  %v841_v15 = vsel %vm4762_vm6, %v706_v49, %v840_v55  ;;  %v479_v43 = vld [vmem:[%s4709_s23 + $0x50] sm:$0xff]  ;;  %v847_v50 = vld [vmem:[#allocation2 + $0x38] sm:$0x1]  ;;  %v4432_v60 = vld [vmem:[%s5458_s3 + $0x160] sm:$0xff]  }
  0x4a   : > { %3152 = vmatmul.mubr.bf16.gmra.mrb[4].mxu1 %v3849_v1  ;;  %4148 = vmatprep.subr.bf16.mxu0 %v4416_v48  ;;  %v1097_v12 = vor.u32 %v1096_v3, %v1093_v52  ;;  %v1107_v17 = vor.u32 %v1106_v9, %v1102_v4  ;;  %842 = vst [vmem:[#allocation2 + $0x2c] sm:$0x1] %v841_v15  ;;  %v4422_v6 = vld [vmem:[#allocation2 + $0x18] sm:$0xff]  }
  0x4b   : > { %v708_v35 = vshrl.u32 %v4008_v11, 16  ;;  %v711_v37 = vshll.u32 %v4008_v11, 16  ;;  %v500_v1 = vmul.f32 %v4723_v33, %v477_v61  ;;  %v716_v22 = vshrl.u32 %v4009_v13, 16  ;;  %v1283_v31 = vld [vmem:[#allocation2 + $0x24] sm:$0xe]  ;;  %4215 = vmatpush3.bf16.msra.mxu1 %v4436_v19 }
  0x4c   : > { %v1098_v21 = vrot.slane %v1097_v12, 4  ;;  %v719_v23 = vshll.u32 %v4009_v13, 16  ;;  %v501_v25 = vmul.f32 %v4723_v33, %v478_v63  ;;  %v3850_v26 = vcombine.low %v4889_v0, %v1345_v39  ;;  %v1024_v16 = vld [vmem:[#allocation2 + $0x24] sm:$0xf] }
  0x4d   : > { %4149 = vmatpush3.bf16.msra.mxu0 %v4418_v56  ;;  %v1108_v27 = vrot.slane %v1107_v17, 4  ;;  %v710_v29 = vrot.slane %v708_v35, 7  ;;  %v523_v34 = vadd.f32 %v4733_v36, %v500_v1  ;;  %v718_v40 = vrot.slane %v716_v22, 7  ;;  %v4435_v17 = vld [vmem:[%s5458_s3 + $0x120] sm:$0xff]   ;;  %v4438_v35 = vld [vmem:[%s5458_s3 + $0x168] sm:$0xff]  }
  0x4e   : > { %v1103_v38 = vsel %vm4847_vm14, %v1098_v21, %v1102_v4  ;;  %4150 = vmatprep.subr.bf16.mxu0 %v4420_v5  ;;  %v3843_v41 = vrot.slane %v1283_v31, 9  ;;  %v1115_v42 = vshrl.u32 %v1024_v16, 16  ;;  %v4419_v44 = vld [vmem:[#allocation2 + $0x24] sm:$0xff]   ;;  %v524_v49 = vadd.f32 %v4733_v36, %v501_v25 }
  0x4f   : > { %v1113_v45 = vsel %vm4847_vm14, %v1108_v27, %v1112_v10  ;;  %v713_v46 = vor.u32 %v711_v37, %v710_v29  ;;  %v714_v47 = vrot.slane %v710_v29, 4  ;;  %v1284_v48 = vld [vmem:[#allocation2 + $0x28] sm:$0xf]  ;;  %v721_v52 = vor.u32 %v719_v23, %v718_v40  ;;  %3159 = vmatprep.mubr.bf16.mxu1 %v4419_v44 }
  0x50   : > { %3055 = vmatmul.mubr.bf16.gmra.mrb[4].mxu0 %v4417_v20  ;;  %v3834_v51 = vcombine.low %v1103_v38, %v1113_v45  ;;  %v723_v53 = vrot.slane %v718_v40, 4  ;;  %v1348_v54 = vrot.slane %v1284_v48, 5  ;;  %v1025_v55 = vld [vmem:[#allocation2 + $0x28] sm:$0xf]  ;;  %v1117_v57 = vrot.slane %v1115_v42, 4  ;;  %v4439_v20 = vld [vmem:[%s5458_s3 + $0x1d8] sm:$0xff]  }
  0x51   : > { %4151 = vmatpush3.bf16.msra.mxu0 %v4423_v18  ;;  %v844_v56 = vsel %vm4777_vm8, %v713_v46, %v843_v24  ;;  %v1118_v58 = vshll.u32 %v1024_v16, 16  ;;  %v1124_v59 = vshll.u32 %v1025_v55, 16  ;;  %v722_v61 = vsel %vm4770_vm7, %v714_v47, %v721_v52  ;;  %v1285_v63 = vld [vmem:[#allocation2 + $0x2c] sm:$0x1]  ;;  %v480_v18 = vld [vmem:[%s4709_s23 + $0x58] sm:$0xff]  ;;  %4216 = vmatprep.subr.bf16.mxu1 %v4439_v20 }
  0x52   : > { %3160 = vmatmul.mubr.bf16.gmra.mrb[8].mxu1 %v3850_v26  ;;  %3062 = vmatprep.mubr.bf16.mxu0 %v3834_v51  ;;  %845 = vst [vmem:[#allocation2 + $0x30] sm:$0xf] %v844_v56  ;;  %v1350_v0 = vrot.slane %v1348_v54, 4  ;;  %v1026_v3 = vld [vmem:[#allocation2 + $0x2c] sm:$0x1]  ;;  %v1128_v4 = vshrl.u32 %v1025_v55, 16  ;;  %v502_v5 = vmul.f32 %v4723_v33, %v479_v43  ;;  %v848_v15 = vsel %vm4762_vm6, %v723_v53, %v847_v50 }
  0x53   : > { %846 = vst [vmem:[#allocation2 + $0x34] sm:$0xf] %v722_v61  ;;  %v1351_v8 = vrot.slane %v1285_v63, 5  ;;  %v1120_v39 = vrot.slane %v1118_v58, 5  ;;  %v1126_v9 = vrot.slane %v1124_v59, 5  ;;  %v1134_v10 = vshll.u32 %v1026_v3, 16  ;;  %4152 = vmatprep.subr.bf16.mxu0 %v4426_v32 }
  0x54   : > { %v1130_v11 = vrot.slane %v1128_v4, 4  ;;  %v539_v12 = vmax.f32 %v523_v34, 0.0  ;;  %v540_v13 = vmax.f32 %v524_v49, 0.0  ;;  %v1349_v37 = vsel %vm4818_vm13, %v3843_v41, %v1348_v54  ;;  %849 = vst [vmem:[#allocation2 + $0x38] sm:$0x1] %v848_v15  ;;  %v4441_v34 = vld [vmem:[%s5458_s3 + $0x128] sm:$0xff]  }
  0x55   : > { %v1121_v1 = vor.u32 %v1120_v39, %v1117_v57  ;;  %v1136_v19 = vrot.slane %v1134_v10, 5  ;;  %4153 = vmatpush3.bf16.msra.mxu0 %v4429_v30  ;;  %v1352_v21 = vsel %vm4818_vm13, %v1350_v0, %v1351_v8  ;;  %v503_v26 = vmul.f32 %v4723_v33, %v480_v18  ;;  %v850_v42 = vld [vmem:[#allocation2 + $0x3c] sm:$0xf]  ;;  %v4428_v54 = vld [vmem:[#allocation2 + $0x24] sm:$0xff]  }
  0x56   : > { %v1131_v22 = vor.u32 %v1130_v11, %v1126_v9  ;;  %v4010_v23 = vpack.c.bf16 %v539_v12, %v539_v12  ;;  %v4011_v24 = vpack.c.bf16 %v540_v13, %v540_v13  ;;  %4154 = vmatprep.subr.bf16.mxu0 %v4432_v60  ;;  %v525_v27 = vadd.f32 %v4733_v36, %v502_v5  ;;  %v854_v39 = vld [vmem:[#allocation2 + $0x44] sm:$0x1] }
  0x57   : > { %v1122_v25 = vrot.slane %v1121_v1, 4  ;;  %v3851_v38 = vcombine.low %v1349_v37, %v1352_v21  ;;  %v526_v53 = vadd.f32 %v4733_v36, %v503_v26  ;;  %v4444_v15 = vld [vmem:[%s5458_s3 + $0x1e0] sm:$0xff]  }
  0x58   : > { %3063 = vmatmul.mubr.bf16.gmra.mrb[8].mxu0 %v4422_v6  ;;  %v1132_v29 = vrot.slane %v1131_v22, 4  ;;  %v725_v31 = vshrl.u32 %v4010_v23, 16  ;;  %v728_v16 = vshll.u32 %v4010_v23, 16  ;;  %v733_v32 = vshrl.u32 %v4011_v24, 16  ;;  %v481_v1 = vld [vmem:[%s4709_s23 + $0x60] sm:$0xff]  ;;  %v482_v23 = vld [vmem:[%s4709_s23 + $0x68] sm:$0xff] }
  0x59   : > { %v1127_v40 = vsel %vm4847_vm14, %v1122_v25, %v1126_v9  ;;  %v736_v41 = vshll.u32 %v4011_v24, 16  ;;  %v1286_v43 = vld [vmem:[#allocation2 + $0x30] sm:$0xe]  ;;  %4155 = vmatpush3.bf16.msra.mxu0 %v4435_v17  ;;  %v541_v44 = vmax.f32 %v525_v27, 0.0  ;;  %v4442_v9 = vld [vmem:[%s5458_s3 + $0x198] sm:$0xff]   ;;  %v542_v37 = vmax.f32 %v526_v53, 0.0 }
  0x5a   : > { %v4425_v45 = vld [vmem:[#allocation2 + $0x30] sm:$0xff]   ;;  %v1137_v46 = vsel %vm4847_vm14, %v1132_v29, %v1136_v19  ;;  %v727_v47 = vrot.slane %v725_v31, 7  ;;  %v735_v48 = vrot.slane %v733_v32, 7  ;;  %v3844_v30 = vrot.slane %v1286_v43, 9  ;;  %4156 = vmatprep.subr.bf16.mxu0 %v4438_v35  ;;  %4217 = vmatpush3.bf16.msra.mxu1 %v4442_v9  ;;  %v857_v29 = vld [vmem:[#allocation2 + $0x48] sm:$0xf] }
  0x5b   : > { %v3835_v49 = vcombine.low %v1127_v40, %v1137_v46  ;;  %v1287_v50 = vld [vmem:[#allocation2 + $0x34] sm:$0xf]  ;;  %v1027_v51 = vld [vmem:[#allocation2 + $0x30] sm:$0xf]  ;;  %3167 = vmatprep.mubr.bf16.mxu1 %v4425_v45  ;;  %v1288_v58 = vld [vmem:[#allocation2 + $0x38] sm:$0x1]  ;;  %v4012_v60 = vpack.c.bf16 %v541_v44, %v541_v44  ;;  %4218 = vmatprep.subr.bf16.mxu1 %v4444_v15  ;;  %v4013_v27 = vpack.c.bf16 %v542_v37, %v542_v37 }
  0x5c   : > { %v1028_v52 = vld [vmem:[#allocation2 + $0x34] sm:$0xf]  ;;  %v730_v55 = vor.u32 %v728_v16, %v727_v47  ;;  %v731_v56 = vrot.slane %v727_v47, 4  ;;  %v738_v57 = vor.u32 %v736_v41, %v735_v48  ;;  %v1029_v59 = vld [vmem:[#allocation2 + $0x38] sm:$0x1]  ;;  %3168 = vmatmul.mubr.bf16.gmra.mrb[12].mxu1 %v3851_v38  ;;  %v1355_v61 = vrot.slane %v1287_v50, 5 }
  0x5d   : > { %3070 = vmatprep.mubr.bf16.mxu0 %v3835_v49  ;;  %v1358_v63 = vrot.slane %v1288_v58, 5  ;;  %v1139_v0 = vshrl.u32 %v1027_v51, 16  ;;  %v1142_v3 = vshll.u32 %v1027_v51, 16  ;;  %v1148_v6 = vshll.u32 %v1028_v52, 16  ;;  %4157 = vmatpush3.bf16.msra.mxu0 %v4441_v34  ;;  %v4445_v31 = vld [vmem:[%s5458_s3 + $0x1a0] sm:$0xff]   ;;  %v4434_v41 = vld [vmem:[#allocation2 + $0x30] sm:$0xff]  }
  0x5e   : > { %v739_v4 = vsel %vm4770_vm7, %v731_v56, %v738_v57  ;;  %v851_v5 = vsel %vm4777_vm8, %v730_v55, %v850_v42  ;;  %v1152_v8 = vshrl.u32 %v1028_v52, 16  ;;  %v740_v10 = vrot.slane %v735_v48, 4  ;;  %4219 = vmatpush3.bf16.msra.mxu1 %v4445_v31  ;;  %v4446_v45 = vld [vmem:[%s5458_s3 + $0x170] sm:$0xff]   ;;  %v4447_v49 = vld [vmem:[%s5458_s3 + $0x1e8] sm:$0xff]   ;;  %v484_v31 = vld [vmem:[%s4709_s23 + $0x78] sm:$0xff] }
  0x5f   : > { %852 = vst [vmem:[#allocation2 + $0x3c] sm:$0xf] %v851_v5  ;;  %853 = vst [vmem:[#allocation2 + $0x40] sm:$0xf] %v739_v4  ;;  %v1357_v11 = vrot.slane %v1355_v61, 4  ;;  %v1141_v12 = vrot.slane %v1139_v0, 4  ;;  %v1356_v19 = vsel %vm4818_vm13, %v3844_v30, %v1355_v61  ;;  %v504_v38 = vmul.f32 %v4723_v33, %v481_v1  ;;  %4158 = vmatprep.subr.bf16.mxu0 %v4446_v45 }
  0x60   : > { %v1144_v13 = vrot.slane %v1142_v3, 5  ;;  %3071 = vmatmul.mubr.bf16.gmra.mrb[12].mxu0 %v4428_v54  ;;  %v1150_v17 = vrot.slane %v1148_v6, 5  ;;  %v1154_v18 = vrot.slane %v1152_v8, 4  ;;  %v1158_v35 = vshll.u32 %v1029_v59, 16  ;;  %v861_v53 = vld [vmem:[#allocation2 + $0x50] sm:$0x1]  ;;  %4220 = vmatprep.subr.bf16.mxu1 %v4447_v49 }
  0x61   : > { %v742_v21 = vshrl.u32 %v4012_v60, 16  ;;  %v745_v22 = vshll.u32 %v4012_v60, 16  ;;  %v1359_v24 = vsel %vm4818_vm13, %v1357_v11, %v1358_v63  ;;  %v855_v34 = vsel %vm4762_vm6, %v740_v10, %v854_v39  ;;  %v4999_v59 = vld [vmem:[%s5460_s5] ss:$0 sm:$0xff] }
  0x62   : > { %v1145_v20 = vor.u32 %v1144_v13, %v1141_v12  ;;  %v1155_v25 = vor.u32 %v1154_v18, %v1150_v17  ;;  %v1160_v26 = vrot.slane %v1158_v35, 5  ;;  %v750_v42 = vshrl.u32 %v4013_v27, 16  ;;  %856 = vst [vmem:[#allocation2 + $0x44] sm:$0x1] %v855_v34 }
  0x63   : > { %v744_v32 = vrot.slane %v742_v21, 7  ;;  %v753_v43 = vshll.u32 %v4013_v27, 16  ;;  %v505_v44 = vmul.f32 %v4723_v33, %v482_v23  ;;  %v3852_v46 = vcombine.low %v1356_v19, %v1359_v24  ;;  %v4449_v23 = vld [vmem:[%s5458_s3 + $0x130] sm:$0xff]   ;;  %v4450_v27 = vld [vmem:[%s5458_s3 + $0x1a8] sm:$0xff]  }
  0x64   : > { %v1146_v16 = vrot.slane %v1145_v20, 4  ;;  %v1156_v40 = vrot.slane %v1155_v25, 4  ;;  %v752_v33 = vrot.slane %v750_v42, 7  ;;  %v527_v52 = vadd.f32 %v4733_v36, %v504_v38  ;;  %4159 = vmatpush3.bf16.msra.mxu0 %v4449_v23  ;;  %4221 = vmatpush3.bf16.msra.mxu1 %v4450_v27 }
  0x65   : > { %v747_v48 = vor.u32 %v745_v22, %v744_v32  ;;  %v748_v30 = vrot.slane %v744_v32, 4  ;;  %v528_v60 = vadd.f32 %v4999_v59, %v505_v44  ;;  %v864_v44 = vld [vmem:[#allocation2 + $0x54] sm:$0xf] }
  0x66   : > { %v1151_v47 = vsel %vm4847_vm14, %v1146_v16, %v1150_v17  ;;  %v4431_v50 = vld [vmem:[#allocation2 + $0x3c] sm:$0xff]   ;;  %v1161_v51 = vsel %vm4847_vm14, %v1156_v40, %v1160_v26  ;;  %v755_v61 = vor.u32 %v753_v43, %v752_v33  ;;  %v757_v36 = vrot.slane %v752_v33, 4 }
  0x67   : > { %v3836_v54 = vcombine.low %v1151_v47, %v1161_v51  ;;  %v858_v55 = vsel %vm4777_vm8, %v747_v48, %v857_v29  ;;  %v1289_v56 = vld [vmem:[#allocation2 + $0x3c] sm:$0xe]  ;;  %v1290_v57 = vld [vmem:[#allocation2 + $0x40] sm:$0xf]  ;;  %3175 = vmatprep.mubr.bf16.mxu1 %v4431_v50  ;;  %v543_v10 = vmax.f32 %v527_v52, 0.0  ;;  %v544_v21 = vmax.f32 %v528_v60, 0.0 }
  0x68   : > { %v1030_v58 = vld [vmem:[#allocation2 + $0x3c] sm:$0xf]  ;;  %859 = vst [vmem:[#allocation2 + $0x48] sm:$0xf] %v858_v55  ;;  %v3845_v63 = vrot.slane %v1289_v56, 9  ;;  %v1362_v0 = vrot.slane %v1290_v57, 5  ;;  %3176 = vmatmul.mubr.bf16.gmra.mrb[16].mxu1 %v3852_v46  ;;  %v756_v39 = vsel %vm4770_vm7, %v748_v30, %v755_v61  ;;  %v862_v18 = vsel %vm4762_vm6, %v757_v36, %v861_v53 }
  0x69   : > { %v1031_v3 = vld [vmem:[#allocation2 + $0x40] sm:$0xf]  ;;  %3078 = vmatprep.mubr.bf16.mxu0 %v3836_v54  ;;  %v1163_v4 = vshrl.u32 %v1030_v58, 16  ;;  %v1166_v5 = vshll.u32 %v1030_v58, 16  ;;  %860 = vst [vmem:[#allocation2 + $0x4c] sm:$0xf] %v756_v39  ;;  %v4014_v22 = vpack.c.bf16 %v543_v10, %v543_v10  ;;  %v4015_v34 = vpack.c.bf16 %v544_v21, %v544_v21 }
  0x6a   : > { %v1172_v6 = vshll.u32 %v1031_v3, 16  ;;  %v1176_v8 = vshrl.u32 %v1031_v3, 16  ;;  %3079 = vmatmul.mubr.bf16.gmra.mrb[16].mxu0 %v4434_v41  ;;  %v1364_v9 = vrot.slane %v1362_v0, 4  ;;  %v1291_v11 = vld [vmem:[#allocation2 + $0x44] sm:$0x1]  ;;  %v1363_v12 = vsel %vm4818_vm13, %v3845_v63, %v1362_v0  ;;  %v483_v29 = vld [vmem:[%s4709_s23 + $0x70] sm:$0xff] }
  0x6b   : > { %v1032_v13 = vld [vmem:[#allocation2 + $0x44] sm:$0x1]  ;;  %v1165_v15 = vrot.slane %v1163_v4, 4  ;;  %v1168_v17 = vrot.slane %v1166_v5, 5  ;;  %v1365_v35 = vrot.slane %v1291_v11, 5  ;;  %v759_v38 = vshrl.u32 %v4014_v22, 16 }
  0x6c   : > { %v1174_v37 = vrot.slane %v1172_v6, 5  ;;  %v1178_v1 = vrot.slane %v1176_v8, 4  ;;  %v1182_v19 = vshll.u32 %v1032_v13, 16  ;;  %863 = vst [vmem:[#allocation2 + $0x50] sm:$0x1] %v862_v18  ;;  %v4440_v42 = vld [vmem:[#allocation2 + $0x3c] sm:$0xff]  }
  0x6d   : > { %v1169_v20 = vor.u32 %v1168_v17, %v1165_v15  ;;  %v1366_v24 = vsel %vm4818_vm13, %v1364_v9, %v1365_v35  ;;  %v762_v43 = vshll.u32 %v4014_v22, 16  ;;  %v4476_v47 = vld [vmem:[%s5459_s4] ss:$0 sm:$0xff]  ;;  %v4452_v30 = vld [vmem:[%s5458_s3 + $0x1f0] sm:$0xff]   ;;  %v761_v50 = vrot.slane %v759_v38, 7  ;;  %v4455_v35 = vld [vmem:[%s5458_s3 + $0x1f8] sm:$0xff]  }
  0x6e   : > { %v1179_v25 = vor.u32 %v1178_v1, %v1174_v37  ;;  %v1184_v26 = vrot.slane %v1182_v19, 5  ;;  %v3853_v16 = vcombine.low %v1363_v12, %v1366_v24  ;;  %v506_v48 = vmul.f32 %v4476_v47, %v483_v29  ;;  %v4453_v52 = vld [vmem:[%s5458_s3 + $0x1b0] sm:$0xff]   ;;  %4222 = vmatprep.subr.bf16.mxu1 %v4452_v30  ;;  %v4454_v12 = vld [vmem:[%s5458_s3 + $0x178] sm:$0xff]   ;;  %v871_v30 = vld [vmem:[#allocation2 + $0x60] sm:$0xf] }
  0x6f   : > { %v1170_v32 = vrot.slane %v1169_v20, 4  ;;  %v5018_v40 = vld [vmem:[#allocation2 + $0x48] sm:$0xe]  ;;  %v767_v51 = vshrl.u32 %v4015_v34, 16  ;;  %v770_v33 = vshll.u32 %v4015_v34, 16  ;;  %v507_v57 = vmul.f32 %v4476_v47, %v484_v31  ;;  %4223 = vmatpush3.bf16.msra.mxu1 %v4453_v52  ;;  %4160 = vmatprep.subr.bf16.mxu0 %v4454_v12  ;;  %v4458_v47 = vld [vmem:[%s5458_s3 + $0x1b8] sm:$0xff]  }
  0x70   : > { %v1180_v41 = vrot.slane %v1179_v25, 4  ;;  %v3846_v45 = vrot.slane %v5018_v40, 9  ;;  %v1033_v46 = vld [vmem:[#allocation2 + $0x48] sm:$0xf]  ;;  %v1293_v55 = vld [vmem:[#allocation2 + $0x4c] sm:$0xf]  ;;  %v764_v60 = vor.u32 %v762_v43, %v761_v50  ;;  %v529_v8 = vadd.f32 %v4999_v59, %v506_v48  ;;  %4224 = vmatprep.subr.bf16.mxu1 %v4455_v35 }
  0x71   : > { %v1175_v49 = vsel %vm4847_vm14, %v1170_v32, %v1174_v37  ;;  %v4437_v53 = vld [vmem:[#allocation2 + $0x48] sm:$0xff]   ;;  %v1187_v56 = vshrl.u32 %v1033_v46, 16  ;;  %v765_v61 = vrot.slane %v761_v50, 4  ;;  %v769_v36 = vrot.slane %v767_v51, 7  ;;  %v868_v21 = vld [vmem:[#allocation2 + $0x5c] sm:$0x1] }
  0x72   : > { %v1185_v54 = vsel %vm4847_vm14, %v1180_v41, %v1184_v26  ;;  %v1034_v0 = vld [vmem:[#allocation2 + $0x4c] sm:$0xf]  ;;  %3183 = vmatprep.mubr.bf16.mxu1 %v4437_v53  ;;  %v1369_v3 = vrot.slane %v1293_v55, 5  ;;  %v1190_v6 = vshll.u32 %v1033_v46, 16  ;;  %v865_v10 = vsel %vm4777_vm8, %v764_v60, %v864_v44  ;;  %v1967_v35 = vld [vmem:[#allocation2 + $0x1c] sm:$0xf] }
  0x73   : > { %v3837_v58 = vcombine.low %v1175_v49, %v1185_v54  ;;  %v1294_v63 = vld [vmem:[#allocation2 + $0x50] sm:$0x1]  ;;  %v1189_v5 = vrot.slane %v1187_v56, 4  ;;  %3184 = vmatmul.mubr.bf16.gmra.mrb[20].mxu1 %v3853_v16  ;;  %v772_v39 = vor.u32 %v770_v33, %v769_v36  ;;  %v774_v9 = vrot.slane %v769_v36, 4  ;;  %866 = vst [vmem:[#allocation2 + $0x54] sm:$0xf] %v865_v10 }
  0x74   : > { %v1035_v4 = vld [vmem:[#allocation2 + $0x50] sm:$0x1]  ;;  %v1196_v11 = vshll.u32 %v1034_v0, 16  ;;  %v1371_v13 = vrot.slane %v1369_v3, 4  ;;  %v1372_v15 = vrot.slane %v1294_v63, 5  ;;  %v1192_v17 = vrot.slane %v1190_v6, 5  ;;  %4225 = vmatpush3.bf16.msra.mxu1 %v4458_v47 }
  0x75   : > { %3086 = vmatprep.mubr.bf16.mxu0 %v3837_v58  ;;  %v1200_v18 = vshrl.u32 %v1034_v0, 16  ;;  %v773_v37 = vsel %vm4770_vm7, %v765_v61, %v772_v39  ;;  %v1206_v19 = vshll.u32 %v1035_v4, 16  ;;  %v530_v20 = vadd.f32 %v4999_v59, %v507_v57  ;;  %v4457_v59 = vld [vmem:[%s5458_s3 + $0x138] sm:$0xff]   ;;  %v4448_v43 = vld [vmem:[#allocation2 + $0x48] sm:$0xff]  }
  0x76   : > { %3087 = vmatmul.mubr.bf16.gmra.mrb[20].mxu0 %v4440_v42  ;;  %v1198_v1 = vrot.slane %v1196_v11, 5  ;;  %867 = vst [vmem:[#allocation2 + $0x58] sm:$0xf] %v773_v37  ;;  %v1193_v22 = vor.u32 %v1192_v17, %v1189_v5  ;;  %v545_v24 = vmax.f32 %v529_v8, 0.0  ;;  %v869_v27 = vsel %vm4762_vm6, %v774_v9, %v868_v21  ;;  %v1968_v37 = vld [vmem:[#allocation2 + $0x20] sm:$0x1] }
  0x77   : > { %v1202_v23 = vrot.slane %v1200_v18, 4  ;;  %v1208_v25 = vrot.slane %v1206_v19, 5  ;;  %v546_v26 = vmax.f32 %v530_v20, 0.0  ;;  %870 = vst [vmem:[#allocation2 + $0x5c] sm:$0x1] %v869_v27  ;;  %v1370_v32 = vsel %vm4818_vm13, %v3846_v45, %v1369_v3  ;;  %4161 = vmatpush3.bf16.msra.mxu0 %v4457_v59 }
  0x78   : > { %v1194_v29 = vrot.slane %v1193_v22, 4  ;;  %v4016_v16 = vpack.c.bf16 %v545_v24, %v545_v24  ;;  %v1373_v34 = vsel %vm4818_vm13, %v1371_v13, %v1372_v15  ;;  %v1966_v13 = vld [vmem:[#allocation2 + $0x18] sm:$0xf]  ;;  %v1750_v59 = vld [vmem:[#allocation2 + $0x10] sm:$0xf] }
  0x79   : > { %v1203_v31 = vor.u32 %v1202_v23, %v1198_v1  ;;  %v4017_v38 = vpack.c.bf16 %v546_v26, %v546_v26  ;;  %v3854_v49 = vcombine.low %v1370_v32, %v1373_v34  ;;  %v1991_v21 = vshrl.u32 %v1966_v13, 16  ;;  %v1749_v26 = vld [vmem:[#allocation2 + $0xc] sm:$0xe] }
  0x7a   : > { %v1199_v41 = vsel %vm4847_vm14, %v1194_v29, %v1198_v1  ;;  %v776_v44 = vshrl.u32 %v4016_v16, 16  ;;  %v779_v46 = vshll.u32 %v4016_v16, 16  ;;  %v1295_v45 = vld [vmem:[#allocation2 + $0x54] sm:$0xe]  ;;  %v1994_v24 = vshll.u32 %v1966_v13, 16 }
  0x7b   : > { %v1204_v42 = vrot.slane %v1203_v31, 4  ;;  %v784_v40 = vshrl.u32 %v4017_v38, 16  ;;  %v787_v48 = vshll.u32 %v4017_v38, 16  ;;  %v3847_v33 = vrot.slane %v1295_v45, 9  ;;  %v1036_v52 = vld [vmem:[#allocation2 + $0x54] sm:$0xf] }
  0x7c   : > { %v778_v51 = vrot.slane %v776_v44, 7  ;;  %v1211_v36 = vshrl.u32 %v1036_v52, 16  ;;  %v1214_v5 = vshll.u32 %v1036_v52, 16  ;;  %v1993_v29 = vrot.slane %v1991_v21, 4 }
  0x7d   : > { %v1209_v50 = vsel %vm4847_vm14, %v1204_v42, %v1208_v25  ;;  %v4443_v53 = vld [vmem:[#allocation2 + $0x54] sm:$0xff]   ;;  %v5064_v55 = vrot.slane %v784_v40, 7  ;;  %v2000_v25 = vshll.u32 %v1967_v35, 16  ;;  %v2004_v31 = vshrl.u32 %v1967_v35, 16 }
  0x7e   : > { %v3838_v54 = vcombine.low %v1199_v41, %v1209_v50  ;;  %v1296_v56 = vld [vmem:[#allocation2 + $0x58] sm:$0xf]  ;;  %v781_v57 = vor.u32 %v779_v46, %v778_v51  ;;  %v782_v58 = vrot.slane %v778_v51, 4  ;;  %3191 = vmatprep.mubr.bf16.mxu1 %v4443_v53  ;;  %v1297_v3 = vld [vmem:[#allocation2 + $0x5c] sm:$0x1]  ;;  %v1213_v10 = vrot.slane %v1211_v36, 4 }
  0x7f   : > { %v1376_v60 = vrot.slane %v1296_v56, 5  ;;  %v1037_v61 = vld [vmem:[#allocation2 + $0x58] sm:$0xf]  ;;  %v789_v63 = vor.u32 %v787_v48, %v5064_v55  ;;  %v791_v0 = vrot.slane %v5064_v55, 4  ;;  %v1038_v4 = vld [vmem:[#allocation2 + $0x5c] sm:$0x1]  ;;  %3192 = vmatmul.mubr.bf16.gmra.mrb[24].mxu1 %v3854_v49 }
  0x80   : > { %3094 = vmatprep.mubr.bf16.mxu0 %v3838_v54  ;;  %v872_v6 = vsel %vm4777_vm8, %v781_v57, %v871_v30  ;;  %v1379_v39 = vrot.slane %v1297_v3, 5  ;;  %v1216_v11 = vrot.slane %v1214_v5, 5  ;;  %v1220_v12 = vshll.u32 %v1037_v61, 16  ;;  %v1751_v41 = vld [vmem:[#allocation2 + $0x14] sm:$0x1] }
  0x81   : > { %3095 = vmatmul.mubr.bf16.gmra.mrb[24].mxu0 %v4448_v43  ;;  %v1378_v8 = vrot.slane %v1376_v60, 4  ;;  %v790_v9 = vsel %vm4770_vm7, %v782_v58, %v789_v63  ;;  %873 = vst [vmem:[#allocation2 + $0x60] sm:$0xf] %v872_v6  ;;  %v1377_v15 = vsel %vm4818_vm13, %v3847_v33, %v1376_v60  ;;  %v1224_v17 = vshrl.u32 %v1037_v61, 16  ;;  %v5079_v43 = vld [vmem:[%s5458_s3 + $0x200] sm:$0xff]   ;;  %v4456_v45 = vld [vmem:[#allocation2 + $0x54] sm:$0xff]  }
  0x82   : > { %874 = vst [vmem:[#allocation2 + $0x64] sm:$0xf] %v790_v9  ;;  %v1230_v18 = vshll.u32 %v1038_v4, 16  ;;  %v1217_v19 = vor.u32 %v1216_v11, %v1213_v10  ;;  %v1222_v20 = vrot.slane %v1220_v12, 5  ;;  %v2010_v16 = vshll.u32 %v1968_v37, 16  ;;  %4290 = vmatprep.subr.bf16.mxu0 %v5079_v43  ;;  %4322 = vmatprep.subr.bf16.mxu1 %v5079_v43 }
  0x83   : > { %v1380_v1 = vsel %vm4818_vm13, %v1378_v8, %v1379_v39  ;;  %v1226_v22 = vrot.slane %v1224_v17, 4  ;;  %v1996_v34 = vrot.slane %v1994_v24, 5  ;;  %v2002_v38 = vrot.slane %v2000_v25, 5  ;;  %v1493_v54 = vld [vmem:[#allocation2 + $0xc] sm:$0xf] }
  0x84   : > { %v1232_v23 = vrot.slane %v1230_v18, 5  ;;  %v1218_v27 = vrot.slane %v1217_v19, 4  ;;  %v3872_v42 = vrot.slane %v1749_v26, 9  ;;  %v3855_v44 = vcombine.low %v1377_v15, %v1380_v1  ;;  %v1494_v58 = vld [vmem:[#allocation2 + $0x10] sm:$0xf] }
  0x85   : > { %v1227_v32 = vor.u32 %v1226_v22, %v1222_v20  ;;  %v2006_v46 = vrot.slane %v2004_v31, 4  ;;  %v2012_v47 = vrot.slane %v2010_v16, 5  ;;  %v1799_v40 = vrot.slane %v1750_v59, 5  ;;  %v1495_v60 = vld [vmem:[#allocation2 + $0x14] sm:$0x1] }
  0x86   : > { %v1223_v48 = vsel %vm4847_vm14, %v1218_v27, %v1222_v20  ;;  %v1997_v49 = vor.u32 %v1996_v34, %v1993_v29  ;;  %v1802_v50 = vrot.slane %v1751_v41, 5  ;;  %v1518_v61 = vshrl.u32 %v1493_v54, 16  ;;  %v1969_v5 = vld [vmem:[#allocation2 + $0x24] sm:$0xf]  ;;  %v1970_v6 = vld [vmem:[#allocation2 + $0x28] sm:$0xf] }
  0x87   : > { %v1228_v30 = vrot.slane %v1227_v32, 4  ;;  %v2007_v33 = vor.u32 %v2006_v46, %v2002_v38  ;;  %v1800_v52 = vsel %vm4818_vm13, %v3872_v42, %v1799_v40  ;;  %v1801_v53 = vrot.slane %v1799_v40, 4  ;;  %v1971_v11 = vld [vmem:[#allocation2 + $0x2c] sm:$0x1]  ;;  %v1752_v19 = vld [vmem:[#allocation2 + $0x18] sm:$0xe] }
  0x88   : > { %v1998_v57 = vrot.slane %v1997_v49, 4  ;;  %v1521_v4 = vshll.u32 %v1493_v54, 16  ;;  %v1520_v9 = vrot.slane %v1518_v61, 4  ;;  %v1527_v10 = vshll.u32 %v1494_v58, 16  ;;  %v4459_v20 = vld [vmem:[#allocation2 + $0x18] sm:$0xff]  }
  0x89   : > { %v4451_v51 = vld [vmem:[#allocation2 + $0x60] sm:$0xff]   ;;  %v1233_v56 = vsel %vm4847_vm14, %v1228_v30, %v1232_v23  ;;  %v2008_v63 = vrot.slane %v2007_v33, 4  ;;  %v1803_v3 = vsel %vm4818_vm13, %v1801_v53, %v1802_v50  ;;  %v1531_v15 = vshrl.u32 %v1494_v58, 16  ;;  %v1753_v25 = vld [vmem:[#allocation2 + $0x1c] sm:$0xf] }
  0x8a   : > { %3199 = vmatprep.mubr.bf16.mxu1 %v4451_v51  ;;  %v3839_v36 = vcombine.low %v1223_v48, %v1233_v56  ;;  %v2003_v8 = vsel %vm4847_vm14, %v1998_v57, %v2002_v38  ;;  %v3880_v39 = vcombine.low %v1800_v52, %v1803_v3  ;;  %v1523_v13 = vrot.slane %v1521_v4, 5  ;;  %v1754_v16 = vld [vmem:[#allocation2 + $0x20] sm:$0x1]  ;;  %v1497_v49 = vld [vmem:[#allocation2 + $0x1c] sm:$0xf] }
  0x8b   : > { %3200 = vmatmul.mubr.bf16.gmra.mrb[28].mxu1 %v3855_v44  ;;  %v2013_v12 = vsel %vm4847_vm14, %v2008_v63, %v2012_v47  ;;  %v1537_v17 = vshll.u32 %v1495_v60, 16  ;;  %v1529_v35 = vrot.slane %v1527_v10, 5  ;;  %v2015_v37 = vshrl.u32 %v1969_v5, 16  ;;  %v5098_v47 = vld [vmem:[%s5458_s3 + $0x208] sm:$0xff]   ;;  %v1498_v53 = vld [vmem:[#allocation2 + $0x20] sm:$0x1] }
  0x8c   : > { %3102 = vmatprep.mubr.bf16.mxu0 %v3839_v36  ;;  %v3896_v18 = vcombine.low %v2003_v8, %v2013_v12  ;;  %v2018_v1 = vshll.u32 %v1969_v5, 16  ;;  %v1524_v21 = vor.u32 %v1523_v13, %v1520_v9  ;;  %v1533_v22 = vrot.slane %v1531_v15, 4  ;;  %v1972_v54 = vld [vmem:[#allocation2 + $0x30] sm:$0xf]  ;;  %v1973_v61 = vld [vmem:[#allocation2 + $0x34] sm:$0xf] }
  0x8d   : > { %3103 = vmatmul.mubr.bf16.gmra.mrb[28].mxu0 %v4456_v45  ;;  %v1539_v23 = vrot.slane %v1537_v17, 5  ;;  %v2024_v24 = vshll.u32 %v1970_v6, 16  ;;  %v2017_v26 = vrot.slane %v2015_v37, 4  ;;  %v2028_v29 = vshrl.u32 %v1970_v6, 16  ;;  %v1496_v45 = vld [vmem:[#allocation2 + $0x18] sm:$0xf] }
  0x8e   : > { %3240 = vmatprep.mubr.bf16.mxu0 %v3880_v39  ;;  %3337 = vmatprep.mubr.bf16.mxu1 %v3896_v18  ;;  %v2020_v27 = vrot.slane %v2018_v1, 5  ;;  %v2034_v31 = vshll.u32 %v1971_v11, 16  ;;  %v1525_v59 = vrot.slane %v1524_v21, 4  ;;  %v1534_v32 = vor.u32 %v1533_v22, %v1529_v35  ;;  %v1974_v5 = vld [vmem:[#allocation2 + $0x38] sm:$0x1]  ;;  %v4464_v10 = vld [vmem:[%s5458_s3 + $0x210] sm:$0xff]  }
  0x8f   : > { %v2026_v34 = vrot.slane %v2024_v24, 5  ;;  %v3873_v38 = vrot.slane %v1752_v19, 9  ;;  %v2030_v42 = vrot.slane %v2028_v29, 4  ;;  %v1806_v46 = vrot.slane %v1753_v25, 5  ;;  %v4461_v12 = vld [vmem:[#allocation2 + $0x24] sm:$0xff]   ;;  %v5121_v22 = vld [vmem:[%s5458_s3 + $0x218] sm:$0xff]  }
  0x90   : > { %v2021_v41 = vor.u32 %v2020_v27, %v2017_v26  ;;  %v2036_v44 = vrot.slane %v2034_v31, 5  ;;  %v1530_v40 = vsel %vm4847_vm14, %v1525_v59, %v1529_v35  ;;  %v1535_v48 = vrot.slane %v1534_v32, 4  ;;  %v1755_v18 = vld [vmem:[#allocation2 + $0x24] sm:$0xe]  ;;  %v1757_v21 = vld [vmem:[#allocation2 + $0x2c] sm:$0x1] }
  0x91   : > { %v1809_v30 = vrot.slane %v1754_v16, 5  ;;  %v2031_v51 = vor.u32 %v2030_v42, %v2026_v34  ;;  %v1807_v33 = vsel %vm4818_vm13, %v3873_v38, %v1806_v46  ;;  %v1808_v52 = vrot.slane %v1806_v46, 4  ;;  %v1499_v38 = vld [vmem:[#allocation2 + $0x24] sm:$0xf] }
  0x92   : > { %v2022_v50 = vrot.slane %v2021_v41, 4  ;;  %v1540_v56 = vsel %vm4847_vm14, %v1535_v48, %v1539_v23  ;;  %v1542_v57 = vshrl.u32 %v1496_v45, 16  ;;  %v1545_v58 = vshll.u32 %v1496_v45, 16 }
  0x93   : > { %3338 = vmatmul.mubr.bf16.vlgmr.msra.gmra.mrb[32].mxu1 %v4459_v20  ;;  %v1551_v60 = vshll.u32 %v1497_v49, 16  ;;  %v3864_v36 = vcombine.low %v1530_v40, %v1540_v56  ;;  %v2032_v3 = vrot.slane %v2031_v51, 4  ;;  %v1810_v4 = vsel %vm4818_vm13, %v1808_v52, %v1809_v30  ;;  %v1756_v20 = vld [vmem:[#allocation2 + $0x28] sm:$0xf]  ;;  %v5133_v51 = vld [vmem:[%s5458_s3 + $0x220] sm:$0xff]  }
  0x94   : > { %4330 = vmatpush3.bf16.msra.mxu1 %v5079_v43  ;;  %v2027_v63 = vsel %vm4847_vm14, %v2022_v50, %v2026_v34  ;;  %v3881_v6 = vcombine.low %v1807_v33, %v1810_v4  ;;  %v1544_v8 = vrot.slane %v1542_v57, 4  ;;  %v1547_v39 = vrot.slane %v1545_v58, 5  ;;  %v1500_v40 = vld [vmem:[#allocation2 + $0x28] sm:$0xf]  ;;  %v1501_v50 = vld [vmem:[#allocation2 + $0x2c] sm:$0x1] }
  0x95   : > { %4323 = vmatprep.subr.bf16.mxu1 %v5098_v47  ;;  %v1553_v9 = vrot.slane %v1551_v60, 5  ;;  %3241 = vmatmul.mubr.bf16.vlgmr.msra.gmra.mrb[32].mxu0 %v3864_v36  ;;  %v2037_v11 = vsel %vm4847_vm14, %v2032_v3, %v2036_v44  ;;  %v1555_v13 = vshrl.u32 %v1497_v49, 16  ;;  %v1561_v15 = vshll.u32 %v1498_v53, 16  ;;  %v1976_v4 = vld [vmem:[#allocation2 + $0x40] sm:$0xf] }
  0x96   : > { %v2039_v17 = vshrl.u32 %v1972_v54, 16  ;;  %4291 = vmatpush3.bf16.msra.mxu0 %v5079_v43  ;;  %v3897_v35 = vcombine.low %v2027_v63, %v2037_v11  ;;  %3248 = vmatprep.mubr.bf16.mxu0 %v3881_v6  ;;  %v1548_v37 = vor.u32 %v1547_v39, %v1544_v8  ;;  %v2042_v1 = vshll.u32 %v1972_v54, 16  ;;  %v1975_v54 = vld [vmem:[#allocation2 + $0x3c] sm:$0xf]  ;;  %v4463_v8 = vld [vmem:[#allocation2 + $0x30] sm:$0xff]  }
  0x97   : > { %v2048_v19 = vshll.u32 %v1973_v61, 16  ;;  %4292 = vmatprep.subr.bf16.mxu0 %v5098_v47  ;;  %v1557_v23 = vrot.slane %v1555_v13, 4  ;;  %v1563_v24 = vrot.slane %v1561_v15, 5  ;;  %v2052_v26 = vshrl.u32 %v1973_v61, 16 }
  0x98   : > { %v2041_v25 = vrot.slane %v2039_v17, 4  ;;  %4331 = vmatpush3.bf16.msra.mxu1 %v5098_v47  ;;  %3345 = vmatprep.mubr.bf16.mxu1 %v3897_v35  ;;  %v1549_v43 = vrot.slane %v1548_v37, 4  ;;  %v2044_v27 = vrot.slane %v2042_v1, 5  ;;  %v2058_v31 = vshll.u32 %v1974_v5, 16  ;;  %v1977_v5 = vld [vmem:[#allocation2 + $0x44] sm:$0x1] }
  0x99   : > { %v2050_v29 = vrot.slane %v2048_v19, 5  ;;  %4324 = vmatprep.subr.bf16.mxu1 %v4464_v10  ;;  %v1558_v16 = vor.u32 %v1557_v23, %v1553_v9  ;;  %v2054_v59 = vrot.slane %v2052_v26, 4  ;;  %v3874_v32 = vrot.slane %v1755_v18, 9  ;;  %v5150_v18 = vld [vmem:[%s5458_s3 + $0x228] sm:$0xff]   ;;  %v1760_v26 = vld [vmem:[#allocation2 + $0x38] sm:$0x1] }
  0x9a   : > { %v1813_v34 = vrot.slane %v1756_v20, 5  ;;  %v1554_v41 = vsel %vm4847_vm14, %v1549_v43, %v1553_v9  ;;  %4293 = vmatpush3.bf16.msra.mxu0 %v5098_v47  ;;  %v2045_v42 = vor.u32 %v2044_v27, %v2041_v25  ;;  %v2060_v44 = vrot.slane %v2058_v31, 5  ;;  %v1759_v20 = vld [vmem:[#allocation2 + $0x34] sm:$0xf] }
  0x9b   : > { %3346 = vmatmul.mubr.bf16.gmra.mrb[36].mxu1 %v4461_v12  ;;  %v1816_v46 = vrot.slane %v1757_v21, 5  ;;  %v1559_v48 = vrot.slane %v1558_v16, 4  ;;  %v2055_v30 = vor.u32 %v2054_v59, %v2050_v29  ;;  %4294 = vmatprep.subr.bf16.mxu0 %v4464_v10  ;;  %v1566_v47 = vshrl.u32 %v1499_v38, 16  ;;  %v1758_v12 = vld [vmem:[#allocation2 + $0x30] sm:$0xe] }
  0x9c   : > { %v1814_v45 = vsel %vm4818_vm13, %v3874_v32, %v1813_v34  ;;  %v1815_v49 = vrot.slane %v1813_v34, 4  ;;  %4332 = vmatpush3.bf16.msra.mxu1 %v4464_v10  ;;  %v2046_v33 = vrot.slane %v2045_v42, 4  ;;  %v1569_v52 = vshll.u32 %v1499_v38, 16  ;;  %v1502_v16 = vld [vmem:[#allocation2 + $0x30] sm:$0xf] }
  0x9d   : > { %v1575_v53 = vshll.u32 %v1500_v40, 16  ;;  %4325 = vmatprep.subr.bf16.mxu1 %v5121_v22  ;;  %v1564_v56 = vsel %vm4847_vm14, %v1559_v48, %v1563_v24  ;;  %v2056_v57 = vrot.slane %v2055_v30, 4  ;;  %v1579_v60 = vshrl.u32 %v1500_v40, 16  ;;  %v1504_v40 = vld [vmem:[#allocation2 + $0x38] sm:$0x1]  ;;  %v4472_v48 = vld [vmem:[%s5458_s3 + $0x230] sm:$0xff]  }
  0x9e   : > { %v1817_v58 = vsel %vm4818_vm13, %v1815_v49, %v1816_v46  ;;  %v3865_v61 = vcombine.low %v1554_v41, %v1564_v56  ;;  %v2051_v36 = vsel %vm4847_vm14, %v2046_v33, %v2050_v29  ;;  %v1568_v3 = vrot.slane %v1566_v47, 4  ;;  %4295 = vmatpush3.bf16.msra.mxu0 %v4464_v10  ;;  %v1503_v41 = vld [vmem:[#allocation2 + $0x34] sm:$0xf]  ;;  %v1978_v33 = vld [vmem:[#allocation2 + $0x48] sm:$0xf] }
  0x9f   : > { %v3882_v63 = vcombine.low %v1814_v45, %v1817_v58  ;;  %v2061_v6 = vsel %vm4847_vm14, %v2056_v57, %v2060_v44  ;;  %v1571_v39 = vrot.slane %v1569_v52, 5  ;;  %v1577_v9 = vrot.slane %v1575_v53, 5  ;;  %4296 = vmatprep.subr.bf16.mxu0 %v5121_v22  ;;  %v4465_v52 = vld [vmem:[#allocation2 + $0x3c] sm:$0xff]   ;;  %v1979_v57 = vld [vmem:[#allocation2 + $0x4c] sm:$0xf] }
  0xa0   : > { %v1581_v11 = vrot.slane %v1579_v60, 4  ;;  %4333 = vmatpush3.bf16.msra.mxu1 %v5121_v22  ;;  %3249 = vmatmul.mubr.bf16.gmra.mrb[36].mxu0 %v3865_v61  ;;  %v3898_v13 = vcombine.low %v2051_v36, %v2061_v6  ;;  %v1585_v15 = vshll.u32 %v1501_v50, 16  ;;  %v2063_v17 = vshrl.u32 %v1975_v54, 16  ;;  %v5177_v58 = vld [vmem:[%s5458_s3 + $0x238] sm:$0xff]  }
  0xa1   : > { %v2066_v10 = vshll.u32 %v1975_v54, 16  ;;  %4326 = vmatprep.subr.bf16.mxu1 %v5133_v51  ;;  %3256 = vmatprep.mubr.bf16.mxu0 %v3882_v63  ;;  %v1572_v35 = vor.u32 %v1571_v39, %v1568_v3  ;;  %v2072_v1 = vshll.u32 %v1976_v4, 16  ;;  %v2076_v19 = vshrl.u32 %v1976_v4, 16  ;;  %v1980_v63 = vld [vmem:[#allocation2 + $0x50] sm:$0x1] }
  0xa2   : > { %v1582_v37 = vor.u32 %v1581_v11, %v1577_v9  ;;  %3353 = vmatprep.mubr.bf16.mxu1 %v3898_v13  ;;  %v1587_v21 = vrot.slane %v1585_v15, 5  ;;  %v2065_v23 = vrot.slane %v2063_v17, 4  ;;  %v2082_v25 = vshll.u32 %v1977_v5, 16  ;;  %4297 = vmatpush3.bf16.msra.mxu0 %v5121_v22  ;;  %v1761_v3 = vld [vmem:[#allocation2 + $0x3c] sm:$0xe] }
  0xa3   : > { %v2068_v24 = vrot.slane %v2066_v10, 5  ;;  %3354 = vmatmul.mubr.bf16.gmra.mrb[40].mxu1 %v4463_v8  ;;  %v1573_v43 = vrot.slane %v1572_v35, 4  ;;  %v2074_v29 = vrot.slane %v2072_v1, 5  ;;  %v2078_v31 = vrot.slane %v2076_v19, 4  ;;  %4298 = vmatprep.subr.bf16.mxu0 %v5133_v51  ;;  %v1762_v13 = vld [vmem:[#allocation2 + $0x40] sm:$0xf] }
  0xa4   : > { %v1583_v27 = vrot.slane %v1582_v37, 4  ;;  %v2084_v32 = vrot.slane %v2082_v25, 5  ;;  %v3875_v34 = vrot.slane %v1758_v12, 9  ;;  %v1820_v38 = vrot.slane %v1759_v20, 5  ;;  %4334 = vmatpush3.bf16.msra.mxu1 %v5133_v51  ;;  %v1763_v37 = vld [vmem:[#allocation2 + $0x44] sm:$0x1] }
  0xa5   : > { %v2069_v59 = vor.u32 %v2068_v24, %v2065_v23  ;;  %v1578_v42 = vsel %vm4847_vm14, %v1573_v43, %v1577_v9  ;;  %v2079_v44 = vor.u32 %v2078_v31, %v2074_v29  ;;  %v1823_v46 = vrot.slane %v1760_v26, 5  ;;  %4327 = vmatprep.subr.bf16.mxu1 %v5150_v18  ;;  %v1505_v23 = vld [vmem:[#allocation2 + $0x3c] sm:$0xf] }
  0xa6   : > { %v1588_v22 = vsel %vm4847_vm14, %v1583_v27, %v1587_v21  ;;  %v1821_v49 = vsel %vm4818_vm13, %v3875_v34, %v1820_v38  ;;  %v1822_v50 = vrot.slane %v1820_v38, 4  ;;  %4299 = vmatpush3.bf16.msra.mxu0 %v5133_v51  ;;  %v1590_v53 = vshrl.u32 %v1502_v16, 16  ;;  %v1507_v38 = vld [vmem:[#allocation2 + $0x44] sm:$0x1] }
  0xa7   : > { %v3866_v30 = vcombine.low %v1578_v42, %v1588_v22  ;;  %v2070_v45 = vrot.slane %v2069_v59, 4  ;;  %v2080_v47 = vrot.slane %v2079_v44, 4  ;;  %v1593_v54 = vshll.u32 %v1502_v16, 16  ;;  %4300 = vmatprep.subr.bf16.mxu0 %v5150_v18  ;;  %v1506_v16 = vld [vmem:[#allocation2 + $0x40] sm:$0xf] }
  0xa8   : > { %v1599_v56 = vshll.u32 %v1503_v41, 16  ;;  %v1824_v51 = vsel %vm4818_vm13, %v1822_v50, %v1823_v46  ;;  %v1603_v61 = vshrl.u32 %v1503_v41, 16  ;;  %v1609_v36 = vshll.u32 %v1504_v40, 16  ;;  %4335 = vmatpush3.bf16.msra.mxu1 %v5150_v18  ;;  %v1981_v40 = vld [vmem:[#allocation2 + $0x54] sm:$0xf] }
  0xa9   : > { %3257 = vmatmul.mubr.bf16.gmra.mrb[40].mxu0 %v3866_v30  ;;  %v2075_v60 = vsel %vm4847_vm14, %v2070_v45, %v2074_v29  ;;  %v2085_v4 = vsel %vm4847_vm14, %v2080_v47, %v2084_v32  ;;  %v3883_v5 = vcombine.low %v1821_v49, %v1824_v51  ;;  %v1592_v6 = vrot.slane %v1590_v53, 4  ;;  %4328 = vmatprep.subr.bf16.mxu1 %v4472_v48  ;;  %v1982_v50 = vld [vmem:[#allocation2 + $0x58] sm:$0xf] }
  0xaa   : > { %v1595_v8 = vrot.slane %v1593_v54, 5  ;;  %v3899_v39 = vcombine.low %v2075_v60, %v2085_v4  ;;  %v1601_v9 = vrot.slane %v1599_v56, 5  ;;  %v1605_v11 = vrot.slane %v1603_v61, 4  ;;  %4301 = vmatpush3.bf16.msra.mxu0 %v5150_v18  ;;  %v1983_v54 = vld [vmem:[#allocation2 + $0x5c] sm:$0x1] }
  0xab   : > { %v1611_v12 = vrot.slane %v1609_v36, 5  ;;  %3264 = vmatprep.mubr.bf16.mxu0 %v3883_v5  ;;  %v2087_v17 = vshrl.u32 %v1978_v33, 16  ;;  %v2090_v10 = vshll.u32 %v1978_v33, 16  ;;  %v2096_v35 = vshll.u32 %v1979_v57, 16  ;;  %4302 = vmatprep.subr.bf16.mxu0 %v4472_v48  ;;  %v4467_v36 = vld [vmem:[#allocation2 + $0x48] sm:$0xff]  }
  0xac   : > { %v1596_v15 = vor.u32 %v1595_v8, %v1592_v6  ;;  %3361 = vmatprep.mubr.bf16.mxu1 %v3899_v39  ;;  %v1606_v1 = vor.u32 %v1605_v11, %v1601_v9  ;;  %v2100_v19 = vshrl.u32 %v1979_v57, 16  ;;  %v2106_v20 = vshll.u32 %v1980_v63, 16  ;;  %4336 = vmatpush3.bf16.msra.mxu1 %v4472_v48  ;;  %v1764_v5 = vld [vmem:[#allocation2 + $0x48] sm:$0xe] }
  0xad   : > { %v3876_v21 = vrot.slane %v1761_v3, 9  ;;  %3362 = vmatmul.mubr.bf16.gmra.mrb[44].mxu1 %v4465_v52  ;;  %v2089_v25 = vrot.slane %v2087_v17, 4  ;;  %v2092_v18 = vrot.slane %v2090_v10, 5  ;;  %v2098_v26 = vrot.slane %v2096_v35, 5  ;;  %4329 = vmatprep.subr.bf16.mxu1 %v5177_v58  ;;  %v1766_v17 = vld [vmem:[#allocation2 + $0x50] sm:$0x1] }
  0xae   : > { %v1597_v24 = vrot.slane %v1596_v15, 4  ;;  %v1607_v43 = vrot.slane %v1606_v1, 4  ;;  %v2102_v27 = vrot.slane %v2100_v19, 4  ;;  %v2108_v29 = vrot.slane %v2106_v20, 5  ;;  %4303 = vmatpush3.bf16.msra.mxu0 %v4472_v48  ;;  %v1508_v19 = vld [vmem:[#allocation2 + $0x48] sm:$0xf] }
  0xaf   : > { %v1827_v31 = vrot.slane %v1762_v13, 5  ;;  %v2093_v32 = vor.u32 %v2092_v18, %v2089_v25  ;;  %v1830_v34 = vrot.slane %v1763_v37, 5  ;;  %v1614_v41 = vshrl.u32 %v1505_v23, 16  ;;  %4304 = vmatprep.subr.bf16.mxu0 %v5177_v58  ;;  %v1509_v25 = vld [vmem:[#allocation2 + $0x4c] sm:$0xf] }
  0xb0   : > { %v1602_v59 = vsel %vm4847_vm14, %v1597_v24, %v1601_v9  ;;  %v1612_v42 = vsel %vm4847_vm14, %v1607_v43, %v1611_v12  ;;  %v2103_v22 = vor.u32 %v2102_v27, %v2098_v26  ;;  %4337 = vmatpush3.bf16.msra.mxu1 %v5177_v58  ;;  %v1617_v49 = vshll.u32 %v1505_v23, 16  ;;  %v1765_v9 = vld [vmem:[#allocation2 + $0x4c] sm:$0xf] }
  0xb1   : > { %v1828_v44 = vsel %vm4818_vm13, %v3876_v21, %v1827_v31  ;;  %v1829_v46 = vrot.slane %v1827_v31, 4  ;;  %v3867_v48 = vcombine.low %v1602_v59, %v1612_v42  ;;  %v2094_v30 = vrot.slane %v2093_v32, 4  ;;  %v1510_v32 = vld [vmem:[#allocation2 + $0x50] sm:$0x1] }
  0xb2   : > { %v1616_v45 = vrot.slane %v1614_v41, 4  ;;  %v2104_v33 = vrot.slane %v2103_v22, 4  ;;  %v1623_v52 = vshll.u32 %v1506_v16, 16  ;;  %v1627_v53 = vshrl.u32 %v1506_v16, 16  ;;  %4305 = vmatpush3.bf16.msra.mxu0 %v5177_v58 }
  0xb3   : > { %v1831_v47 = vsel %vm4818_vm13, %v1829_v46, %v1830_v34  ;;  %3265 = vmatmul.mubr.bf16.gmra.mrb[44].mxu0 %v3867_v48  ;;  %v2099_v56 = vsel %vm4847_vm14, %v2094_v30, %v2098_v26  ;;  %v1619_v60 = vrot.slane %v1617_v49, 5  ;;  %v1633_v51 = vshll.u32 %v1507_v38, 16  ;;  %v875_v34 = vld [vmem:[#allocation2 + $0x68] sm:$0x1] }
  0xb4   : > { %v3884_v57 = vcombine.low %v1828_v44, %v1831_v47  ;;  %v2109_v61 = vsel %vm4847_vm14, %v2104_v33, %v2108_v29  ;;  %v1625_v63 = vrot.slane %v1623_v52, 5  ;;  %v1629_v3 = vrot.slane %v1627_v53, 4  ;;  %v1984_v44 = vld [vmem:[#allocation2 + $0x60] sm:$0xf]  ;;  %v1985_v47 = vld [vmem:[#allocation2 + $0x64] sm:$0xf] }
  0xb5   : > { %v2111_v4 = vshrl.u32 %v1981_v40, 16  ;;  %v3900_v6 = vcombine.low %v2099_v56, %v2109_v61  ;;  %v1620_v8 = vor.u32 %v1619_v60, %v1616_v45  ;;  %v1635_v39 = vrot.slane %v1633_v51, 5  ;;  %v4469_v53 = vld [vmem:[#allocation2 + $0x54] sm:$0xff]  }
  0xb6   : > { %3272 = vmatprep.mubr.bf16.mxu0 %v3884_v57  ;;  %v2114_v58 = vshll.u32 %v1981_v40, 16  ;;  %v1630_v11 = vor.u32 %v1629_v3, %v1625_v63  ;;  %v2120_v13 = vshll.u32 %v1982_v50, 16  ;;  %v2124_v15 = vshrl.u32 %v1982_v50, 16  ;;  %v1767_v60 = vld [vmem:[#allocation2 + $0x54] sm:$0xe] }
  0xb7   : > { %v2113_v12 = vrot.slane %v2111_v4, 4  ;;  %3369 = vmatprep.mubr.bf16.mxu1 %v3900_v6  ;;  %v1621_v10 = vrot.slane %v1620_v8, 4  ;;  %v2130_v37 = vshll.u32 %v1983_v54, 16  ;;  %v3877_v1 = vrot.slane %v1764_v5, 9  ;;  %v1768_v3 = vld [vmem:[#allocation2 + $0x58] sm:$0xf] }
  0xb8   : > { %v2116_v35 = vrot.slane %v2114_v58, 5  ;;  %3370 = vmatmul.mubr.bf16.gmra.mrb[48].mxu1 %v4467_v36  ;;  %v1631_v20 = vrot.slane %v1630_v11, 4  ;;  %v2122_v21 = vrot.slane %v2120_v13, 5  ;;  %v2126_v23 = vrot.slane %v2124_v15, 4  ;;  %v1769_v4 = vld [vmem:[#allocation2 + $0x5c] sm:$0x1] }
  0xb9   : > { %v1834_v24 = vrot.slane %v1765_v9, 5  ;;  %v1626_v18 = vsel %vm4847_vm14, %v1621_v10, %v1625_v63  ;;  %v2132_v43 = vrot.slane %v2130_v37, 5  ;;  %v1837_v27 = vrot.slane %v1766_v17, 5  ;;  %v1511_v58 = vld [vmem:[#allocation2 + $0x54] sm:$0xf] }
  0xba   : > { %v2117_v26 = vor.u32 %v2116_v35, %v2113_v12  ;;  %v1636_v29 = vsel %vm4847_vm14, %v1631_v20, %v1635_v39  ;;  %v2127_v31 = vor.u32 %v2126_v23, %v2122_v21  ;;  %v1638_v42 = vshrl.u32 %v1508_v19, 16  ;;  %v1512_v10 = vld [vmem:[#allocation2 + $0x58] sm:$0xf] }
  0xbb   : > { %v1835_v16 = vsel %vm4818_vm13, %v3877_v1, %v1834_v24  ;;  %v1836_v59 = vrot.slane %v1834_v24, 4  ;;  %v3868_v38 = vcombine.low %v1626_v18, %v1636_v29  ;;  %v1641_v22 = vshll.u32 %v1508_v19, 16  ;;  %v1513_v19 = vld [vmem:[#allocation2 + $0x5c] sm:$0x1]  ;;  %v570_v29 = vld [vmem:[%s444_s9] sm:$0xff] }
  0xbc   : > { %v2118_v41 = vrot.slane %v2117_v26, 4  ;;  %v2128_v46 = vrot.slane %v2127_v31, 4  ;;  %v1647_v48 = vshll.u32 %v1509_v25, 16  ;;  %v1651_v30 = vshrl.u32 %v1509_v25, 16 }
  0xbd   : > { %v1838_v40 = vsel %vm4818_vm13, %v1836_v59, %v1837_v27  ;;  %3273 = vmatmul.mubr.bf16.gmra.mrb[48].mxu0 %v3868_v38  ;;  %v1640_v50 = vrot.slane %v1638_v42, 4  ;;  %v1643_v33 = vrot.slane %v1641_v22, 5  ;;  %v1657_v57 = vshll.u32 %v1510_v32, 16  ;;  %v1770_v38 = vld [vmem:[#allocation2 + $0x60] sm:$0xe] }
  0xbe   : > { %v2123_v45 = vsel %vm4847_vm14, %v2118_v41, %v2122_v21  ;;  %v3885_v49 = vcombine.low %v1835_v16, %v1838_v40  ;;  %v2133_v52 = vsel %vm4847_vm14, %v2128_v46, %v2132_v43  ;;  %v1649_v54 = vrot.slane %v1647_v48, 5 }
  0xbf   : > { %v1653_v56 = vrot.slane %v1651_v30, 4  ;;  %v3901_v51 = vcombine.low %v2123_v45, %v2133_v52  ;;  %v1644_v61 = vor.u32 %v1643_v33, %v1640_v50  ;;  %v876_v36 = vsel %vm4762_vm6, %v791_v0, %v875_v34  ;;  %v571_v34 = vld [vmem:[%s444_s9 + $0x8] sm:$0xff]  ;;  %v4477_v33 = vld [vmem:[%s5459_s4] ss:$0 sm:$0xff] }
  0xc0   : > { %3280 = vmatprep.mubr.bf16.mxu0 %v3885_v49  ;;  %v2135_v63 = vshrl.u32 %v1984_v44, 16  ;;  %v1659_v6 = vrot.slane %v1657_v57, 5  ;;  %877 = vst [vmem:[#allocation2 + $0x68] sm:$0x1] %v876_v36  ;;  %v2138_v8 = vshll.u32 %v1984_v44, 16  ;;  %v2144_v39 = vshll.u32 %v1985_v47, 16 }
  0xc1   : > { %v1654_v5 = vor.u32 %v1653_v56, %v1649_v54  ;;  %3377 = vmatprep.mubr.bf16.mxu1 %v3901_v51  ;;  %v1645_v9 = vrot.slane %v1644_v61, 4  ;;  %v2148_v12 = vshrl.u32 %v1985_v47, 16  ;;  %v3878_v13 = vrot.slane %v1767_v60, 9  ;;  %v4478_v36 = vld [vmem:[%s5460_s5] ss:$0 sm:$0xff] }
  0xc2   : > { %v2137_v11 = vrot.slane %v2135_v63, 4  ;;  %3378 = vmatmul.mubr.bf16.gmra.mrb[52].mxu1 %v4469_v53  ;;  %v2140_v0 = vrot.slane %v2138_v8, 5  ;;  %v2146_v15 = vrot.slane %v2144_v39, 5  ;;  %v1841_v17 = vrot.slane %v1768_v3, 5  ;;  %v1771_v53 = vld [vmem:[#allocation2 + $0x64] sm:$0xf] }
  0xc3   : > { %v1655_v55 = vrot.slane %v1654_v5, 4  ;;  %v1650_v35 = vsel %vm4847_vm14, %v1645_v9, %v1649_v54  ;;  %v2150_v37 = vrot.slane %v2148_v12, 4  ;;  %v1844_v1 = vrot.slane %v1769_v4, 5  ;;  %v1514_v5 = vld [vmem:[#allocation2 + $0x60] sm:$0xf] }
  0xc4   : > { %v1662_v20 = vshrl.u32 %v1511_v58, 16  ;;  %v2141_v23 = vor.u32 %v2140_v0, %v2137_v11  ;;  %v1842_v24 = vsel %vm4818_vm13, %v3878_v13, %v1841_v17  ;;  %v1843_v25 = vrot.slane %v1841_v17, 4  ;;  %v4471_v8 = vld [vmem:[#allocation2 + $0x60] sm:$0xff]  }
  0xc5   : > { %v1660_v21 = vsel %vm4847_vm14, %v1655_v55, %v1659_v6  ;;  %v2151_v26 = vor.u32 %v2150_v37, %v2146_v15  ;;  %v1665_v27 = vshll.u32 %v1511_v58, 16  ;;  %v1671_v59 = vshll.u32 %v1512_v10, 16  ;;  %v1515_v11 = vld [vmem:[#allocation2 + $0x64] sm:$0xf] }
  0xc6   : > { %v3869_v18 = vcombine.low %v1650_v35, %v1660_v21  ;;  %v1664_v43 = vrot.slane %v1662_v20, 4  ;;  %v2142_v31 = vrot.slane %v2141_v23, 4  ;;  %v1845_v16 = vsel %vm4818_vm13, %v1843_v25, %v1844_v1 }
  0xc7   : > { %v1675_v32 = vshrl.u32 %v1512_v10, 16  ;;  %v1986_v41 = vld [vmem:[#allocation2 + $0x68] sm:$0x1]  ;;  %v2152_v42 = vrot.slane %v2151_v26, 4  ;;  %v3886_v22 = vcombine.low %v1842_v24, %v1845_v16  ;;  %v1667_v44 = vrot.slane %v1665_v27, 5 }
  0xc8   : > { %3281 = vmatmul.mubr.bf16.gmra.mrb[52].mxu0 %v3869_v18  ;;  %v1681_v46 = vshll.u32 %v1513_v19, 16  ;;  %v2147_v40 = vsel %vm4847_vm14, %v2142_v31, %v2146_v15  ;;  %v2154_v48 = vshll.u32 %v1986_v41, 16  ;;  %v1673_v30 = vrot.slane %v1671_v59, 5  ;;  %v1772_v54 = vld [vmem:[#allocation2 + $0x68] sm:$0x1] }
  0xc9   : > { %v1677_v45 = vrot.slane %v1675_v32, 4  ;;  %3288 = vmatprep.mubr.bf16.mxu0 %v3886_v22  ;;  %v1668_v49 = vor.u32 %v1667_v44, %v1664_v43  ;;  %v572_v47 = vmul.f32 %v4477_v33, %v570_v29  ;;  %v573_v52 = vmul.f32 %v4477_v33, %v571_v34  ;;  %v1516_v15 = vld [vmem:[#allocation2 + $0x68] sm:$0x1]  ;;  %v2222_v33 = vld [vmem:[#allocation2 + $0x18] sm:$0xe] }
  0xca   : > { %v1683_v50 = vrot.slane %v1681_v46, 5  ;;  %v2156_v56 = vrot.slane %v2154_v48, 5  ;;  %v580_v60 = vstv %s5244_s10  ;;  %v3879_v51 = vrot.slane %v1770_v38, 9 }
  0xcb   : > { %v1678_v57 = vor.u32 %v1677_v45, %v1673_v30  ;;  %v1669_v61 = vrot.slane %v1668_v49, 4  ;;  %v574_v63 = vadd.f32 %v4478_v36, %v572_v47  ;;  %v575_v3 = vadd.f32 %v4478_v36, %v573_v52  ;;  %v940_v45 = vld [vmem:[#allocation2 + $0x74] sm:$0x1]  ;;  %v2227_v36 = vld [vmem:[#allocation2 + $0x2c] sm:$0x1] }
  0xcc   : > { %vm5257_vm15 = vcmp.eq.s32.totalorder %v580_v60, 1  ;;  %v2157_v6 = vsel %vm4847_vm14, %v2152_v42, %v2156_v56  ;;  %v1848_v58 = vrot.slane %v1771_v53, 5  ;;  %v1851_v9 = vrot.slane %v1772_v54, 5  ;;  %v2223_v56 = vld [vmem:[#allocation2 + $0x1c] sm:$0xf] }
  0xcd   : > { %v1679_v39 = vrot.slane %v1678_v57, 4  ;;  %v3902_v12 = vcombine.low %v2147_v40, %v2157_v6  ;;  %v1674_v13 = vsel %vm4847_vm14, %v1669_v61, %v1673_v30  ;;  %v576_v55 = vmax.f32 %v574_v63, 0.0  ;;  %v936_v30 = vld [vmem:[#allocation2 + $0x6c] sm:$0xf]  ;;  %v2224_v57 = vld [vmem:[#allocation2 + $0x20] sm:$0x1] }
  0xce   : > { %v577_v0 = vmax.f32 %v575_v3, 0.0  ;;  %v1849_v10 = vsel %vm4818_vm13, %v3879_v51, %v1848_v58  ;;  %v1850_v35 = vrot.slane %v1848_v58, 4  ;;  %v1686_v37 = vshrl.u32 %v1514_v5, 16  ;;  %v2225_v51 = vld [vmem:[#allocation2 + $0x24] sm:$0xe] }
  0xcf   : > { %v1684_v17 = vsel %vm4847_vm14, %v1679_v39, %v1683_v50  ;;  %3385 = vmatprep.mubr.bf16.mxu1 %v3902_v12  ;;  %v1689_v20 = vshll.u32 %v1514_v5, 16  ;;  %v1695_v21 = vshll.u32 %v1515_v11, 16  ;;  %v1699_v25 = vshrl.u32 %v1515_v11, 16  ;;  %v2226_v61 = vld [vmem:[#allocation2 + $0x28] sm:$0xf] }
  0xd0   : > { %v3870_v1 = vcombine.low %v1674_v13, %v1684_v17  ;;  %v578_v19 = vpack.c.bf16 %v577_v0, %v576_v55  ;;  %3386 = vmatmul.mubr.bf16.gmra.mrb[56].mxu1 %v4471_v8  ;;  %v1852_v23 = vsel %vm4818_vm13, %v1850_v35, %v1851_v9  ;;  %v1688_v24 = vrot.slane %v1686_v37, 4  ;;  %v2235_v6 = vld [vmem:[#allocation2 + $0x4c] sm:$0xf]  ;;  %v2228_v9 = vld [vmem:[#allocation2 + $0x30] sm:$0xe] }
  0xd1   : > { %v1705_v18 = vshll.u32 %v1516_v15, 16  ;;  %v3887_v43 = vcombine.low %v1849_v10, %v1852_v23  ;;  %v1691_v27 = vrot.slane %v1689_v20, 5  ;;  %v1697_v29 = vrot.slane %v1695_v21, 5  ;;  %v2229_v13 = vld [vmem:[#allocation2 + $0x34] sm:$0xf] }
  0xd2   : > { %3289 = vmatmul.mubr.bf16.gmra.mrb[56].mxu0 %v3870_v1  ;;  %v582_v26 = vsel %vm5257_vm15, %v578_v19, 0  ;;  %v1701_v59 = vrot.slane %v1699_v25, 4  ;;  %v3904_v8 = vrot.slane %v2222_v33, 9  ;;  %v2272_v39 = vrot.slane %v2223_v56, 5  ;;  %v2234_v55 = vld [vmem:[#allocation2 + $0x48] sm:$0xe] }
  0xd3   : > { %v3822_v31 = vcombine.low %v582_v26, %v582_v26  ;;  %v3823_v16 = vcombine.high %v582_v26, %v582_v26  ;;  %3296 = vmatprep.mubr.bf16.mxu0 %v3887_v43  ;;  %v1692_v32 = vor.u32 %v1691_v27, %v1688_v24  ;;  %v1707_v46 = vrot.slane %v1705_v18, 5  ;;  %v2230_v15 = vld [vmem:[#allocation2 + $0x38] sm:$0x1]  ;;  %v2236_v17 = vld [vmem:[#allocation2 + $0x50] sm:$0x1] }
  0xd4   : > { %v1702_v44 = vor.u32 %v1701_v59, %v1697_v29  ;;  %v2275_v58 = vrot.slane %v2224_v57, 5  ;;  %v3905_v11 = vrot.slane %v2225_v51, 9  ;;  %v2279_v12 = vrot.slane %v2226_v61, 5  ;;  %v2231_v27 = vld [vmem:[#allocation2 + $0x3c] sm:$0xe] }
  0xd5   : > { %v916_v34 = vshrl.u32 %v3822_v31, 16  ;;  %v919_v38 = vshll.u32 %v3822_v31, 16  ;;  %v924_v41 = vshrl.u32 %v3823_v16, 16  ;;  %v927_v42 = vshll.u32 %v3823_v16, 16  ;;  %v2233_v33 = vld [vmem:[#allocation2 + $0x44] sm:$0x1] }
  0xd6   : > { %v1693_v22 = vrot.slane %v1692_v32, 4  ;;  %v1703_v50 = vrot.slane %v1702_v44, 4  ;;  %v2282_v7 = vrot.slane %v2227_v36, 5  ;;  %v2300_v14 = vrot.slane %v2235_v6, 5  ;;  %v2237_v57 = vld [vmem:[#allocation2 + $0x54] sm:$0xe] }
  0xd7   : > { %v918_v40 = vrot.slane %v916_v34, 7  ;;  %v926_v48 = vrot.slane %v924_v41, 7  ;;  %v2273_v2 = vsel %vm4818_vm13, %v3904_v8, %v2272_v39  ;;  %v2274_v0 = vrot.slane %v2272_v39, 4  ;;  %v2239_v61 = vld [vmem:[#allocation2 + $0x5c] sm:$0x1] }
  0xd8   : > { %v1698_v49 = vsel %vm4847_vm14, %v1693_v22, %v1697_v29  ;;  %v1708_v60 = vsel %vm4847_vm14, %v1703_v50, %v1707_v46  ;;  %v2280_v10 = vsel %vm4818_vm13, %v3905_v11, %v2279_v12  ;;  %v2281_v35 = vrot.slane %v2279_v12, 4  ;;  %v2241_v22 = vld [vmem:[#allocation2 + $0x64] sm:$0xf] }
  0xd9   : > { %v921_v47 = vor.u32 %v919_v38, %v918_v40  ;;  %v922_v52 = vrot.slane %v918_v40, 4  ;;  %v929_v53 = vor.u32 %v927_v42, %v926_v48  ;;  %v931_v54 = vrot.slane %v926_v48, 4  ;;  %v2238_v42 = vld [vmem:[#allocation2 + $0x58] sm:$0xf]  ;;  %v2232_v40 = vld [vmem:[#allocation2 + $0x40] sm:$0xf] }
  0xda   : > { %v3871_v5 = vcombine.low %v1698_v49, %v1708_v60  ;;  %v3906_v37 = vrot.slane %v2228_v9, 9  ;;  %v2276_v1 = vsel %vm4818_vm13, %v2274_v0, %v2275_v58  ;;  %v2286_v19 = vrot.slane %v2229_v13, 5  ;;  %v2240_v58 = vld [vmem:[#allocation2 + $0x60] sm:$0xe]  ;;  %v2242_v9 = vld [vmem:[#allocation2 + $0x68] sm:$0x1] }
  0xdb   : > { %v930_v63 = vsel %vm4770_vm7, %v922_v52, %v929_v53  ;;  %v937_v3 = vsel %vm4777_vm8, %v921_v47, %v936_v30  ;;  %v941_v4 = vsel %vm4762_vm6, %v931_v54, %v940_v45  ;;  %v3908_v20 = vrot.slane %v2234_v55, 9 }
  0xdc   : > { %938 = vst [vmem:[#allocation2 + $0x6c] sm:$0xf] %v937_v3  ;;  %939 = vst [vmem:[#allocation2 + $0x70] sm:$0xf] %v930_v63  ;;  %3297 = vmatmul.mubr.bf16.gmra.mrb[60].mxu0 %v3871_v5  ;;  %v3912_v21 = vcombine.low %v2273_v2, %v2276_v1  ;;  %v2283_v23 = vsel %vm4818_vm13, %v2281_v35, %v2282_v7  ;;  %v2289_v24 = vrot.slane %v2230_v15, 5  ;;  %v2302_v25 = vrot.slane %v2300_v14, 4 }
  0xdd   : > { %942 = vst [vmem:[#allocation2 + $0x74] sm:$0x1] %v941_v4  ;;  %v2303_v18 = vrot.slane %v2236_v17, 5  ;;  %v3913_v26 = vcombine.low %v2280_v10, %v2283_v23  ;;  %v2288_v43 = vrot.slane %v2286_v19, 4  ;;  %v2287_v59 = vsel %vm4818_vm13, %v3906_v37, %v2286_v19 }
  0xde   : > { %4306 = vmatprep.mubr.bf16.mxu0 %v3912_v21  ;;  %v3907_v48 = vrot.slane %v2231_v27, 9  ;;  %v2301_v47 = vsel %vm4818_vm13, %v3908_v20, %v2300_v14  ;;  %v2293_v60 = vrot.slane %v2232_v40, 5  ;;  %v2307_v36 = vrot.slane %v2238_v42, 5 }
  0xdf   : > { %v2290_v46 = vsel %vm4818_vm13, %v2288_v43, %v2289_v24  ;;  %v2304_v51 = vsel %vm4818_vm13, %v2302_v25, %v2303_v18  ;;  %v2314_v63 = vrot.slane %v2241_v22, 5  ;;  %v2296_v3 = vrot.slane %v2233_v33, 5 }
  0xe0   : > { %v3914_v52 = vcombine.low %v2287_v59, %v2290_v46  ;;  %v2294_v6 = vsel %vm4818_vm13, %v3907_v48, %v2293_v60  ;;  %v2295_v8 = vrot.slane %v2293_v60, 4  ;;  %v3909_v39 = vrot.slane %v2237_v57, 9 }
  0xe1   : > { %v2310_v13 = vrot.slane %v2239_v61, 5  ;;  %v3916_v2 = vcombine.low %v2301_v47, %v2304_v51  ;;  %v2309_v0 = vrot.slane %v2307_v36, 4  ;;  %v3910_v17 = vrot.slane %v2240_v58, 9 }
  0xe2   : > { %v2297_v55 = vsel %vm4818_vm13, %v2295_v8, %v2296_v3  ;;  %v2316_v10 = vrot.slane %v2314_v63, 4  ;;  %v2317_v35 = vrot.slane %v2242_v9, 5  ;;  %v2308_v62 = vsel %vm4818_vm13, %v3909_v39, %v2307_v36 }
  0xe3   : > { %v1987_v29 = vld [vmem:[#allocation2 + $0x6c] sm:$0xf]  ;;  %v1988_v31 = vld [vmem:[#allocation2 + $0x70] sm:$0xf]  ;;  %v3915_v15 = vcombine.low %v2294_v6, %v2297_v55  ;;  %v2311_v1 = vsel %vm4818_vm13, %v2309_v0, %v2310_v13  ;;  %v2315_v20 = vsel %vm4818_vm13, %v3910_v17, %v2314_v63 }
  0xe4   : > { %v1989_v16 = vld [vmem:[#allocation2 + $0x74] sm:$0x1]  ;;  %v2159_v32 = vshrl.u32 %v1987_v29, 16  ;;  %v2162_v34 = vshll.u32 %v1987_v29, 16  ;;  %v2168_v38 = vshll.u32 %v1988_v31, 16  ;;  %v2172_v41 = vshrl.u32 %v1988_v31, 16  ;;  %4307 = vmatmul.mubr.bf16.vlgmr.msra.gmra.mrb[64].mxu0 %v3913_v26 }
  0xe5   : > { %v2178_v44 = vshll.u32 %v1989_v16, 16  ;;  %4310 = vmatprep.mubr.bf16.mxu0 %v3914_v52  ;;  %v4473_v7 = vld [vmem:[#allocation2 + $0x6c] sm:$0xff]   ;;  %v2318_v21 = vsel %vm4818_vm13, %v2316_v10, %v2317_v35  ;;  %v2245_v24 = vld [vmem:[#allocation2 + $0x74] sm:$0x1]  ;;  %v3917_v25 = vcombine.low %v2308_v62, %v2311_v1 }
  0xe6   : > { %v2161_v30 = vrot.slane %v2159_v32, 4  ;;  %v2164_v45 = vrot.slane %v2162_v34, 5  ;;  %v2170_v49 = vrot.slane %v2168_v38, 5  ;;  %v2174_v50 = vrot.slane %v2172_v41, 4  ;;  %v2244_v37 = vld [vmem:[#allocation2 + $0x70] sm:$0xf] }
  0xe7   : > { %v2180_v56 = vrot.slane %v2178_v44, 5  ;;  %v2321_v19 = vrot.slane %v2244_v37, 5  ;;  %v2243_v23 = vld [vmem:[#allocation2 + $0x6c] sm:$0xe]  ;;  %v3918_v18 = vcombine.low %v2315_v20, %v2318_v21  ;;  %v2324_v27 = vrot.slane %v2245_v24, 5 }
  0xe8   : > { %v2165_v53 = vor.u32 %v2164_v45, %v2161_v30  ;;  %v2175_v54 = vor.u32 %v2174_v50, %v2170_v49  ;;  %v3911_v26 = vrot.slane %v2243_v23, 9 }
  0xe9   : > { %v2323_v43 = vrot.slane %v2321_v19, 4 }
  0xea   : > { %v2166_v4 = vrot.slane %v2165_v53, 4  ;;  %v2176_v5 = vrot.slane %v2175_v54, 4  ;;  %v2322_v29 = vsel %vm4818_vm13, %v3911_v26, %v2321_v19 }
  0xeb   : > { %v2325_v31 = vsel %vm4818_vm13, %v2323_v43, %v2324_v27 }
  0xec   : > { %v2171_v11 = vsel %vm4847_vm14, %v2166_v4, %v2170_v49  ;;  %v2181_v12 = vsel %vm4847_vm14, %v2176_v5, %v2180_v56  ;;  %4311 = vmatmul.mubr.bf16.gmra.mrb[68].mxu0 %v3915_v15  ;;  %v3919_v16 = vcombine.low %v2322_v29, %v2325_v31 }
  0xed   : > { %v3903_v14 = vcombine.low %v2171_v11, %v2181_v12 }
  0xef   : > { %3393 = vmatprep.mubr.bf16.mxu1 %v3903_v14 }
  0xf0   : > { %3394 = vmatmul.mubr.bf16.gmra.mrb[60].mxu1 %v4473_v7 }
  0xf1   : > { %4314 = vmatprep.mubr.bf16.mxu1 %v3916_v2 }
  0xf8   : > { %4315 = vmatmul.mubr.bf16.vlgmr.msra.gmra.mrb[64].mxu1 %v3917_v25 }
  0xf9   : > { %4318 = vmatprep.mubr.bf16.mxu1 %v3918_v18 }
 0x100   : > { %4319 = vmatmul.mubr.bf16.gmra.mrb[68].mxu1 %v3919_v16 }
 0x115   : > { %v4098_v59 = vpop.f32.mrb[0].mxu1 }
 0x116   : > { %v4099_v32 = vpop.f32.mrb[1].mxu1 }
 0x117   : > { %v4100_v34 = vadd.f32 %v4099_v32, %v4098_v59  ;;  %v4101_v38 = vpop.f32.mrb[2].mxu1 }
 0x118   : > { %v4102_v41 = vpop.f32.mrb[3].mxu1 }
 0x119   : > { %v4103_v42 = vadd.f32 %v4102_v41, %v4101_v38 }
 0x11b   : > { %v4034_v22 = vpop.f32.mrb[0].mxu0 }
 0x11c   : > { %v4035_v44 = vpop.f32.mrb[1].mxu0 }
 0x11d   : > { %v4104_v46 = vpop.f32.mrb[4].mxu1  ;;  %v4036_v40 = vadd.f32 %v4035_v44, %v4034_v22  ;;  %v4037_v48 = vpop.f32.mrb[2].mxu0 }
 0x11e   : > { %v4105_v30 = vpop.f32.mrb[5].mxu1  ;;  %v4038_v45 = vpop.f32.mrb[3].mxu0 }
 0x11f   : > { %v4106_v49 = vadd.f32 %v4105_v30, %v4104_v46  ;;  %v4107_v50 = vpop.f32.mrb[6].mxu1  ;;  %v5319_v33 = vadd.f32 %v4100_v34, %v4036_v40  ;;  %v4039_v28 = vadd.f32 %v4038_v45, %v4037_v48 }
 0x120   : > { %v4108_v47 = vpop.f32.mrb[7].mxu1 }
 0x121   : > { %v4109_v52 = vadd.f32 %v4108_v47, %v4107_v50  ;;  %v5321_v53 = vadd.f32 %v4103_v42, %v4039_v28 }
 0x123   : > { %v4040_v54 = vpop.f32.mrb[4].mxu0 }
 0x124   : > { %v4041_v56 = vpop.f32.mrb[5].mxu0 }
 0x125   : > { %v4042_v57 = vadd.f32 %v4041_v56, %v4040_v54  ;;  %v4043_v60 = vpop.f32.mrb[6].mxu0  ;;  %v4110_v51 = vpop.f32.mrb[8].mxu1 }
 0x126   : > { %v4044_v61 = vpop.f32.mrb[7].mxu0  ;;  %v4111_v36 = vpop.f32.mrb[9].mxu1 }
 0x127   : > { %v5323_v63 = vadd.f32 %v4106_v49, %v4042_v57  ;;  %v4045_v3 = vadd.f32 %v4044_v61, %v4043_v60  ;;  %v4112_v4 = vadd.f32 %v4111_v36, %v4110_v51  ;;  %v4113_v5 = vpop.f32.mrb[10].mxu1 }
 0x128   : > { %v4114_v6 = vpop.f32.mrb[11].mxu1 }
 0x129   : > { %v5325_v8 = vadd.f32 %v4109_v52, %v4045_v3  ;;  %v4115_v39 = vadd.f32 %v4114_v6, %v4113_v5 }
 0x12b   : > { %v4046_v58 = vpop.f32.mrb[8].mxu0 }
 0x12c   : > { %v4047_v9 = vpop.f32.mrb[9].mxu0 }
 0x12d   : > { %v4048_v11 = vadd.f32 %v4047_v9, %v4046_v58  ;;  %v4049_v12 = vpop.f32.mrb[10].mxu0 }
 0x12e   : > { %v4050_v7 = vpop.f32.mrb[11].mxu0 }
 0x12f   : > { %v5327_v13 = vadd.f32 %v4112_v4, %v4048_v11  ;;  %v4051_v55 = vadd.f32 %v4050_v7, %v4049_v12  ;;  %v4116_v14 = vpop.f32.mrb[12].mxu1 }
 0x130   : > { %v4117_v0 = vpop.f32.mrb[13].mxu1 }
 0x131   : > { %v5329_v2 = vadd.f32 %v4115_v39, %v4051_v55  ;;  %v4118_v15 = vadd.f32 %v4117_v0, %v4116_v14  ;;  %v4119_v17 = vpop.f32.mrb[14].mxu1 }
 0x132   : > { %v4120_v35 = vpop.f32.mrb[15].mxu1 }
 0x133   : > { %v4052_v10 = vpop.f32.mrb[12].mxu0  ;;  %v4121_v62 = vadd.f32 %v4120_v35, %v4119_v17 }
 0x134   : > { %v4053_v37 = vpop.f32.mrb[13].mxu0 }
 0x135   : > { %v4054_v1 = vadd.f32 %v4053_v37, %v4052_v10  ;;  %v4055_v19 = vpop.f32.mrb[14].mxu0 }
 0x136   : > { %v4056_v20 = vpop.f32.mrb[15].mxu0 }
 0x137   : > { %v5331_v21 = vadd.f32 %v4118_v15, %v4054_v1  ;;  %v4057_v23 = vadd.f32 %v4056_v20, %v4055_v19 }
 0x139   : > { %v5333_v24 = vadd.f32 %v4121_v62, %v4057_v23 }
 0x13b   : > { %v4122_v25 = vpop.f32.mrb[16].mxu1 }
 0x13c   : > { %v4123_v26 = vpop.f32.mrb[17].mxu1 }
 0x13d   : > { %v4058_v18 = vpop.f32.mrb[16].mxu0  ;;  %v4124_v27 = vadd.f32 %v4123_v26, %v4122_v25  ;;  %v4125_v29 = vpop.f32.mrb[18].mxu1 }
 0x13e   : > { %v4059_v43 = vpop.f32.mrb[17].mxu0  ;;  %v4126_v59 = vpop.f32.mrb[19].mxu1 }
 0x13f   : > { %v4060_v31 = vadd.f32 %v4059_v43, %v4058_v18  ;;  %v4061_v16 = vpop.f32.mrb[18].mxu0  ;;  %v4127_v34 = vadd.f32 %v4126_v59, %v4125_v29 }
 0x140   : > { %v4062_v32 = vpop.f32.mrb[19].mxu0 }
 0x141   : > { %v5335_v38 = vadd.f32 %v4124_v27, %v4060_v31  ;;  %v4063_v41 = vadd.f32 %v4062_v32, %v4061_v16 }
 0x143   : > { %v5337_v42 = vadd.f32 %v4127_v34, %v4063_v41 }
 0x146   : > { %v4128_v22 = vpop.f32.mrb[20].mxu1 }
 0x147   : > { %v4129_v46 = vpop.f32.mrb[21].mxu1 }
 0x148   : > { %v4130_v48 = vadd.f32 %v4129_v46, %v4128_v22  ;;  %v4131_v30 = vpop.f32.mrb[22].mxu1 }
 0x149   : > { %v4064_v44 = vpop.f32.mrb[20].mxu0  ;;  %v4132_v50 = vpop.f32.mrb[23].mxu1 }
 0x14a   : > { %v4065_v40 = vpop.f32.mrb[21].mxu0  ;;  %v4133_v47 = vadd.f32 %v4132_v50, %v4131_v30 }
 0x14b   : > { %v4066_v45 = vadd.f32 %v4065_v40, %v4064_v44  ;;  %v4067_v49 = vpop.f32.mrb[22].mxu0 }
 0x14c   : > { %v4068_v28 = vpop.f32.mrb[23].mxu0 }
 0x14d   : > { %v5339_v52 = vadd.f32 %v4130_v48, %v4066_v45  ;;  %v4069_v54 = vadd.f32 %v4068_v28, %v4067_v49 }
 0x14f   : > { %v5341_v56 = vadd.f32 %v4133_v47, %v4069_v54 }
 0x152   : > { %v4134_v60 = vpop.f32.mrb[24].mxu1 }
 0x153   : > { %v4135_v61 = vpop.f32.mrb[25].mxu1 }
 0x154   : > { %v4070_v57 = vpop.f32.mrb[24].mxu0  ;;  %v4136_v3 = vadd.f32 %v4135_v61, %v4134_v60  ;;  %v4137_v5 = vpop.f32.mrb[26].mxu1 }
 0x155   : > { %v4071_v51 = vpop.f32.mrb[25].mxu0  ;;  %v4138_v39 = vpop.f32.mrb[27].mxu1 }
 0x156   : > { %v4072_v36 = vadd.f32 %v4071_v51, %v4070_v57  ;;  %v4073_v4 = vpop.f32.mrb[26].mxu0  ;;  %v4139_v11 = vadd.f32 %v4138_v39, %v4137_v5 }
 0x157   : > { %v4074_v6 = vpop.f32.mrb[27].mxu0 }
 0x158   : > { %v5343_v58 = vadd.f32 %v4136_v3, %v4072_v36  ;;  %v4075_v9 = vadd.f32 %v4074_v6, %v4073_v4 }
 0x15a   : > { %v5345_v12 = vadd.f32 %v4139_v11, %v4075_v9 }
 0x15e   : > { %v4140_v7 = vpop.f32.mrb[28].mxu1 }
 0x15f   : > { %v4141_v55 = vpop.f32.mrb[29].mxu1 }
 0x160   : > { %v4076_v14 = vpop.f32.mrb[28].mxu0  ;;  %v4142_v0 = vadd.f32 %v4141_v55, %v4140_v7  ;;  %v4143_v15 = vpop.f32.mrb[30].mxu1 }
 0x161   : > { %v4077_v17 = vpop.f32.mrb[29].mxu0  ;;  %v4144_v10 = vpop.f32.mrb[31].mxu1 }
 0x162   : > { %v4078_v35 = vadd.f32 %v4077_v17, %v4076_v14  ;;  %v4079_v37 = vpop.f32.mrb[30].mxu0  ;;  %v4145_v62 = vadd.f32 %v4144_v10, %v4143_v15 }
 0x163   : > { %v4080_v1 = vpop.f32.mrb[31].mxu0 }
 0x164   : > { %v5347_v19 = vadd.f32 %v4142_v0, %v4078_v35  ;;  %v4081_v20 = vadd.f32 %v4080_v1, %v4079_v37 }
 0x166   : > { %v5349_v23 = vadd.f32 %v4145_v62, %v4081_v20  ;;  %v4226_v25 = vpop.f32.mrb[32].mxu1 }
 0x167   : > { %v4227_v18 = vpop.f32.mrb[33].mxu1 }
 0x168   : > { %v4228_v26 = vadd.f32 %v4227_v18, %v4226_v25  ;;  %v4229_v43 = vpop.f32.mrb[34].mxu1  ;;  %v4162_v29 = vpop.f32.mrb[32].mxu0 }
 0x169   : > { %v4230_v27 = vpop.f32.mrb[35].mxu1  ;;  %v4163_v16 = vpop.f32.mrb[33].mxu0 }
 0x16a   : > { %v4231_v31 = vadd.f32 %v4230_v27, %v4229_v43  ;;  %v4164_v59 = vadd.f32 %v4163_v16, %v4162_v29  ;;  %v4165_v32 = vpop.f32.mrb[34].mxu0 }
 0x16b   : > { %v4166_v34 = vpop.f32.mrb[35].mxu0 }
 0x16c   : > { %v3243_v41 = vadd.f32 %v4164_v59, %v5319_v33  ;;  %v4167_v22 = vadd.f32 %v4166_v34, %v4165_v32 }
 0x16e   : > { %v4232_v44 = vpop.f32.mrb[36].mxu1  ;;  %v3246_v40 = vadd.f32 %v4167_v22, %v5321_v53  ;;  %v5353_v45 = vadd.f32 %v4228_v26, %v3243_v41 }
 0x16f   : > { %v4233_v46 = vpop.f32.mrb[37].mxu1 }
 0x170   : > { %v4234_v48 = vadd.f32 %v4233_v46, %v4232_v44  ;;  %v4235_v30 = vpop.f32.mrb[38].mxu1  ;;  %v5355_v28 = vadd.f32 %v4231_v31, %v3246_v40 }
 0x171   : > { %v4236_v49 = vpop.f32.mrb[39].mxu1 }
 0x172   : > { %v4237_v50 = vadd.f32 %v4236_v49, %v4235_v30 }
 0x173   : > { %v4168_v47 = vpop.f32.mrb[36].mxu0 }
 0x174   : > { %v4169_v54 = vpop.f32.mrb[37].mxu0 }
 0x175   : > { %v4170_v57 = vadd.f32 %v4169_v54, %v4168_v47  ;;  %v4171_v60 = vpop.f32.mrb[38].mxu0 }
 0x176   : > { %v4172_v51 = vpop.f32.mrb[39].mxu0  ;;  %v4238_v61 = vpop.f32.mrb[40].mxu1 }
 0x177   : > { %v3251_v33 = vadd.f32 %v4170_v57, %v5323_v63  ;;  %v4173_v36 = vadd.f32 %v4172_v51, %v4171_v60  ;;  %v4239_v3 = vpop.f32.mrb[41].mxu1 }
 0x178   : > { %v4240_v4 = vadd.f32 %v4239_v3, %v4238_v61  ;;  %v4241_v53 = vpop.f32.mrb[42].mxu1 }
 0x179   : > { %v3254_v5 = vadd.f32 %v4173_v36, %v5325_v8  ;;  %v4242_v6 = vpop.f32.mrb[43].mxu1  ;;  %v5359_v39 = vadd.f32 %v4234_v48, %v3251_v33 }
 0x17a   : > { %v4243_v9 = vadd.f32 %v4242_v6, %v4241_v53 }
 0x17b   : > { %v5361_v7 = vadd.f32 %v4237_v50, %v3254_v5 }
 0x17c   : > { %v4174_v11 = vpop.f32.mrb[40].mxu0 }
 0x17d   : > { %v4175_v55 = vpop.f32.mrb[41].mxu0 }
 0x17e   : > { %v4176_v14 = vadd.f32 %v4175_v55, %v4174_v11  ;;  %v4177_v0 = vpop.f32.mrb[42].mxu0 }
 0x17f   : > { %v4178_v15 = vpop.f32.mrb[43].mxu0 }
 0x180   : > { %v3259_v17 = vadd.f32 %v4176_v14, %v5327_v13  ;;  %v4179_v63 = vadd.f32 %v4178_v15, %v4177_v0  ;;  %v4244_v10 = vpop.f32.mrb[44].mxu1 }
 0x181   : > { %v4245_v37 = vpop.f32.mrb[45].mxu1 }
 0x182   : > { %v3262_v35 = vadd.f32 %v4179_v63, %v5329_v2  ;;  %v5365_v62 = vadd.f32 %v4240_v4, %v3259_v17  ;;  %v4246_v8 = vadd.f32 %v4245_v37, %v4244_v10  ;;  %v4247_v1 = vpop.f32.mrb[46].mxu1 }
 0x183   : > { %v4248_v20 = vpop.f32.mrb[47].mxu1 }
 0x184   : > { %v5367_v25 = vadd.f32 %v4243_v9, %v3262_v35  ;;  %v4249_v18 = vadd.f32 %v4248_v20, %v4247_v1 }
 0x186   : > { %v4180_v26 = vpop.f32.mrb[44].mxu0 }
 0x187   : > { %v4181_v43 = vpop.f32.mrb[45].mxu0 }
 0x188   : > { %v4182_v27 = vadd.f32 %v4181_v43, %v4180_v26  ;;  %v4183_v29 = vpop.f32.mrb[46].mxu0 }
 0x189   : > { %v4184_v31 = vpop.f32.mrb[47].mxu0 }
 0x18a   : > { %v3267_v13 = vadd.f32 %v4182_v27, %v5331_v21  ;;  %v4185_v16 = vadd.f32 %v4184_v31, %v4183_v29 }
 0x18b   : > { %v4250_v59 = vpop.f32.mrb[48].mxu1 }
 0x18c   : > { %v3270_v2 = vadd.f32 %v4185_v16, %v5333_v24  ;;  %v4251_v32 = vpop.f32.mrb[49].mxu1  ;;  %v5371_v34 = vadd.f32 %v4246_v8, %v3267_v13 }
 0x18d   : > { %v4252_v41 = vadd.f32 %v4251_v32, %v4250_v59  ;;  %v4253_v22 = vpop.f32.mrb[50].mxu1 }
 0x18e   : > { %v4254_v44 = vpop.f32.mrb[51].mxu1  ;;  %v5373_v46 = vadd.f32 %v4249_v18, %v3270_v2 }
 0x18f   : > { %v4255_v40 = vadd.f32 %v4254_v44, %v4253_v22 }
 0x190   : > { %v4186_v48 = vpop.f32.mrb[48].mxu0 }
 0x191   : > { %v4187_v30 = vpop.f32.mrb[49].mxu0 }
 0x192   : > { %v4188_v49 = vadd.f32 %v4187_v30, %v4186_v48  ;;  %v4189_v50 = vpop.f32.mrb[50].mxu0 }
 0x193   : > { %v4190_v47 = vpop.f32.mrb[51].mxu0 }
 0x194   : > { %v3275_v21 = vadd.f32 %v4188_v49, %v5335_v38  ;;  %v4191_v54 = vadd.f32 %v4190_v47, %v4189_v50 }
 0x195   : > { %v4256_v57 = vpop.f32.mrb[52].mxu1 }
 0x196   : > { %v3278_v24 = vadd.f32 %v4191_v54, %v5337_v42  ;;  %v4257_v60 = vpop.f32.mrb[53].mxu1  ;;  %v5377_v51 = vadd.f32 %v4252_v41, %v3275_v21 }
 0x197   : > { %v4258_v61 = vadd.f32 %v4257_v60, %v4256_v57  ;;  %v4259_v33 = vpop.f32.mrb[54].mxu1 }
 0x198   : > { %v4260_v36 = vpop.f32.mrb[55].mxu1  ;;  %v5379_v3 = vadd.f32 %v4255_v40, %v3278_v24 }
 0x199   : > { %v4261_v4 = vadd.f32 %v4260_v36, %v4259_v33 }
 0x19b   : > { %v4192_v53 = vpop.f32.mrb[52].mxu0 }
 0x19c   : > { %v4193_v5 = vpop.f32.mrb[53].mxu0 }
 0x19d   : > { %v4194_v6 = vadd.f32 %v4193_v5, %v4192_v53  ;;  %v4195_v9 = vpop.f32.mrb[54].mxu0 }
 0x19e   : > { %v4196_v11 = vpop.f32.mrb[55].mxu0 }
 0x19f   : > { %v3283_v38 = vadd.f32 %v4194_v6, %v5339_v52  ;;  %v4197_v55 = vadd.f32 %v4196_v11, %v4195_v9 }
 0x1a1   : > { %v3286_v14 = vadd.f32 %v4197_v55, %v5341_v56  ;;  %v5383_v42 = vadd.f32 %v4258_v61, %v3283_v38 }
 0x1a3   : > { %v5385_v0 = vadd.f32 %v4261_v4, %v3286_v14  ;;  %v4262_v15 = vpop.f32.mrb[56].mxu1 }
 0x1a4   : > { %v4263_v63 = vpop.f32.mrb[57].mxu1 }
 0x1a5   : > { %v4198_v17 = vpop.f32.mrb[56].mxu0  ;;  %v4264_v35 = vadd.f32 %v4263_v63, %v4262_v15  ;;  %v4265_v37 = vpop.f32.mrb[58].mxu1 }
 0x1a6   : > { %v4199_v10 = vpop.f32.mrb[57].mxu0  ;;  %v4266_v20 = vpop.f32.mrb[59].mxu1 }
 0x1a7   : > { %v4200_v8 = vadd.f32 %v4199_v10, %v4198_v17  ;;  %v4201_v1 = vpop.f32.mrb[58].mxu0  ;;  %v4267_v26 = vadd.f32 %v4266_v20, %v4265_v37 }
 0x1a8   : > { %v4202_v18 = vpop.f32.mrb[59].mxu0 }
 0x1a9   : > { %v3291_v52 = vadd.f32 %v4200_v8, %v5343_v58  ;;  %v4203_v43 = vadd.f32 %v4202_v18, %v4201_v1 }
 0x1ab   : > { %v3294_v56 = vadd.f32 %v4203_v43, %v5345_v12  ;;  %v5389_v27 = vadd.f32 %v4264_v35, %v3291_v52 }
 0x1ad   : > { %v5391_v29 = vadd.f32 %v4267_v26, %v3294_v56 }
 0x1af   : > { %v4204_v31 = vpop.f32.mrb[60].mxu0 }
 0x1b0   : > { %v4205_v13 = vpop.f32.mrb[61].mxu0 }
 0x1b1   : > { %v4206_v16 = vadd.f32 %v4205_v13, %v4204_v31  ;;  %v4207_v59 = vpop.f32.mrb[62].mxu0 }
 0x1b2   : > { %v4208_v2 = vpop.f32.mrb[63].mxu0 }
 0x1b3   : > { %v3299_v32 = vadd.f32 %v4206_v16, %v5347_v19  ;;  %v4209_v41 = vadd.f32 %v4208_v2, %v4207_v59 }
 0x1b5   : > { %v3302_v22 = vadd.f32 %v4209_v41, %v5349_v23 }
 0x1b7   : > { %v4308_v44 = vpop.f32.mrb[64].mxu0 }
 0x1b8   : > { %v3445_v58 = vadd.f32 %v4308_v44, %v5359_v39  ;;  %v3436_v40 = vpop.f32.mrb[65].mxu0 }
 0x1b9   : > { %v3437_v12 = vadd.f32 %v3436_v40, %v5353_v45  ;;  %v4309_v19 = vpop.f32.mrb[66].mxu0 }
 0x1ba   : > { %3501 = vst [vmem:[%s5401_s17 + $0x10] sm:$0xff] %v3445_v58  ;;  %v3448_v23 = vadd.f32 %v4309_v19, %v5361_v7  ;;  %v3439_v48 = vpop.f32.mrb[67].mxu0  ;;  %v3538_v47 = vmul.f32 %v3445_v58, %v3445_v58 }
 0x1bb   : > { %3499 = vst [vmem:[%s5401_s17] sm:$0xff] %v3437_v12  ;;  %v3440_v39 = vadd.f32 %v3439_v48, %v5355_v28  ;;  %v3536_v30 = vmul.f32 %v3437_v12, %v3437_v12 }
 0x1bc   : > { %3502 = vst [vmem:[%s5401_s17 + $0x18] sm:$0xff] %v3448_v23  ;;  %v3539_v57 = vmul.f32 %v3448_v23, %v3448_v23 }
 0x1bd   : > { %3500 = vst [vmem:[%s5401_s17 + $0x8] sm:$0xff] %v3440_v39  ;;  %v3515_v49 = vadd.f32 %v3440_v39, %v3437_v12  ;;  %v3537_v50 = vmul.f32 %v3440_v39, %v3440_v39 }
 0x1bf   : > { %v3516_v21 = vadd.f32 %v3515_v49, %v3445_v58  ;;  %v3552_v54 = vadd.f32 %v3537_v50, %v3536_v30  ;;  %v4312_v45 = vpop.f32.mrb[68].mxu0 }
 0x1c0   : > { %v3461_v7 = vadd.f32 %v4312_v45, %v5371_v34  ;;  %v3452_v33 = vpop.f32.mrb[69].mxu0 }
 0x1c1   : > { %v3553_v24 = vadd.f32 %v3552_v54, %v3538_v47  ;;  %v3517_v60 = vadd.f32 %v3516_v21, %v3448_v23  ;;  %v3453_v28 = vadd.f32 %v3452_v33, %v5365_v62  ;;  %v4313_v53 = vpop.f32.mrb[70].mxu0 }
 0x1c2   : > { %3505 = vst [vmem:[%s5401_s17 + $0x30] sm:$0xff] %v3461_v7  ;;  %v3464_v9 = vadd.f32 %v4313_v53, %v5373_v46  ;;  %v3455_v11 = vpop.f32.mrb[71].mxu0  ;;  %v3542_v37 = vmul.f32 %v3461_v7, %v3461_v7 }
 0x1c3   : > { %v4268_v61 = vpop.f32.mrb[60].mxu1  ;;  %v3554_v4 = vadd.f32 %v3553_v24, %v3539_v57  ;;  %3503 = vst [vmem:[%s5401_s17 + $0x20] sm:$0xff] %v3453_v28  ;;  %v3518_v55 = vadd.f32 %v3517_v60, %v3453_v28  ;;  %v3540_v14 = vmul.f32 %v3453_v28, %v3453_v28  ;;  %v3456_v34 = vadd.f32 %v3455_v11, %v5367_v25 }
 0x1c4   : > { %v4269_v36 = vpop.f32.mrb[61].mxu1  ;;  %3506 = vst [vmem:[%s5401_s17 + $0x38] sm:$0xff] %v3464_v9  ;;  %v3543_v25 = vmul.f32 %v3464_v9, %v3464_v9 }
 0x1c5   : > { %v4270_v5 = vadd.f32 %v4269_v36, %v4268_v61  ;;  %v4271_v6 = vpop.f32.mrb[62].mxu1  ;;  %v3555_v63 = vadd.f32 %v3554_v4, %v3540_v14  ;;  %3504 = vst [vmem:[%s5401_s17 + $0x28] sm:$0xff] %v3456_v34  ;;  %v3519_v62 = vadd.f32 %v3518_v55, %v3456_v34  ;;  %v3541_v10 = vmul.f32 %v3456_v34, %v3456_v34 }
 0x1c6   : > { %v4272_v38 = vpop.f32.mrb[63].mxu1 }
 0x1c7   : > { %v4273_v15 = vadd.f32 %v4272_v38, %v4271_v6  ;;  %v3396_v17 = vadd.f32 %v4270_v5, %v3299_v32  ;;  %v3520_v8 = vadd.f32 %v3519_v62, %v3461_v7  ;;  %v3556_v46 = vadd.f32 %v3555_v63, %v3541_v10 }
 0x1c9   : > { %v3399_v35 = vadd.f32 %v4273_v15, %v3302_v22  ;;  %v3521_v26 = vadd.f32 %v3520_v8, %v3464_v9  ;;  %v3557_v52 = vadd.f32 %v3556_v46, %v3542_v37 }
 0x1cb   : > { %v4316_v1 = vpop.f32.mrb[64].mxu1  ;;  %v3558_v16 = vadd.f32 %v3557_v52, %v3543_v25 }
 0x1cc   : > { %v3477_v20 = vadd.f32 %v4316_v1, %v5383_v42  ;;  %v3468_v18 = vpop.f32.mrb[65].mxu1 }
 0x1cd   : > { %v3469_v43 = vadd.f32 %v3468_v18, %v5377_v51  ;;  %v4317_v56 = vpop.f32.mrb[66].mxu1 }
 0x1ce   : > { %3509 = vst [vmem:[%s5401_s17 + $0x50] sm:$0xff] %v3477_v20  ;;  %v3480_v31 = vadd.f32 %v4317_v56, %v5385_v0  ;;  %v3471_v13 = vpop.f32.mrb[67].mxu1  ;;  %v3546_v44 = vmul.f32 %v3477_v20, %v3477_v20 }
 0x1cf   : > { %3507 = vst [vmem:[%s5401_s17 + $0x40] sm:$0xff] %v3469_v43  ;;  %v3544_v59 = vmul.f32 %v3469_v43, %v3469_v43  ;;  %v3472_v2 = vadd.f32 %v3471_v13, %v5379_v3  ;;  %v3522_v32 = vadd.f32 %v3521_v26, %v3469_v43 }
 0x1d0   : > { %3510 = vst [vmem:[%s5401_s17 + $0x58] sm:$0xff] %v3480_v31  ;;  %v3547_v19 = vmul.f32 %v3480_v31, %v3480_v31 }
 0x1d1   : > { %3508 = vst [vmem:[%s5401_s17 + $0x48] sm:$0xff] %v3472_v2  ;;  %v3545_v42 = vmul.f32 %v3472_v2, %v3472_v2  ;;  %v3523_v41 = vadd.f32 %v3522_v32, %v3472_v2  ;;  %v3559_v22 = vadd.f32 %v3558_v16, %v3544_v59 }
 0x1d3   : > { %v4320_v51 = vpop.f32.mrb[68].mxu1  ;;  %v3524_v58 = vadd.f32 %v3523_v41, %v3477_v20  ;;  %v3560_v40 = vadd.f32 %v3559_v22, %v3545_v42 }
 0x1d4   : > { %v3493_v0 = vadd.f32 %v4320_v51, %v3396_v17  ;;  %v3484_v12 = vpop.f32.mrb[69].mxu1 }
 0x1d5   : > { %v3485_v23 = vadd.f32 %v3484_v12, %v5389_v27  ;;  %v4321_v3 = vpop.f32.mrb[70].mxu1  ;;  %v3525_v48 = vadd.f32 %v3524_v58, %v3480_v31  ;;  %v3561_v39 = vadd.f32 %v3560_v40, %v3546_v44 }
 0x1d6   : > { %3513 = vst [vmem:[%s5401_s17 + $0x70] sm:$0xff] %v3493_v0  ;;  %v3496_v30 = vadd.f32 %v4321_v3, %v3399_v35  ;;  %v3487_v49 = vpop.f32.mrb[71].mxu1  ;;  %v3550_v45 = vmul.f32 %v3493_v0, %v3493_v0 }
 0x1d7   : > { %3511 = vst [vmem:[%s5401_s17 + $0x60] sm:$0xff] %v3485_v23  ;;  %v3548_v50 = vmul.f32 %v3485_v23, %v3485_v23  ;;  %v3488_v47 = vadd.f32 %v3487_v49, %v5391_v29  ;;  %v3526_v21 = vadd.f32 %v3525_v48, %v3485_v23  ;;  %v3562_v54 = vadd.f32 %v3561_v39, %v3547_v19 }
 0x1d8   : > { %3514 = vst [vmem:[%s5401_s17 + $0x78] sm:$0xff] %v3496_v30  ;;  %v3551_v7 = vmul.f32 %v3496_v30, %v3496_v30 }
 0x1d9   : > { %3512 = vst [vmem:[%s5401_s17 + $0x68] sm:$0xff] %v3488_v47  ;;  %v3549_v57 = vmul.f32 %v3488_v47, %v3488_v47  ;;  %v3527_v24 = vadd.f32 %v3526_v21, %v3488_v47  ;;  %v3563_v27 = vadd.f32 %v3562_v54, %v3548_v50 }
 0x1db   : > { %v3528_v60 = vadd.f32 %v3527_v24, %v3493_v0  ;;  %v3564_v61 = vadd.f32 %v3563_v27, %v3549_v57 }
 0x1dd   : > { %v3529_v33 = vadd.f32 %v3528_v60, %v3496_v30  ;;  %v3565_v36 = vadd.f32 %v3564_v61, %v3550_v45 }
 0x1df   : > { %v3530_v28 = vrot.slane %v3529_v33, 4  ;;  %v3566_v4 = vadd.f32 %v3565_v36, %v3551_v7 }
 0x1e1   : > { %v3531_v29 = vadd.f32 %v3530_v28, %v3529_v33  ;;  %v3567_v53 = vrot.slane %v3566_v4, 4 }
 0x1e3   : > { %v3532_v5 = vrot.slane %v3531_v29, 2  ;;  %v3568_v6 = vadd.f32 %v3567_v53, %v3566_v4 }
 0x1e5   : > { %v3533_v9 = vadd.f32 %v3532_v5, %v3531_v29  ;;  %v3569_v11 = vrot.slane %v3568_v6, 2 }
 0x1e7   : > { %v3534_v38 = vrot.slane %v3533_v9, 1  ;;  %v3570_v55 = vadd.f32 %v3569_v11, %v3568_v6 }
 0x1e9   : > { %v3571_v14 = vrot.slane %v3570_v55, 1  ;;  %v3535_v34 = vadd.f32 %v3534_v38, %v3533_v9 }
 0x1eb   : > { %v3572_v15 = vadd.f32 %v3571_v14, %v3570_v55 }
 0x1ed   : > { %v3574_v17 = vsel %vm824_vm4, %v3535_v34, %v3572_v15 }
 0x1ee   : > { %3575 = vst [vmem:[%s467_s11] sm:$0x3] %v3574_v17 }
 0x1ef PF: > { %s18_s28 = sadd.s32 1, %s4517_s28   ;;  %s5478_s24 = smov %s4509_s26 }
 0x1f0   : > { %p15_p12 = scmp.ge.s32.totalorder %s18_s28, 6   ;;  %s5479_s25 = smov %s4513_s27 }
 0x1f1   : > { %s5480_s26 = smov %s5483_s29  ;;  %s5481_s27 = smov %s5487_s30 }
 0x1f2   :  { %17 = sbr.rel (!%p15_p12) target bundleno = 3 (0x3), region = 95 }

</bundles_post_ra>
